<compile_context>
chip_gen: v7x
topology: tpu7x:2x2x1
jax: 0.10.0
libtpu: 0.0.40
codegen_flags: <defaults>
</compile_context>

<pallas_src>
import functools

import numpy as np
import jax
import jax.numpy as jnp
from jax.experimental import pallas as pl
from jax.experimental.pallas import tpu as pltpu

F32 = jnp.float32
BF16 = jnp.bfloat16
LRELU = 0.2    # nn.LeakyReLU(0.2)
PRELU = 0.25   # nn.PReLU() default init
VMEM_LIMIT = 32 * 1024 * 1024

# ----------------------------------------------------------------------------
# Deterministic synthetic parameters (NOT a checkpoint load)
# ----------------------------------------------------------------------------
_RNG = np.random.default_rng(0)


def _w_init(shape, fan_in):
    w = _RNG.normal(0.0, 0.3 / np.sqrt(fan_in), size=shape).astype(np.float32)
    return jnp.asarray(w).astype(BF16)


def _b_init(n):
    return jnp.asarray(_RNG.normal(0.0, 0.01, size=(1, n)).astype(np.float32))


def _zeros_b(n):
    return jnp.zeros((1, n), jnp.float32)


def _pick_tile(m, cap=512):
    if m <= cap:
        return m
    for t in (512, 256, 128, 64, 32, 16, 8):
        if m % t == 0:
            return t
    return m


# ----------------------------------------------------------------------------
# Kernel A: split-K fused matmul  out = act(sum_g piece_g @ w_g + b) [+ residual]
# ----------------------------------------------------------------------------
def _matmul_pieces_call(pieces, weights, bias, residual, slope, out_dtype):
    M = pieces[0].shape[0]
    N = weights[0].shape[1]
    n_p = len(pieces)
    has_res = residual is not None
    tm = _pick_tile(M)
    grid = (M // tm,) if M % tm == 0 else (1,)
    if grid == (1,):
        tm = M

    def kern(*refs):
        p_refs = refs[0:n_p]
        w_refs = refs[n_p:2 * n_p]
        b_ref = refs[2 * n_p]
        pos = 2 * n_p + 1
        res_ref = refs[pos] if has_res else None
        o_ref = refs[pos + (1 if has_res else 0)]

        acc = jnp.dot(p_refs[0][...], w_refs[0][...],
                      preferred_element_type=jnp.float32)
        for g in range(1, n_p):
            acc = acc + jnp.dot(p_refs[g][...], w_refs[g][...],
                                preferred_element_type=jnp.float32)
        acc = acc + b_ref[...]
        if slope is not None:
            acc = jnp.where(acc >= 0, acc, slope * acc)
        if has_res:
            acc = acc + res_ref[...].astype(jnp.float32)
        o_ref[...] = acc.astype(o_ref.dtype)

    in_specs = []
    for p in pieces:
        kg = p.shape[1]
        in_specs.append(pl.BlockSpec((tm, kg), lambda i: (i, 0)))
    for w in weights:
        kg = w.shape[0]
        in_specs.append(pl.BlockSpec((kg, N), lambda i: (0, 0)))
    in_specs.append(pl.BlockSpec((1, N), lambda i: (0, 0)))
    args = list(pieces) + list(weights) + [bias]
    if has_res:
        in_specs.append(pl.BlockSpec((tm, N), lambda i: (i, 0)))
        args.append(residual)

    return pl.pallas_call(
        kern,
        out_shape=jax.ShapeDtypeStruct((M, N), out_dtype),
        grid=grid,
        in_specs=in_specs,
        out_specs=pl.BlockSpec((tm, N), lambda i: (i, 0)),
        compiler_params=pltpu.CompilerParams(
            dimension_semantics=("parallel",),
            vmem_limit_bytes=VMEM_LIMIT),
    )(*args)


# ----------------------------------------------------------------------------
# Kernel B: direct stride-1 3x3 conv (multi-dilation branches, fused epilogue)
# ----------------------------------------------------------------------------
def _conv3x3_call(xp, ws, bs, dils, offs, residual, Ho, Wo, slope, out_dtype):
    B, Hp, Wp, Cin = xp.shape
    n_br = len(ws)
    couts = tuple(int(w.shape[2]) for w in ws)
    has_res = residual is not None

    tmr = Ho if (Ho * Wo <= 512 or (Ho % 2) != 0) else Ho // 2
    n_row = Ho // tmr
    Mblk = tmr * Wo

    def kern(*refs):
        x_ref = refs[0]
        w_refs = refs[1:1 + n_br]
        b_refs = refs[1 + n_br:1 + 2 * n_br]
        pos = 1 + 2 * n_br
        res_ref = refs[pos] if has_res else None
        pos += 1 if has_res else 0
        o_refs = refs[pos:pos + n_br]

        m = pl.program_id(1)
        for g in range(n_br):
            d, off, cout = dils[g], offs[g], couts[g]
            acc = None
            for ky in range(3):
                r0 = m * tmr + off + ky * d
                for kx in range(3):
                    c0 = off + kx * d
                    win = x_ref[0, pl.ds(r0, tmr), c0:c0 + Wo, :]
                    contrib = jnp.dot(win.reshape(Mblk, Cin),
                                      w_refs[g][ky * 3 + kx],
                                      preferred_element_type=jnp.float32)
                    acc = contrib if acc is None else acc + contrib
            acc = acc + b_refs[g][...]
            if slope is not None:
                acc = jnp.where(acc >= 0, acc, slope * acc)
            if has_res and g == 0:
                acc = acc + res_ref[0].astype(jnp.float32)
            o_refs[g][0] = acc.astype(o_refs[g].dtype)

    in_specs = [pl.BlockSpec((1, Hp, Wp, Cin), lambda b, m: (b, 0, 0, 0))]
    for g in range(n_br):
        in_specs.append(pl.BlockSpec((9, Cin, couts[g]), lambda b, m: (0, 0, 0)))
    for g in range(n_br):
        in_specs.append(pl.BlockSpec((1, couts[g]), lambda b, m: (0, 0)))
    args = [xp] + list(ws) + list(bs)
    if has_res:
        in_specs.append(pl.BlockSpec((1, Mblk, couts[0]), lambda b, m: (b, m, 0)))
        args.append(residual)

    out_shape = [jax.ShapeDtypeStruct((B, Ho * Wo, couts[g]), out_dtype)
                 for g in range(n_br)]
    out_specs = [pl.BlockSpec((1, Mblk, couts[g]), lambda b, m: (b, m, 0))
                 for g in range(n_br)]

    outs = pl.pallas_call(
        kern,
        out_shape=out_shape,
        grid=(B, n_row),
        in_specs=in_specs,
        out_specs=out_specs,
        compiler_params=pltpu.CompilerParams(
            dimension_semantics=("parallel", "parallel"),
            vmem_limit_bytes=VMEM_LIMIT),
    )(*args)
    return list(outs)


# ----------------------------------------------------------------------------
# Small elementwise / reduction kernels for SKFF
# ----------------------------------------------------------------------------
def _gap_sum_call(x1, x2):
    """(B, HW, C) x2 -> (B, 1, C) f32 mean of (x1 + x2)."""
    B, HW, C = x1.shape
    inv = 1.0 / float(HW)

    def kern(a_ref, b_ref, o_ref):
        s = a_ref[0].astype(jnp.float32) + b_ref[0].astype(jnp.float32)
        o_ref[0] = jnp.sum(s, axis=0, keepdims=True) * inv

    return pl.pallas_call(
        kern,
        out_shape=jax.ShapeDtypeStruct((B, 1, C), jnp.float32),
        grid=(B,),
        in_specs=[pl.BlockSpec((1, HW, C), lambda b: (b, 0, 0)),
                  pl.BlockSpec((1, HW, C), lambda b: (b, 0, 0))],
        out_specs=pl.BlockSpec((1, 1, C), lambda b: (b, 0, 0)),
        compiler_params=pltpu.CompilerParams(
            dimension_semantics=("parallel",),
            vmem_limit_bytes=VMEM_LIMIT),
    )(x1, x2)


def _skff_combine_call(x1, x2, z):
    """x1,x2: (B,HW,C) bf16 ; z: (B,1,2C) f32 -> softmax-weighted sum (B,HW,C)."""
    B, HW, C = x1.shape

    def kern(a_ref, b_ref, z_ref, o_ref):
        z1 = z_ref[0, :, 0:C]
        z2 = z_ref[0, :, C:2 * C]
        m = jnp.maximum(z1, z2)
        e1 = jnp.exp(z1 - m)
        e2 = jnp.exp(z2 - m)
        inv = pl.reciprocal(e1 + e2, approx=True)
        a1 = e1 * inv
        a2 = e2 * inv
        o_ref[0] = (a_ref[0].astype(jnp.float32) * a1 +
                    b_ref[0].astype(jnp.float32) * a2).astype(o_ref.dtype)

    return pl.pallas_call(
        kern,
        out_shape=jax.ShapeDtypeStruct((B, HW, C), x1.dtype),
        grid=(B,),
        in_specs=[pl.BlockSpec((1, HW, C), lambda b: (b, 0, 0)),
                  pl.BlockSpec((1, HW, C), lambda b: (b, 0, 0)),
                  pl.BlockSpec((1, 1, 2 * C), lambda b: (b, 0, 0))],
        out_specs=pl.BlockSpec((1, HW, C), lambda b: (b, 0, 0)),
        compiler_params=pltpu.CompilerParams(
            dimension_semantics=("parallel",),
            vmem_limit_bytes=VMEM_LIMIT),
    )(x1, x2, z)


# ----------------------------------------------------------------------------
# JIT'd layer wrappers (JAX glue: padding, flattening, phase packing)
# ----------------------------------------------------------------------------
@functools.partial(jax.jit, static_argnames=("dils", "pad_mode", "slope", "out_dtype"))
def conv3x3_apply(x, ws, bs, residual, *, dils, pad_mode, slope, out_dtype):
    B, H, W, Cin = x.shape
    x = x.astype(BF16)
    P = max(dils)                      # pad = dilation for k=3
    mode = "reflect" if pad_mode == "reflect" else "constant"
    xp = jnp.pad(x, ((0, 0), (P, P), (P, P), (0, 0)), mode=mode)
    Ho, Wo = H, W
    offs = tuple(P - d for d in dils)
    res2 = None
    if residual is not None:
        res2 = residual.reshape(B, H * W, residual.shape[-1])

    if Wo % 8 == 0:
        outs = _conv3x3_call(xp, ws, bs, dils, offs, res2, Ho, Wo, slope, out_dtype)
    else:
        # Tiny-spatial fallback (e.g. 4x4): split-K matmul over the 9 taps.
        outs = []
        for g in range(len(ws)):
            d, off = dils[g], offs[g]
            pieces, wsl = [], []
            for ky in range(3):
                for kx in range(3):
                    sl = xp[:, off + ky * d: off + ky * d + Ho,
                            off + kx * d: off + kx * d + Wo, :]
                    pieces.append(sl.reshape(B * Ho * Wo, Cin))
                    wsl.append(ws[g][ky * 3 + kx])
            r = (res2.reshape(B * Ho * Wo, -1)
                 if (res2 is not None and g == 0) else None)
            o = _matmul_pieces_call(tuple(pieces), tuple(wsl), bs[g], r,
                                    slope, out_dtype)
            outs.append(o.reshape(B, Ho * Wo, -1))

    outs = [o.reshape(B, H, W, -1) for o in outs]
    return outs if len(outs) > 1 else outs[0]


@functools.partial(jax.jit, static_argnames=("slope", "out_dtype"))
def pointwise_conv(pieces, weights, bias, residual=None, *, slope=None,
                   out_dtype=BF16):
    B, H, W, _ = pieces[0].shape
    ps = tuple(p.astype(BF16).reshape(B * H * W, p.shape[-1]) for p in pieces)
    r = (residual.reshape(B * H * W, residual.shape[-1])
         if residual is not None else None)
    out = _matmul_pieces_call(ps, weights, bias, r, slope, out_dtype)
    return out.reshape(B, H, W, -1)


@functools.partial(jax.jit, static_argnames=("pad_mode", "slope", "out_dtype"))
def conv3x3_s2(x, w, bias, *, pad_mode, slope=None, out_dtype=BF16):
    """3x3 / stride-2 / pad-1 conv as a split-K matmul over 9 strided tap slices."""
    B, H, W, Cin = x.shape
    x = x.astype(BF16)
    mode = "reflect" if pad_mode == "reflect" else "constant"
    xp = jnp.pad(x, ((0, 0), (1, 1), (1, 1), (0, 0)), mode=mode)
    Ho = (H - 1) // 2 + 1
    Wo = (W - 1) // 2 + 1
    pieces, wsl = [], []
    for ky in range(3):
        for kx in range(3):
            sl = xp[:, ky: ky + 2 * (Ho - 1) + 1: 2,
                    kx: kx + 2 * (Wo - 1) + 1: 2, :]
            pieces.append(sl.reshape(B * Ho * Wo, Cin))
            wsl.append(w[ky * 3 + kx])
    out = _matmul_pieces_call(tuple(pieces), tuple(wsl), bias, None, slope,
                              out_dtype)
    return out.reshape(B, Ho, Wo, -1)


@functools.partial(jax.jit, static_argnames=("slope", "out_dtype"))
def conv_transpose_s2(x, wbig, bias4, *, slope=None, out_dtype=BF16):
    """ConvTranspose2d(k=3,s=2,p=1,op=1) via sub-pixel phase decomposition."""
    B, H, W, Cin = x.shape
    Cout = wbig.shape[1] // 4
    x = x.astype(BF16)
    xp = jnp.pad(x, ((0, 0), (0, 1), (0, 1), (0, 0)))
    pieces = tuple(xp[:, a:a + H, b:b + W, :].reshape(B * H * W, Cin)
                   for a in (0, 1) for b in (0, 1))
    wsl = tuple(wbig[(a * 2 + b) * Cin:(a * 2 + b + 1) * Cin, :]
                for a in (0, 1) for b in (0, 1))
    out = _matmul_pieces_call(pieces, wsl, bias4, None, slope, out_dtype)
    out = out.reshape(B, H, W, 2, 2, Cout)
    out = out.transpose(0, 1, 3, 2, 4, 5).reshape(B, 2 * H, 2 * W, Cout)
    return out


@jax.jit
def gap_sum(x1, x2):
    B, H, W, C = x1.shape
    return _gap_sum_call(x1.astype(BF16).reshape(B, H * W, C),
                         x2.astype(BF16).reshape(B, H * W, C))


@jax.jit
def skff_fuse(x1, x2, z):
    B, H, W, C = x1.shape
    o = _skff_combine_call(x1.astype(BF16).reshape(B, H * W, C),
                           x2.astype(BF16).reshape(B, H * W, C), z)
    return o.reshape(B, H, W, C)


# ----------------------------------------------------------------------------
# Parameterized layers
# ----------------------------------------------------------------------------
class Conv3x3:
    """Stride-1 3x3 conv; multiple dilation branches share one fused kernel."""

    def __init__(self, cin, couts, dils=(1,), pad_mode="reflect"):
        self.ws = tuple(_w_init((9, cin, co), cin * 9) for co in couts)
        self.bs = tuple(_b_init(co) for co in couts)
        self.dils = tuple(dils)
        self.pad_mode = pad_mode

    def __call__(self, x, slope=None, residual=None, out_dtype=BF16):
        return conv3x3_apply(x, self.ws, self.bs, residual,
                             dils=self.dils, pad_mode=self.pad_mode,
                             slope=slope, out_dtype=out_dtype)


class ConvTranspose2dLayer:
    """nn.ConvTranspose2d(cin, cout, 3, stride=2, padding=1, output_padding=1)."""

    def __init__(self, cin, cout):
        w = _RNG.normal(0.0, 0.3 / np.sqrt(cin * 9),
                        size=(3, 3, cin, cout)).astype(np.float32)
        wbig = np.zeros((4 * cin, 4 * cout), np.float32)
        for py in (0, 1):
            for px in (0, 1):
                col = (py * 2 + px) * cout
                for a in (0, 1):
                    for b in (0, 1):
                        ky = py + 1 - 2 * a
                        kx = px + 1 - 2 * b
                        if 0 <= ky < 3 and 0 <= kx < 3:
                            row = (a * 2 + b) * cin
                            wbig[row:row + cin, col:col + cout] = w[ky, kx]
        self.w = jnp.asarray(wbig).astype(BF16)
        b = _RNG.normal(0.0, 0.01, size=(cout,)).astype(np.float32)
        self.b = jnp.asarray(np.tile(b, 4)[None, :])

    def __call__(self, x, slope=None, out_dtype=BF16):
        return conv_transpose_s2(x, self.w, self.b, slope=slope,
                                 out_dtype=out_dtype)


class Downsample:
    # TODO(synk): `downsample` is not defined in the provided MSFN.py excerpt;
    #             using Conv2d(cin, cout, 3, stride=2, padding=1) as a stand-in.
    def __init__(self, cin, cout):
        self.w = _w_init((9, cin, cout), cin * 9)
        self.b = _b_init(cout)

    def __call__(self, x):
        return conv3x3_s2(x, self.w, self.b, pad_mode="constant")


class Upsample:
    # TODO(synk): `upsample` is not defined in the provided MSFN.py excerpt;
    #             using ConvTranspose2d(cin, cout, 3, stride=2, padding=1, output_padding=1).
    def __init__(self, cin, cout):
        self.deconv = ConvTranspose2dLayer(cin, cout)

    def __call__(self, x):
        return self.deconv(x)


# ----------------------------------------------------------------------------
# MSFN blocks (mirroring the PyTorch forward semantics)
# ----------------------------------------------------------------------------
class ResBlock:
    def __init__(self, ch, k=3):
        self.ch = ch
        self.conv0 = Conv3x3(ch, (ch,), dils=(1,))
        self.conv1 = Conv3x3(ch, (ch // 2, ch // 2), dils=(2, 3))   # conv1_1 + conv1_2 fused
        w21 = _w_init((2 * ch, ch), 2 * ch)
        self.w21 = (w21[:ch], w21[ch:ch + ch // 2], w21[ch + ch // 2:])
        self.b21 = _b_init(ch)
        self.conv2 = Conv3x3(ch, (ch,), dils=(1,))
        self.conv3 = Conv3x3(ch, (ch,), dils=(1,))

    def __call__(self, x):
        t = self.conv0(x, slope=LRELU)
        t2, t3 = self.conv1(t, slope=LRELU)
        y = pointwise_conv((t, t2, t3), self.w21, self.b21)   # cat([t,t2,t3]) fused as split-K
        y = self.conv2(y, slope=LRELU)
        return self.conv3(y, slope=LRELU, residual=x)          # x + t fused in epilogue


class DenseBlock:
    # TODO(synk): `TA` is not defined in the provided MSFN.py excerpt; treated as identity.
    def __init__(self, num=4, ch=128):
        self.blocks = [ResBlock(ch) for _ in range(num)]
        w = _w_init((num * ch, ch), num * ch)
        self.w_lff = tuple(w[i * ch:(i + 1) * ch] for i in range(num))
        self.b_lff = _b_init(ch)

    def __call__(self, x):
        res = []
        ox = x
        for blk in self.blocks:
            x = blk(x)
            res.append(x)
        # LFF over cat(res) fused as split-K; residual (+ox) fused in epilogue
        return pointwise_conv(tuple(res), self.w_lff, self.b_lff, residual=ox)


class SKFF:
    def __init__(self, in_channels, height=2, reduction=8):
        d = max(int(in_channels / reduction), 4)
        self.C = in_channels
        self.w_du = _w_init((in_channels, d), in_channels)     # bias=False
        self.b_du = _zeros_b(d)
        self.w_fcs = _w_init((d, 2 * in_channels), d)          # fcs[0] | fcs[1] fused
        self.b_fcs = _zeros_b(2 * in_channels)

    def __call__(self, x1, x2):
        B, H, W, C = x1.shape
        s = gap_sum(x1, x2)                                    # (B,1,C) mean of (x1+x2)
        s4 = s.reshape(B, 1, 1, C)
        z_d = pointwise_conv((s4,), (self.w_du,), self.b_du, slope=PRELU,
                             out_dtype=F32)
        z = pointwise_conv((z_d,), (self.w_fcs,), self.b_fcs, out_dtype=F32)
        z = z.reshape(B, 1, 2 * C)
        return skff_fuse(x1, x2, z)


class ScaleBlock1:
    def __init__(self, typ, in_ch=128, out_ch=128):
        self.scale = Upsample(in_ch, out_ch) if typ == "up" else Downsample(in_ch, out_ch)
        self.skff = SKFF(in_ch)
        self.dense = DenseBlock(4, in_ch)

    def __call__(self, x1, x2):
        x2 = self.scale(x2)
        return self.dense(self.skff(x1, x2))


class MSFB:
    def __init__(self, block_num=3, in_ch=128, out_ch=128):
        self.block_num = block_num
        self.scale1 = Downsample(in_ch, in_ch)
        self.scale2 = Upsample(in_ch, out_ch)
        self.conv1 = [DenseBlock(4, in_ch)] + \
                     [ScaleBlock1("up", in_ch, out_ch) for _ in range(block_num - 1)]
        self.conv2 = [DenseBlock(4, in_ch)] + \
                     [ScaleBlock1("down", in_ch, out_ch) for _ in range(block_num - 1)]
        w = _w_init((2 * in_ch, out_ch), 2 * in_ch)
        self.w_att = (w[:in_ch], w[in_ch:])
        self.b_att = _b_init(out_ch)

    def __call__(self, x):
        out = [self.conv1[0](x), self.conv2[0](self.scale1(x))]
        for i in range(1, self.block_num):
            d1 = self.conv1[i](out[0], out[1])
            d2 = self.conv2[i](out[1], out[0])
            out = [d1, d2]
        o1 = self.scale2(out[1])
        # attention 1x1 over cat([out0, out1_up]) fused as split-K; +x fused
        return pointwise_conv((out[0], o1), self.w_att, self.b_att, residual=x)


class ScaleBlock2:
    def __init__(self, typ, in_ch=128, out_ch=128):
        self.scale = Upsample(in_ch, out_ch) if typ == "up" else Downsample(in_ch, out_ch)
        self.skff = SKFF(in_ch)
        self.msfb = MSFB(3, in_ch, out_ch)

    def __call__(self, x1, x2):
        x2 = self.scale(x2)
        return self.msfb(self.skff(x1, x2))


class MSFN:
    def __init__(self, block_num=3, in_c=3, out_c=3, mid_c=128):
        self.block_num = block_num
        self.enc1 = Conv3x3(in_c, (mid_c,), dils=(1,))
        self.w_enc2 = _w_init((9, mid_c, mid_c), mid_c * 9)
        self.b_enc2 = _b_init(mid_c)
        self.down = Downsample(mid_c, mid_c)
        self.upblocks = [DenseBlock(4, mid_c)] + \
                        [ScaleBlock2("up", mid_c, mid_c) for _ in range(block_num - 1)]
        self.downblocks = [DenseBlock(4, mid_c)] + \
                          [ScaleBlock2("down", mid_c, mid_c) for _ in range(block_num - 1)]
        self.up = Upsample(mid_c, mid_c)
        w = _w_init((2 * mid_c, mid_c), 2 * mid_c)
        self.w_att = (w[:mid_c], w[mid_c:])
        self.b_att = _b_init(mid_c)
        self.dec_t = ConvTranspose2dLayer(mid_c, mid_c)
        self.dec1 = Conv3x3(mid_c, (mid_c // 4,), dils=(1,))
        self.dec2 = Conv3x3(mid_c // 4, (out_c,), dils=(1,))

    def __call__(self, x):
        fea = conv3x3_s2(self.enc1(x, slope=LRELU), self.w_enc2, self.b_enc2,
                         pad_mode="reflect", slope=LRELU)
        out = [self.upblocks[0](fea), self.downblocks[0](self.down(fea))]
        for i in range(1, self.block_num):
            d1 = self.upblocks[i](out[0], out[1])
            d2 = self.downblocks[i](out[1], out[0])
            out = [d1, d2]
        o1 = self.up(out[1])
        o = pointwise_conv((out[0], o1), self.w_att, self.b_att, residual=fea)
        o = self.dec_t(o, slope=LRELU)
        o = self.dec1(o, slope=LRELU)
        # final conv + residual (original input) fused; f32 output
        return self.dec2(o, residual=x, out_dtype=F32)


class Wrapper:
    def __init__(self):
        self.msfn = MSFN()

    def __call__(self, inputs):
        x = inputs["input"]                          # NCHW (PyTorch convention)
        xh = jnp.transpose(x, (0, 2, 3, 1))          # -> NHWC
        yh = self.msfn(xh)
        return {"image": jnp.transpose(yh, (0, 3, 1, 2)).astype(jnp.float32)}


# ----------------------------------------------------------------------------
if __name__ == "__main__":
    # spatial must be >= 32: the network downsamples by 8 internally and uses
    # dilation-3 reflect padding at the deepest (4x4) scale.
    key = jax.random.PRNGKey(0)
    x = jax.random.normal(key, (1, 3, 32, 32), dtype=jnp.float32)

    model = Wrapper()
    out = model({"input": x})
    y = jax.block_until_ready(out["image"])
    assert y.shape == (1, 3, 32, 32)
    print("KERNEL_OK")
</pallas_src>

<mosaic_0001>
module attributes {stable_mosaic.version = 11 : i64} {
  func.func @kern(%arg0: i32, %arg1: i32, %arg2: memref<1x34x34x3xbf16, #tpu.memory_space<vmem>>, %arg3: memref<9x3x128xbf16, #tpu.memory_space<vmem>>, %arg4: memref<1x128xf32, #tpu.memory_space<vmem>>, %arg5: memref<1x512x128xbf16, #tpu.memory_space<vmem>>) attributes {dimension_semantics = [#tpu.dimension_semantics<parallel>, #tpu.dimension_semantics<parallel>], iteration_bounds = array<i64: 1, 2>, scalar_prefetch = 0 : i64, scratch_operands = 0 : i64, tpu.core_type = #tpu.core_type<tc>, window_params = [{transform_indices = @transform_0, window_bounds = array<i64: 1, 34, 34, 3>}, {pipeline_mode = #tpu.pipeline_mode<synchronous>, transform_indices = @transform_1, window_bounds = array<i64: 9, 3, 128>}, {pipeline_mode = #tpu.pipeline_mode<synchronous>, transform_indices = @transform_2, window_bounds = array<i64: 1, 128>}, {transform_indices = @transform_3, window_bounds = array<i64: 1, 512, 128>}]} {
    %c16_i32 = arith.constant 16 : i32
    %0 = arith.muli %arg1, %c16_i32 : i32
    %c0_i32 = arith.constant 0 : i32
    %1 = arith.addi %0, %c0_i32 : i32
    %c0_i32_0 = arith.constant 0 : i32
    %2 = arith.addi %1, %c0_i32_0 : i32
    %c0 = arith.constant 0 : index
    %3 = arith.index_cast %2 : i32 to index
    %c0_1 = arith.constant 0 : index
    %c0_2 = arith.constant 0 : index
    %4 = vector.load %arg2[%c0, %3, %c0_1, %c0_2] : memref<1x34x34x3xbf16, #tpu.memory_space<vmem>>, vector<1x16x32x3xbf16>
    %5 = vector.shape_cast %4 : vector<1x16x32x3xbf16> to vector<16x32x3xbf16>
    %6 = vector.shape_cast %5 : vector<16x32x3xbf16> to vector<512x3xbf16>
    %c0_3 = arith.constant 0 : index
    %c0_4 = arith.constant 0 : index
    %c0_5 = arith.constant 0 : index
    %7 = vector.load %arg3[%c0_3, %c0_4, %c0_5] : memref<9x3x128xbf16, #tpu.memory_space<vmem>>, vector<1x3x128xbf16>
    %8 = vector.shape_cast %7 : vector<1x3x128xbf16> to vector<3x128xbf16>
    %cst = arith.constant dense<0.000000e+00> : vector<512x128xf32>
    %9 = tpu.matmul %6, %8, %cst {dimension_numbers = #tpu.dot_dimension_numbers<[1], [0], [0], [1], [0, 0, 1, 1], [], []>} : vector<512x3xbf16>, vector<3x128xbf16>, vector<512x128xf32> -> vector<512x128xf32>
    %c0_6 = arith.constant 0 : index
    %10 = arith.index_cast %2 : i32 to index
    %c1 = arith.constant 1 : index
    %c0_7 = arith.constant 0 : index
    %11 = vector.load %arg2[%c0_6, %10, %c1, %c0_7] : memref<1x34x34x3xbf16, #tpu.memory_space<vmem>>, vector<1x16x32x3xbf16>
    %12 = vector.shape_cast %11 : vector<1x16x32x3xbf16> to vector<16x32x3xbf16>
    %13 = vector.shape_cast %12 : vector<16x32x3xbf16> to vector<512x3xbf16>
    %c1_8 = arith.constant 1 : index
    %c0_9 = arith.constant 0 : index
    %c0_10 = arith.constant 0 : index
    %14 = vector.load %arg3[%c1_8, %c0_9, %c0_10] : memref<9x3x128xbf16, #tpu.memory_space<vmem>>, vector<1x3x128xbf16>
    %15 = vector.shape_cast %14 : vector<1x3x128xbf16> to vector<3x128xbf16>
    %cst_11 = arith.constant dense<0.000000e+00> : vector<512x128xf32>
    %16 = tpu.matmul %13, %15, %cst_11 {dimension_numbers = #tpu.dot_dimension_numbers<[1], [0], [0], [1], [0, 0, 1, 1], [], []>} : vector<512x3xbf16>, vector<3x128xbf16>, vector<512x128xf32> -> vector<512x128xf32>
    %17 = arith.addf %9, %16 : vector<512x128xf32>
    %c0_12 = arith.constant 0 : index
    %18 = arith.index_cast %2 : i32 to index
    %c2 = arith.constant 2 : index
    %c0_13 = arith.constant 0 : index
    %19 = vector.load %arg2[%c0_12, %18, %c2, %c0_13] : memref<1x34x34x3xbf16, #tpu.memory_space<vmem>>, vector<1x16x32x3xbf16>
    %20 = vector.shape_cast %19 : vector<1x16x32x3xbf16> to vector<16x32x3xbf16>
    %21 = vector.shape_cast %20 : vector<16x32x3xbf16> to vector<512x3xbf16>
    %c2_14 = arith.constant 2 : index
    %c0_15 = arith.constant 0 : index
    %c0_16 = arith.constant 0 : index
    %22 = vector.load %arg3[%c2_14, %c0_15, %c0_16] : memref<9x3x128xbf16, #tpu.memory_space<vmem>>, vector<1x3x128xbf16>
    %23 = vector.shape_cast %22 : vector<1x3x128xbf16> to vector<3x128xbf16>
    %cst_17 = arith.constant dense<0.000000e+00> : vector<512x128xf32>
    %24 = tpu.matmul %21, %23, %cst_17 {dimension_numbers = #tpu.dot_dimension_numbers<[1], [0], [0], [1], [0, 0, 1, 1], [], []>} : vector<512x3xbf16>, vector<3x128xbf16>, vector<512x128xf32> -> vector<512x128xf32>
    %25 = arith.addf %17, %24 : vector<512x128xf32>
    %c16_i32_18 = arith.constant 16 : i32
    %26 = arith.muli %arg1, %c16_i32_18 : i32
    %c0_i32_19 = arith.constant 0 : i32
    %27 = arith.addi %26, %c0_i32_19 : i32
    %c1_i32 = arith.constant 1 : i32
    %28 = arith.addi %27, %c1_i32 : i32
    %c0_20 = arith.constant 0 : index
    %29 = arith.index_cast %28 : i32 to index
    %c0_21 = arith.constant 0 : index
    %c0_22 = arith.constant 0 : index
    %30 = vector.load %arg2[%c0_20, %29, %c0_21, %c0_22] : memref<1x34x34x3xbf16, #tpu.memory_space<vmem>>, vector<1x16x32x3xbf16>
    %31 = vector.shape_cast %30 : vector<1x16x32x3xbf16> to vector<16x32x3xbf16>
    %32 = vector.shape_cast %31 : vector<16x32x3xbf16> to vector<512x3xbf16>
    %c3 = arith.constant 3 : index
    %c0_23 = arith.constant 0 : index
    %c0_24 = arith.constant 0 : index
    %33 = vector.load %arg3[%c3, %c0_23, %c0_24] : memref<9x3x128xbf16, #tpu.memory_space<vmem>>, vector<1x3x128xbf16>
    %34 = vector.shape_cast %33 : vector<1x3x128xbf16> to vector<3x128xbf16>
    %cst_25 = arith.constant dense<0.000000e+00> : vector<512x128xf32>
    %35 = tpu.matmul %32, %34, %cst_25 {dimension_numbers = #tpu.dot_dimension_numbers<[1], [0], [0], [1], [0, 0, 1, 1], [], []>} : vector<512x3xbf16>, vector<3x128xbf16>, vector<512x128xf32> -> vector<512x128xf32>
    %36 = arith.addf %25, %35 : vector<512x128xf32>
    %c0_26 = arith.constant 0 : index
    %37 = arith.index_cast %28 : i32 to index
    %c1_27 = arith.constant 1 : index
    %c0_28 = arith.constant 0 : index
    %38 = vector.load %arg2[%c0_26, %37, %c1_27, %c0_28] : memref<1x34x34x3xbf16, #tpu.memory_space<vmem>>, vector<1x16x32x3xbf16>
    %39 = vector.shape_cast %38 : vector<1x16x32x3xbf16> to vector<16x32x3xbf16>
    %40 = vector.shape_cast %39 : vector<16x32x3xbf16> to vector<512x3xbf16>
    %c4 = arith.constant 4 : index
    %c0_29 = arith.constant 0 : index
    %c0_30 = arith.constant 0 : index
    %41 = vector.load %arg3[%c4, %c0_29, %c0_30] : memref<9x3x128xbf16, #tpu.memory_space<vmem>>, vector<1x3x128xbf16>
    %42 = vector.shape_cast %41 : vector<1x3x128xbf16> to vector<3x128xbf16>
    %cst_31 = arith.constant dense<0.000000e+00> : vector<512x128xf32>
    %43 = tpu.matmul %40, %42, %cst_31 {dimension_numbers = #tpu.dot_dimension_numbers<[1], [0], [0], [1], [0, 0, 1, 1], [], []>} : vector<512x3xbf16>, vector<3x128xbf16>, vector<512x128xf32> -> vector<512x128xf32>
    %44 = arith.addf %36, %43 : vector<512x128xf32>
    %c0_32 = arith.constant 0 : index
    %45 = arith.index_cast %28 : i32 to index
    %c2_33 = arith.constant 2 : index
    %c0_34 = arith.constant 0 : index
    %46 = vector.load %arg2[%c0_32, %45, %c2_33, %c0_34] : memref<1x34x34x3xbf16, #tpu.memory_space<vmem>>, vector<1x16x32x3xbf16>
    %47 = vector.shape_cast %46 : vector<1x16x32x3xbf16> to vector<16x32x3xbf16>
    %48 = vector.shape_cast %47 : vector<16x32x3xbf16> to vector<512x3xbf16>
    %c5 = arith.constant 5 : index
    %c0_35 = arith.constant 0 : index
    %c0_36 = arith.constant 0 : index
    %49 = vector.load %arg3[%c5, %c0_35, %c0_36] : memref<9x3x128xbf16, #tpu.memory_space<vmem>>, vector<1x3x128xbf16>
    %50 = vector.shape_cast %49 : vector<1x3x128xbf16> to vector<3x128xbf16>
    %cst_37 = arith.constant dense<0.000000e+00> : vector<512x128xf32>
    %51 = tpu.matmul %48, %50, %cst_37 {dimension_numbers = #tpu.dot_dimension_numbers<[1], [0], [0], [1], [0, 0, 1, 1], [], []>} : vector<512x3xbf16>, vector<3x128xbf16>, vector<512x128xf32> -> vector<512x128xf32>
    %52 = arith.addf %44, %51 : vector<512x128xf32>
    %c16_i32_38 = arith.constant 16 : i32
    %53 = arith.muli %arg1, %c16_i32_38 : i32
    %c0_i32_39 = arith.constant 0 : i32
    %54 = arith.addi %53, %c0_i32_39 : i32
    %c2_i32 = arith.constant 2 : i32
    %55 = arith.addi %54, %c2_i32 : i32
    %c0_40 = arith.constant 0 : index
    %56 = arith.index_cast %55 : i32 to index
    %c0_41 = arith.constant 0 : index
    %c0_42 = arith.constant 0 : index
    %57 = vector.load %arg2[%c0_40, %56, %c0_41, %c0_42] : memref<1x34x34x3xbf16, #tpu.memory_space<vmem>>, vector<1x16x32x3xbf16>
    %58 = vector.shape_cast %57 : vector<1x16x32x3xbf16> to vector<16x32x3xbf16>
    %59 = vector.shape_cast %58 : vector<16x32x3xbf16> to vector<512x3xbf16>
    %c6 = arith.constant 6 : index
    %c0_43 = arith.constant 0 : index
    %c0_44 = arith.constant 0 : index
    %60 = vector.load %arg3[%c6, %c0_43, %c0_44] : memref<9x3x128xbf16, #tpu.memory_space<vmem>>, vector<1x3x128xbf16>
    %61 = vector.shape_cast %60 : vector<1x3x128xbf16> to vector<3x128xbf16>
    %cst_45 = arith.constant dense<0.000000e+00> : vector<512x128xf32>
    %62 = tpu.matmul %59, %61, %cst_45 {dimension_numbers = #tpu.dot_dimension_numbers<[1], [0], [0], [1], [0, 0, 1, 1], [], []>} : vector<512x3xbf16>, vector<3x128xbf16>, vector<512x128xf32> -> vector<512x128xf32>
    %63 = arith.addf %52, %62 : vector<512x128xf32>
    %c0_46 = arith.constant 0 : index
    %64 = arith.index_cast %55 : i32 to index
    %c1_47 = arith.constant 1 : index
    %c0_48 = arith.constant 0 : index
    %65 = vector.load %arg2[%c0_46, %64, %c1_47, %c0_48] : memref<1x34x34x3xbf16, #tpu.memory_space<vmem>>, vector<1x16x32x3xbf16>
    %66 = vector.shape_cast %65 : vector<1x16x32x3xbf16> to vector<16x32x3xbf16>
    %67 = vector.shape_cast %66 : vector<16x32x3xbf16> to vector<512x3xbf16>
    %c7 = arith.constant 7 : index
    %c0_49 = arith.constant 0 : index
    %c0_50 = arith.constant 0 : index
    %68 = vector.load %arg3[%c7, %c0_49, %c0_50] : memref<9x3x128xbf16, #tpu.memory_space<vmem>>, vector<1x3x128xbf16>
    %69 = vector.shape_cast %68 : vector<1x3x128xbf16> to vector<3x128xbf16>
    %cst_51 = arith.constant dense<0.000000e+00> : vector<512x128xf32>
    %70 = tpu.matmul %67, %69, %cst_51 {dimension_numbers = #tpu.dot_dimension_numbers<[1], [0], [0], [1], [0, 0, 1, 1], [], []>} : vector<512x3xbf16>, vector<3x128xbf16>, vector<512x128xf32> -> vector<512x128xf32>
    %71 = arith.addf %63, %70 : vector<512x128xf32>
    %c0_52 = arith.constant 0 : index
    %72 = arith.index_cast %55 : i32 to index
    %c2_53 = arith.constant 2 : index
    %c0_54 = arith.constant 0 : index
    %73 = vector.load %arg2[%c0_52, %72, %c2_53, %c0_54] : memref<1x34x34x3xbf16, #tpu.memory_space<vmem>>, vector<1x16x32x3xbf16>
    %74 = vector.shape_cast %73 : vector<1x16x32x3xbf16> to vector<16x32x3xbf16>
    %75 = vector.shape_cast %74 : vector<16x32x3xbf16> to vector<512x3xbf16>
    %c8 = arith.constant 8 : index
    %c0_55 = arith.constant 0 : index
    %c0_56 = arith.constant 0 : index
    %76 = vector.load %arg3[%c8, %c0_55, %c0_56] : memref<9x3x128xbf16, #tpu.memory_space<vmem>>, vector<1x3x128xbf16>
    %77 = vector.shape_cast %76 : vector<1x3x128xbf16> to vector<3x128xbf16>
    %cst_57 = arith.constant dense<0.000000e+00> : vector<512x128xf32>
    %78 = tpu.matmul %75, %77, %cst_57 {dimension_numbers = #tpu.dot_dimension_numbers<[1], [0], [0], [1], [0, 0, 1, 1], [], []>} : vector<512x3xbf16>, vector<3x128xbf16>, vector<512x128xf32> -> vector<512x128xf32>
    %79 = arith.addf %71, %78 : vector<512x128xf32>
    %c0_58 = arith.constant 0 : index
    %c0_59 = arith.constant 0 : index
    %80 = vector.load %arg4[%c0_58, %c0_59] : memref<1x128xf32, #tpu.memory_space<vmem>>, vector<1x128xf32>
    %81 = vector.broadcast %80 : vector<1x128xf32> to vector<512x128xf32>
    %82 = arith.addf %79, %81 : vector<512x128xf32>
    %cst_60 = arith.constant 0.000000e+00 : f32
    %83 = vector.broadcast %cst_60 : f32 to vector<512x128xf32>
    %84 = arith.cmpf oge, %82, %83 : vector<512x128xf32>
    %cst_61 = arith.constant 2.000000e-01 : f32
    %85 = vector.broadcast %cst_61 : f32 to vector<512x128xf32>
    %86 = arith.mulf %85, %82 : vector<512x128xf32>
    %87 = arith.select %84, %82, %86 : vector<512x128xi1>, vector<512x128xf32>
    %88 = arith.truncf %87 : vector<512x128xf32> to vector<512x128xbf16>
    %c0_62 = arith.constant 0 : index
    %c0_63 = arith.constant 0 : index
    %c0_64 = arith.constant 0 : index
    %89 = vector.load %arg5[%c0_62, %c0_63, %c0_64] : memref<1x512x128xbf16, #tpu.memory_space<vmem>>, vector<1x512x128xbf16>
    %90 = vector.shape_cast %89 : vector<1x512x128xbf16> to vector<512x128xbf16>
    %91 = vector.shape_cast %88 : vector<512x128xbf16> to vector<1x512x128xbf16>
    tpu.vector_store %arg5[%c0_62, %c0_63, %c0_64], %91 {strides = array<i32>} : memref<1x512x128xbf16, #tpu.memory_space<vmem>>, vector<1x512x128xbf16>,
    return
  }
  func.func @transform_0(%arg0: i32, %arg1: i32) -> (i32, i32, i32, i32) {
    %c0_i32 = arith.constant 0 : i32
    %c0_i32_0 = arith.constant 0 : i32
    %c0_i32_1 = arith.constant 0 : i32
    %c0_i32_2 = arith.constant 0 : i32
    return %arg0, %c0_i32, %c0_i32_0, %c0_i32_1 : i32, i32, i32, i32
  }
  func.func @transform_1(%arg0: i32, %arg1: i32) -> (i32, i32, i32) {
    %c0_i32 = arith.constant 0 : i32
    %c0_i32_0 = arith.constant 0 : i32
    %c0_i32_1 = arith.constant 0 : i32
    %c0_i32_2 = arith.constant 0 : i32
    return %c0_i32, %c0_i32_0, %c0_i32_1 : i32, i32, i32
  }
  func.func @transform_2(%arg0: i32, %arg1: i32) -> (i32, i32) {
    %c0_i32 = arith.constant 0 : i32
    %c0_i32_0 = arith.constant 0 : i32
    %c0_i32_1 = arith.constant 0 : i32
    return %c0_i32, %c0_i32_0 : i32, i32
  }
  func.func @transform_3(%arg0: i32, %arg1: i32) -> (i32, i32, i32) {
    %c0_i32 = arith.constant 0 : i32
    %c0_i32_0 = arith.constant 0 : i32
    return %arg0, %arg1, %c0_i32 : i32, i32, i32
  }
}

</mosaic_0001>

<bundles_post_ra>
// kernel: conv3x3_apply.1
= control target key start
LH: loop header
LB: loop body
LE: loop exit
PB: predicated region body
PF: predicated region fallthrough
CT: control target
= control target key end

     0   :  { %8 = vsyncpa [#allocation3], 0  ;;  %s15464_s0 = inlined_call_operand.vmem [shape: bf16[1,34,34,3], index: 0, kind: input, shape index: {}]   ;;  %s15465_s1 = inlined_call_operand.vmem [shape: bf16[9,3,128], index: 1, kind: input, shape index: {}]   ;;  %s15466_s2 = inlined_call_operand.vmem [shape: f32[1,128], index: 2, kind: input, shape index: {}]   ;;  %s15467_s3 = inlined_call_operand.hbm [shape: bf16[1,1024,128], index: 3, kind: output, shape index: {}]  }
   0x1   :  { %10 = vsyncpa [#allocation3 + $0x1], 0  ;;  %s12404_s12 = smov 0   ;;  %s12406_s13 = smov 0  }
   0x2   :  { %s12408_s14 = smov 0   ;;  %s12410_s15 = smov 0  }
   0x3   :  { %s12412_s16 = smov 0   ;;  %s12414_s17 = smov 0  }
   0x4 LB: > { %s9250_s18 = sadd.s32 4294967295, %s12378_s17   ;;  %s9251_s19 = sadd.s32 4294967294, %s12378_s17   ;;  %s12378_s17 = sphi %s12414_s17, %s16_s17   ;;  %s12374_s16 = sphi %s12412_s16, %s15516_s16   ;;  %s12370_s15 = sphi %s12410_s15, %s15515_s15   ;;  %s12366_s14 = sphi %s12408_s14, %s15514_s14   ;;  %s12362_s13 = sphi %s12406_s13, %s15513_s13   ;;  %s12358_s12 = sphi %s12404_s12, %s15512_s12  }
   0x5   : > { %s25_s20 = sadd.s32 1, %s12374_s16  ;;  %s105_s21 = sadd.s32 1, %s12366_s14 }
   0x6   : > { %p26_p0 = scmp.ge.s32.totalorder %s25_s20, 2  ;;  %p115_p1 = scmp.ne.s32.totalorder %s12366_s14, %s12362_s13 }
   0x7   : > { %p116_p2 = scmp.eq.s32.totalorder %s9250_s18, 1  ;;  %p121_p3 = scmp.ne.s32.totalorder %s12362_s13, %s12358_s12 }
   0x8   : > { %s15518_s20 = smov (%p26_p0, %s25_s20), 0  ;;  %p122_p5 = scmp.eq.s32.totalorder %s9251_s19, 1 }
   0x9   : > { %p12444_p4 = por %p116_p2, %p115_p1  ;;  %s101_s23 = ssub.s32 %s12374_s16, %s15518_s20 }
   0xa   : > { %p9254_p6 = scmp.ge.s32.totalorder %s12378_s17, 1  ;;  %p103_p7 = scmp.eq.s32.totalorder %s101_s23, 0 }
   0xb   : > { %p12451_p8 = por %p122_p5, %p121_p3  ;;  %p154_p9 = scmp.lt.s32.totalorder %s12378_s17, 3 }
   0xc   : > { %s12457_s25 = scalar_select %p103_p7, %s12366_s14, %s105_s21  }
   0xd   : > { %p155_p10 = pnand %p9254_p6, %p154_p9 }
   0xf   : > { %158 = sbr.rel (%p155_p10) target bundleno = 938 (0x3aa), region = 32 }
  0x16   : > { %v9259_v0 = vld [vmem:[%s15465_s1 + $0x2] sm:$0x3]  ;;  %vm1172_vm0 = vcmask 1040384   ;;  %vm1173_vm1 = vcmask 1041408   ;;  %s10285_s28 = smul.u32 320, %s12370_s15  ;;  %v12380_v1 = vmov 65535  }
  0x17   : > { %v1174_v2 = vsel %vm1172_vm0, 4294967295, %v12380_v1  ;;  %v9680_v3 = vld [vmem:[%s15465_s1 + $0x8] sm:$0x3]  ;;  %vm270_vm2 = vsmask.f32 3328  ;;  %vm1075_vm4 = vcmask 23552  }
  0x18   : > { %v12466_v4 = vsel %vm1173_vm1, %v1174_v2, 0  ;;  %s12471_s6 = scalar_lea.vmem %s15464_s0, %s10285_s28  ;;  %vm271_vm3 = vsmask.f32 7440  ;;  %v253_v5 = vld [vmem:[%s15465_s1] sm:$0x3]  ;;  %vm2064_vm6 = vcmask 1042432  }
  0x19   : > { %v1177_v6 = vand.u32 %v9259_v0, %v12466_v4  ;;  %v12478_v7 = vand.u32 %v9680_v3, %v12466_v4  ;;  %v189_v8 = vld [vmem:[%s12471_s6] sm:$0xf]  ;;  %v190_v9 = vld [vmem:[%s12471_s6 + $0x4] sm:$0xf]  ;;  %v191_v10 = vld [vmem:[%s12471_s6 + $0x8] sm:$0xf]  ;;  %v12484_v11 = vand.u32 %v12466_v4, %v253_v5 }
  0x1a   : > { %v274_v12 = vshrl.u32 %v189_v8, 16  ;;  %v277_v13 = vshll.u32 %v189_v8, 16  ;;  %v283_v14 = vshll.u32 %v190_v9, 16  ;;  %v287_v15 = vshrl.u32 %v190_v9, 16  ;;  %v9600_v18 = vld [vmem:[%s12471_s6 + $0x14] sm:$0xf]  ;;  %vm12500_vm5 = vmor %vm270_vm2, %vm271_vm3 }
  0x1b   : > { %10839 = vmatprep.subr.bf16.mxu1 %v1177_v6  ;;  %11103 = vmatprep.subr.bf16.mxu0 %v12478_v7  ;;  %v293_v16 = vshll.u32 %v191_v10, 16  ;;  %v297_v17 = vshrl.u32 %v191_v10, 16  ;;  %v12489_v19 = vld [vmem:[%s12471_s6 + $0x18] sm:$0xf]  ;;  %v12493_v24 = vld [vmem:[%s12471_s6 + $0x1c] sm:$0xf] }
  0x1c   : > { %10840 = vmatpush3.bf16.msra.mxu1 %v1177_v6  ;;  %11104 = vmatpush3.bf16.msra.mxu0 %v12478_v7  ;;  %v276_v20 = vrot.slane %v274_v12, 4  ;;  %v279_v21 = vrot.slane %v277_v13, 5  ;;  %v285_v22 = vrot.slane %v283_v14, 5  ;;  %v289_v23 = vrot.slane %v287_v15, 4  ;;  %v192_v42 = vld [vmem:[%s12471_s6 + $0xc] sm:$0xf] }
  0x1d   : > { %v295_v25 = vrot.slane %v293_v16, 5  ;;  %v299_v26 = vrot.slane %v297_v17, 4  ;;  %10905 = vmatprep.subr.bf16.mxu1 %v12484_v11  ;;  %v3588_v27 = vshrl.u32 %v9600_v18, 16  ;;  %v3591_v28 = vshll.u32 %v9600_v18, 16  ;;  %v9777_v46 = vld [vmem:[%s15465_s1 + $0xa] sm:$0x3] }
  0x1e   : > { %v280_v29 = vor.u32 %v279_v21, %v276_v20  ;;  %v290_v30 = vor.u32 %v289_v23, %v285_v22  ;;  %v3597_v31 = vshll.u32 %v12489_v19, 16  ;;  %v3601_v32 = vshrl.u32 %v12489_v19, 16  ;;  %v254_v51 = vld [vmem:[%s12471_s6 + $0x10] sm:$0x1]  ;;  %v12520_v60 = vld [vmem:[%s12471_s6 + $0x20] sm:$0xf] }
  0x1f   : > { %v300_v34 = vor.u32 %v299_v26, %v295_v25  ;;  %v3590_v35 = vrot.slane %v3588_v27, 4  ;;  %v3593_v36 = vrot.slane %v3591_v28, 5  ;;  %v3607_v37 = vshll.u32 %v12493_v24, 16  ;;  %v12527_v1 = vld [vmem:[%s12471_s6 + $0x24] sm:$0x1]  ;;  %s10350_s9 = sshll.u32 %s12370_s15, 12 }
  0x20   : > { %v281_v38 = vrot.slane %v280_v29, 4  ;;  %v291_v39 = vrot.slane %v290_v30, 4  ;;  %v3599_v40 = vrot.slane %v3597_v31, 5  ;;  %v3603_v41 = vrot.slane %v3601_v32, 4  ;;  %v193_v8 = vld [vmem:[%s12471_s6 + $0x14] sm:$0xf]  ;;  %s15410_s19 = scalar_lea.hbm %s15467_s3, %s10350_s9 }
  0x21   : > { %v3594_v43 = vor.u32 %v3593_v36, %v3590_v35  ;;  %v3609_v44 = vrot.slane %v3607_v37, 5  ;;  %v3611_v45 = vshrl.u32 %v12493_v24, 16  ;;  %v301_v49 = vrot.slane %v300_v34, 4  ;;  %v194_v18 = vld [vmem:[%s12471_s6 + $0x18] sm:$0xf]  ;;  %s12381_s23 = smov [#allocation2]  }
  0x22   : > { %v286_v47 = vsel %vm12500_vm5, %v281_v38, %v285_v22  ;;  %v296_v48 = vsel %vm12500_vm5, %v291_v39, %v295_v25  ;;  %v3604_v50 = vor.u32 %v3603_v41, %v3599_v40  ;;  %v4942_v55 = vrot.slane %v12493_v24, 5  ;;  %v195_v23 = vld [vmem:[%s12471_s6 + $0x1c] sm:$0xf]  ;;  %v9605_v30 = vld [vmem:[%s12471_s6 + $0x28] sm:$0xf]  ;;  %s12304_s26 = sshll.u32 %s12381_s23, 4  ;;  %s12305_s26 = int_to_ptr.vmem [resolvable:$false] %s12304_s26 }
  0x23   : > { %v9260_v52 = vcombine.low %v286_v47, %v296_v48  ;;  %v3595_v53 = vrot.slane %v3594_v43, 4  ;;  %v3613_v54 = vrot.slane %v3611_v45, 4  ;;  %v12517_v57 = vand.u32 %v9777_v46, %v12466_v4  ;;  %v9607_v48 = vld [vmem:[%s12471_s6 + $0x30] sm:$0xf]  ;;  %s12306_s27 = scalar_lea.vmem %s12305_s26, 8192 }
  0x24   : > { %v3605_v56 = vrot.slane %v3604_v50, 4  ;;  %v303_v58 = vshll.u32 %v192_v42, 16  ;;  %v307_v59 = vshrl.u32 %v192_v42, 16  ;;  %v4939_v63 = vrot.slane %v12489_v19, 5 }
  0x25   : > { %10841 = vmatprep.mubr.msk.bf16.mxu1 %vm1075_vm4, %v9260_v52  ;;  %v3600_v61 = vsel %vm12500_vm5, %v3595_v53, %v3599_v40  ;;  %v3614_v62 = vor.u32 %v3613_v54, %v3609_v44  ;;  %v313_v0 = vshll.u32 %v254_v51, 16  ;;  %v12533_v3 = vrot.slane %v4942_v55, 4  ;;  %11169 = vmatprep.subr.bf16.mxu0 %v12517_v57  ;;  %v9606_v40 = vld [vmem:[%s12471_s6 + $0x2c] sm:$0xf] }
  0x26   : > { %v3610_v2 = vsel %vm12500_vm5, %v3605_v56, %v3609_v44  ;;  %v305_v5 = vrot.slane %v303_v58, 5  ;;  %v309_v6 = vrot.slane %v307_v59, 4  ;;  %v3617_v13 = vshll.u32 %v12520_v60, 16 }
  0x27   : > { %v3615_v9 = vrot.slane %v3614_v62, 4  ;;  %v9681_v10 = vcombine.low %v3600_v61, %v3610_v2  ;;  %v315_v12 = vrot.slane %v313_v0, 5  ;;  %v3621_v16 = vshrl.u32 %v12520_v60, 16  ;;  %v196_v61 = vld [vmem:[%s12471_s6 + $0x20] sm:$0xf] }
  0x28   : > { %v306_v14 = vsel %vm12500_vm5, %v301_v49, %v305_v5  ;;  %v310_v15 = vor.u32 %v309_v6, %v305_v5  ;;  %v3627_v17 = vshll.u32 %v12527_v1, 16  ;;  %v3619_v20 = vrot.slane %v3617_v13, 5  ;;  %v255_v6 = vld [vmem:[%s12471_s6 + $0x24] sm:$0x1] }
  0x29   : > { %11105 = vmatprep.mubr.msk.bf16.mxu0 %vm1075_vm4, %v9681_v10  ;;  %v4945_v21 = vrot.slane %v12520_v60, 5  ;;  %v4948_v22 = vrot.slane %v12527_v1, 5  ;;  %v318_v25 = vshrl.u32 %v193_v8, 16  ;;  %v3623_v27 = vrot.slane %v3621_v16, 4 }
  0x2a   : > { %v311_v26 = vrot.slane %v310_v15, 4  ;;  %v3629_v28 = vrot.slane %v3627_v17, 5  ;;  %v321_v29 = vshll.u32 %v193_v8, 16  ;;  %v3620_v31 = vsel %vm12500_vm5, %v3615_v9, %v3619_v20 }
  0x2b   : > { %v12552_v32 = vrot.slane %v4945_v21, 4  ;;  %v320_v34 = vrot.slane %v318_v25, 4  ;;  %v327_v35 = vshll.u32 %v194_v18, 16  ;;  %v3624_v37 = vor.u32 %v3623_v27, %v3619_v20  ;;  %v9608_v25 = vld [vmem:[%s12471_s6 + $0x34] sm:$0xf] }
  0x2c   : > { %v316_v36 = vsel %vm12500_vm5, %v311_v26, %v315_v12  ;;  %v323_v38 = vrot.slane %v321_v29, 5  ;;  %v331_v39 = vshrl.u32 %v194_v18, 16  ;;  %v337_v43 = vshll.u32 %v195_v23, 16  ;;  %v9609_v29 = vld [vmem:[%s12471_s6 + $0x38] sm:$0x1] }
  0x2d   : > { %v9261_v41 = vcombine.low %v306_v14, %v316_v36  ;;  %v329_v42 = vrot.slane %v327_v35, 5  ;;  %v3632_v44 = vshrl.u32 %v9605_v30, 16  ;;  %v3625_v45 = vrot.slane %v3624_v37, 4 }
  0x2e   : > { %v324_v46 = vor.u32 %v323_v38, %v320_v34  ;;  %v333_v47 = vrot.slane %v331_v39, 4  ;;  %v3635_v49 = vshll.u32 %v9605_v30, 16  ;;  %v339_v50 = vrot.slane %v337_v43, 5 }
  0x2f   : > { %10842 = vmatmul.mubr.msk.bf16.vlgmr.msra.gmra.mrb[0].mxu1 %vm1075_vm4, %v9261_v41  ;;  %v3634_v51 = vrot.slane %v3632_v44, 4  ;;  %v3641_v52 = vshll.u32 %v9606_v40, 16  ;;  %v3645_v53 = vshrl.u32 %v9606_v40, 16  ;;  %v3630_v54 = vsel %vm12500_vm5, %v3625_v45, %v3629_v28  ;;  %v198_v44 = vld [vmem:[%s12471_s6 + $0x2c] sm:$0xf] }
  0x30   : > { %10906 = vmatpush3.bf16.msra.mxu1 %v12484_v11  ;;  %v325_v56 = vrot.slane %v324_v46, 4  ;;  %v334_v58 = vor.u32 %v333_v47, %v329_v42  ;;  %v3637_v59 = vrot.slane %v3635_v49, 5  ;;  %v9682_v62 = vcombine.low %v3620_v31, %v3630_v54  ;;  %v9610_v54 = vld [vmem:[%s12471_s6 + $0x3c] sm:$0xf] }
  0x31   : > { %v3643_v0 = vrot.slane %v3641_v52, 5  ;;  %v3647_v2 = vrot.slane %v3645_v53, 4  ;;  %v3651_v5 = vshll.u32 %v9607_v48, 16  ;;  %v341_v12 = vshrl.u32 %v195_v23, 16  ;;  %v199_v52 = vld [vmem:[%s12471_s6 + $0x30] sm:$0xf] }
  0x32   : > { %v330_v8 = vsel %vm12500_vm5, %v325_v56, %v329_v42  ;;  %v335_v9 = vrot.slane %v334_v58, 4  ;;  %v3638_v10 = vor.u32 %v3637_v59, %v3634_v51  ;;  %11106 = vmatmul.mubr.msk.bf16.vlgmr.msra.gmra.mrb[0].mxu0 %vm1075_vm4, %v9682_v62  ;;  %v347_v14 = vshll.u32 %v196_v61, 16 }
  0x33   : > { %v3648_v11 = vor.u32 %v3647_v2, %v3643_v0  ;;  %v3653_v13 = vrot.slane %v3651_v5, 5  ;;  %v351_v15 = vshrl.u32 %v196_v61, 16  ;;  %11170 = vmatpush3.bf16.msra.mxu0 %v12517_v57  ;;  %v343_v18 = vrot.slane %v341_v12, 4  ;;  %v197_v57 = vld [vmem:[%s12471_s6 + $0x28] sm:$0xf] }
  0x34   : > { %v340_v16 = vsel %vm12500_vm5, %v335_v9, %v339_v50  ;;  %v3639_v17 = vrot.slane %v3638_v10, 4  ;;  %v357_v20 = vshll.u32 %v255_v6, 16  ;;  %v349_v23 = vrot.slane %v347_v14, 5  ;;  %v9611_v6 = vld [vmem:[%s12471_s6 + $0x40] sm:$0xf] }
  0x35   : > { %v9262_v26 = vcombine.low %v330_v8, %v340_v16  ;;  %v3649_v27 = vrot.slane %v3648_v11, 4  ;;  %v353_v28 = vrot.slane %v351_v15, 4  ;;  %v344_v31 = vor.u32 %v343_v18, %v339_v50  ;;  %v9612_v15 = vld [vmem:[%s12471_s6 + $0x44] sm:$0xf] }
  0x36   : > { %v3644_v30 = vsel %vm12500_vm5, %v3639_v17, %v3643_v0  ;;  %v359_v34 = vrot.slane %v357_v20, 5  ;;  %v3655_v35 = vshrl.u32 %v9607_v48, 16  ;;  %v3661_v38 = vshll.u32 %v9608_v25, 16 }
  0x37   : > { %10845 = vmatprep.mubr.msk.bf16.mxu1 %vm1075_vm4, %v9262_v26  ;;  %v3654_v36 = vsel %vm12500_vm5, %v3649_v27, %v3653_v13  ;;  %v354_v37 = vor.u32 %v353_v28, %v349_v23  ;;  %v3665_v39 = vshrl.u32 %v9608_v25, 16  ;;  %v345_v41 = vrot.slane %v344_v31, 4  ;;  %v200_v26 = vld [vmem:[%s12471_s6 + $0x34] sm:$0xf] }
  0x38   : > { %v9683_v40 = vcombine.low %v3644_v30, %v3654_v36  ;;  %v3657_v42 = vrot.slane %v3655_v35, 4  ;;  %v3671_v43 = vshll.u32 %v9609_v29, 16  ;;  %v3663_v46 = vrot.slane %v3661_v38, 5  ;;  %v256_v35 = vld [vmem:[%s12471_s6 + $0x38] sm:$0x1] }
  0x39   : > { %v355_v45 = vrot.slane %v354_v37, 4  ;;  %v3667_v47 = vrot.slane %v3665_v39, 4  ;;  %v362_v48 = vshrl.u32 %v197_v57, 16  ;;  %v350_v49 = vsel %vm12500_vm5, %v345_v41, %v349_v23 }
  0x3a   : > { %11109 = vmatprep.mubr.msk.bf16.mxu0 %vm1075_vm4, %v9683_v40  ;;  %v3658_v50 = vor.u32 %v3657_v42, %v3653_v13  ;;  %v3673_v51 = vrot.slane %v3671_v43, 5  ;;  %v365_v53 = vshll.u32 %v197_v57, 16  ;;  %v371_v61 = vshll.u32 %v198_v44, 16 }
  0x3b   : > { %v360_v56 = vsel %vm12500_vm5, %v355_v45, %v359_v34  ;;  %v3668_v58 = vor.u32 %v3667_v47, %v3663_v46  ;;  %v364_v59 = vrot.slane %v362_v48, 4  ;;  %v375_v5 = vshrl.u32 %v198_v44, 16  ;;  %v9613_v44 = vld [vmem:[%s12471_s6 + $0x48] sm:$0xf] }
  0x3c   : > { %v9263_v62 = vcombine.low %v350_v49, %v360_v56  ;;  %v3659_v0 = vrot.slane %v3658_v50, 4  ;;  %v367_v2 = vrot.slane %v365_v53, 5  ;;  %v373_v9 = vrot.slane %v371_v61, 5  ;;  %v9614_v53 = vld [vmem:[%s12471_s6 + $0x4c] sm:$0x1] }
  0x3d   : > { %v3669_v8 = vrot.slane %v3668_v58, 4  ;;  %v381_v10 = vshll.u32 %v199_v52, 16  ;;  %v3676_v12 = vshrl.u32 %v9610_v54, 16  ;;  %v377_v14 = vrot.slane %v375_v5, 4 }
  0x3e   : > { %10846 = vmatmul.mubr.msk.bf16.gmra.mrb[4].mxu1 %vm1075_vm4, %v9263_v62  ;;  %v3664_v11 = vsel %vm12500_vm5, %v3659_v0, %v3663_v46  ;;  %v368_v13 = vor.u32 %v367_v2, %v364_v59  ;;  %v3679_v16 = vshll.u32 %v9610_v54, 16  ;;  %v3685_v25 = vshll.u32 %v9611_v6, 16  ;;  %v201_v54 = vld [vmem:[%s12471_s6 + $0x3c] sm:$0xf] }
  0x3f   : > { %v3674_v17 = vsel %vm12500_vm5, %v3669_v8, %v3673_v51  ;;  %v383_v18 = vrot.slane %v381_v10, 5  ;;  %v3678_v20 = vrot.slane %v3676_v12, 4  ;;  %v378_v28 = vor.u32 %v377_v14, %v373_v9  ;;  %v202_v10 = vld [vmem:[%s12471_s6 + $0x40] sm:$0xf] }
  0x40   : > { %v9684_v27 = vcombine.low %v3664_v11, %v3674_v17  ;;  %v369_v23 = vrot.slane %v368_v13, 4  ;;  %v3681_v29 = vrot.slane %v3679_v16, 5  ;;  %v3687_v30 = vrot.slane %v3685_v25, 5  ;;  %v203_v16 = vld [vmem:[%s12471_s6 + $0x44] sm:$0xf] }
  0x41   : > { %v3689_v31 = vshrl.u32 %v9611_v6, 16  ;;  %v3695_v34 = vshll.u32 %v9612_v15, 16  ;;  %v385_v57 = vshrl.u32 %v199_v52, 16  ;;  %v379_v37 = vrot.slane %v378_v28, 4 }
  0x42   : > { %11110 = vmatmul.mubr.msk.bf16.gmra.mrb[4].mxu0 %vm1075_vm4, %v9684_v27  ;;  %v374_v36 = vsel %vm12500_vm5, %v369_v23, %v373_v9  ;;  %v3682_v38 = vor.u32 %v3681_v29, %v3678_v20  ;;  %v391_v39 = vshll.u32 %v200_v26, 16  ;;  %v395_v43 = vshrl.u32 %v200_v26, 16  ;;  %v9615_v26 = vld [vmem:[%s12471_s6 + $0x50] sm:$0xf] }
  0x43   : > { %v3691_v40 = vrot.slane %v3689_v31, 4  ;;  %v3697_v41 = vrot.slane %v3695_v34, 5  ;;  %v387_v42 = vrot.slane %v385_v57, 4  ;;  %v384_v45 = vsel %vm12500_vm5, %v379_v37, %v383_v18  ;;  %v9616_v57 = vld [vmem:[%s12471_s6 + $0x54] sm:$0xf] }
  0x44   : > { %v3683_v46 = vrot.slane %v3682_v38, 4  ;;  %v393_v47 = vrot.slane %v391_v39, 5  ;;  %v401_v48 = vshll.u32 %v256_v35, 16  ;;  %v9264_v49 = vcombine.low %v374_v36, %v384_v45 }
  0x45   : > { %v3692_v50 = vor.u32 %v3691_v40, %v3687_v30  ;;  %v388_v51 = vor.u32 %v387_v42, %v383_v18  ;;  %v397_v52 = vrot.slane %v395_v43, 4  ;;  %v3699_v59 = vshrl.u32 %v9612_v15, 16  ;;  %v9617_v43 = vld [vmem:[%s12471_s6 + $0x58] sm:$0xf] }
  0x46   : > { %v3688_v56 = vsel %vm12500_vm5, %v3683_v46, %v3687_v30  ;;  %v403_v58 = vrot.slane %v401_v48, 5  ;;  %v3705_v61 = vshll.u32 %v9613_v44, 16  ;;  %10849 = vmatprep.mubr.msk.bf16.mxu1 %vm1075_vm4, %v9264_v49  ;;  %v3709_v5 = vshrl.u32 %v9613_v44, 16  ;;  %v204_v49 = vld [vmem:[%s12471_s6 + $0x48] sm:$0xf] }
  0x47   : > { %v3693_v62 = vrot.slane %v3692_v50, 4  ;;  %v389_v0 = vrot.slane %v388_v51, 4  ;;  %v398_v2 = vor.u32 %v397_v52, %v393_v47  ;;  %v3701_v6 = vrot.slane %v3699_v59, 4 }
  0x48   : > { %v3707_v8 = vrot.slane %v3705_v61, 5  ;;  %v3715_v9 = vshll.u32 %v9614_v53, 16  ;;  %v406_v12 = vshrl.u32 %v201_v54, 16  ;;  %v3711_v15 = vrot.slane %v3709_v5, 4 }
  0x49   : > { %v3698_v11 = vsel %vm12500_vm5, %v3693_v62, %v3697_v41  ;;  %v394_v13 = vsel %vm12500_vm5, %v389_v0, %v393_v47  ;;  %v399_v14 = vrot.slane %v398_v2, 4  ;;  %v3702_v18 = vor.u32 %v3701_v6, %v3697_v41  ;;  %v257_v2 = vld [vmem:[%s12471_s6 + $0x4c] sm:$0x1] }
  0x4a   : > { %v9685_v17 = vcombine.low %v3688_v56, %v3698_v11  ;;  %v3717_v20 = vrot.slane %v3715_v9, 5  ;;  %v408_v25 = vrot.slane %v406_v12, 4  ;;  %v3712_v23 = vor.u32 %v3711_v15, %v3707_v8  ;;  %v9618_v12 = vld [vmem:[%s12471_s6 + $0x5c] sm:$0xf] }
  0x4b   : > { %v404_v27 = vsel %vm12500_vm5, %v399_v14, %v403_v58  ;;  %v409_v28 = vshll.u32 %v201_v54, 16  ;;  %v415_v29 = vshll.u32 %v202_v10, 16  ;;  %v3703_v31 = vrot.slane %v3702_v18, 4 }
  0x4c   : > { %11113 = vmatprep.mubr.msk.bf16.mxu0 %vm1075_vm4, %v9685_v17  ;;  %v9265_v30 = vcombine.low %v394_v13, %v404_v27  ;;  %v419_v34 = vshrl.u32 %v202_v10, 16  ;;  %v425_v35 = vshll.u32 %v203_v16, 16  ;;  %v3713_v36 = vrot.slane %v3712_v23, 4 }
  0x4d   : > { %v411_v37 = vrot.slane %v409_v28, 5  ;;  %v417_v38 = vrot.slane %v415_v29, 5  ;;  %v3720_v39 = vshrl.u32 %v9615_v26, 16  ;;  %v3708_v40 = vsel %vm12500_vm5, %v3703_v31, %v3707_v8 }
  0x4e   : > { %10850 = vmatmul.mubr.msk.bf16.gmra.mrb[8].mxu1 %vm1075_vm4, %v9265_v30  ;;  %v421_v41 = vrot.slane %v419_v34, 4  ;;  %v427_v42 = vrot.slane %v425_v35, 5  ;;  %v3723_v44 = vshll.u32 %v9615_v26, 16  ;;  %v3718_v45 = vsel %vm12500_vm5, %v3713_v36, %v3717_v20  ;;  %v205_v35 = vld [vmem:[%s12471_s6 + $0x50] sm:$0xf] }
  0x4f   : > { %v412_v46 = vor.u32 %v411_v37, %v408_v25  ;;  %v3722_v47 = vrot.slane %v3720_v39, 4  ;;  %v3729_v48 = vshll.u32 %v9616_v57, 16  ;;  %v9686_v50 = vcombine.low %v3708_v40, %v3718_v45  ;;  %v9619_v25 = vld [vmem:[%s12471_s6 + $0x60] sm:$0x1]  ;;  %v206_v39 = vld [vmem:[%s12471_s6 + $0x54] sm:$0xf] }
  0x50   : > { %v422_v51 = vor.u32 %v421_v41, %v417_v38  ;;  %v3725_v52 = vrot.slane %v3723_v44, 5  ;;  %v3733_v53 = vshrl.u32 %v9616_v57, 16  ;;  %v3739_v58 = vshll.u32 %v9617_v43, 16 }
  0x51   : > { %v413_v54 = vrot.slane %v412_v46, 4  ;;  %v3731_v56 = vrot.slane %v3729_v48, 5  ;;  %v429_v59 = vshrl.u32 %v203_v16, 16  ;;  %11114 = vmatmul.mubr.msk.bf16.gmra.mrb[8].mxu0 %vm1075_vm4, %v9686_v50  ;;  %v435_v5 = vshll.u32 %v204_v49, 16  ;;  %v207_v46 = vld [vmem:[%s12471_s6 + $0x58] sm:$0xf] }
  0x52   : > { %v423_v61 = vrot.slane %v422_v51, 4  ;;  %v3726_v62 = vor.u32 %v3725_v52, %v3722_v47  ;;  %v3735_v0 = vrot.slane %v3733_v53, 4  ;;  %v3741_v8 = vrot.slane %v3739_v58, 5  ;;  %v9620_v53 = vld [vmem:[%s12471_s6 + $0x64] sm:$0xf] }
  0x53   : > { %v418_v6 = vsel %vm12500_vm5, %v413_v54, %v417_v38  ;;  %v431_v9 = vrot.slane %v429_v59, 4  ;;  %v439_v10 = vshrl.u32 %v204_v49, 16  ;;  %v437_v15 = vrot.slane %v435_v5, 5 }
  0x54   : > { %v428_v11 = vsel %vm12500_vm5, %v423_v61, %v427_v42  ;;  %v3727_v13 = vrot.slane %v3726_v62, 4  ;;  %v3736_v14 = vor.u32 %v3735_v0, %v3731_v56  ;;  %v445_v20 = vshll.u32 %v257_v2, 16  ;;  %v9621_v61 = vld [vmem:[%s12471_s6 + $0x68] sm:$0xf] }
  0x55   : > { %v9266_v16 = vcombine.low %v418_v6, %v428_v11  ;;  %v432_v17 = vor.u32 %v431_v9, %v427_v42  ;;  %v441_v18 = vrot.slane %v439_v10, 4  ;;  %v3743_v23 = vshrl.u32 %v9617_v43, 16  ;;  %v9622_v9 = vld [vmem:[%s12471_s6 + $0x6c] sm:$0xf] }
  0x56   : > { %v3732_v26 = vsel %vm12500_vm5, %v3727_v13, %v3731_v56  ;;  %v3737_v27 = vrot.slane %v3736_v14, 4  ;;  %v3749_v28 = vshll.u32 %v9618_v12, 16  ;;  %v447_v31 = vrot.slane %v445_v20, 5 }
  0x57   : > { %10853 = vmatprep.mubr.msk.bf16.mxu1 %vm1075_vm4, %v9266_v16  ;;  %v433_v29 = vrot.slane %v432_v17, 4  ;;  %v442_v30 = vor.u32 %v441_v18, %v437_v15  ;;  %v3753_v34 = vshrl.u32 %v9618_v12, 16  ;;  %v3745_v36 = vrot.slane %v3743_v23, 4  ;;  %v208_v16 = vld [vmem:[%s12471_s6 + $0x5c] sm:$0xf] }
  0x58   : > { %v3742_v57 = vsel %vm12500_vm5, %v3737_v27, %v3741_v8  ;;  %v3751_v37 = vrot.slane %v3749_v28, 5  ;;  %v3759_v38 = vshll.u32 %v9619_v25, 16  ;;  %v450_v47 = vshrl.u32 %v205_v35, 16 }
  0x59   : > { %v9687_v40 = vcombine.low %v3732_v26, %v3742_v57  ;;  %v438_v41 = vsel %vm12500_vm5, %v433_v29, %v437_v15  ;;  %v443_v42 = vrot.slane %v442_v30, 4  ;;  %v3755_v43 = vrot.slane %v3753_v34, 4 }
  0x5a   : > { %v3746_v44 = vor.u32 %v3745_v36, %v3741_v8  ;;  %v3761_v45 = vrot.slane %v3759_v38, 5  ;;  %v453_v48 = vshll.u32 %v205_v35, 16  ;;  %v459_v51 = vshll.u32 %v206_v39, 16 }
  0x5b   : > { %11117 = vmatprep.mubr.msk.bf16.mxu0 %vm1075_vm4, %v9687_v40  ;;  %v448_v49 = vsel %vm12500_vm5, %v443_v42, %v447_v31  ;;  %v3756_v50 = vor.u32 %v3755_v43, %v3751_v37  ;;  %v463_v52 = vshrl.u32 %v206_v39, 16  ;;  %v452_v58 = vrot.slane %v450_v47, 4  ;;  %v258_v31 = vld [vmem:[%s12471_s6 + $0x60] sm:$0x1]  ;;  %v9623_v39 = vld [vmem:[%s12471_s6 + $0x70] sm:$0xf] }
  0x5c   : > { %v9267_v54 = vcombine.low %v438_v41, %v448_v49  ;;  %v3747_v56 = vrot.slane %v3746_v44, 4  ;;  %v455_v59 = vrot.slane %v453_v48, 5  ;;  %v461_v0 = vrot.slane %v459_v51, 5  ;;  %v9624_v48 = vld [vmem:[%s12471_s6 + $0x74] sm:$0x1] }
  0x5d   : > { %v3757_v62 = vrot.slane %v3756_v50, 4  ;;  %v465_v2 = vrot.slane %v463_v52, 4  ;;  %v469_v5 = vshll.u32 %v207_v46, 16  ;;  %v3764_v10 = vshrl.u32 %v9620_v53, 16 }
  0x5e   : > { %10854 = vmatmul.mubr.msk.bf16.gmra.mrb[12].mxu1 %vm1075_vm4, %v9267_v54  ;;  %v3752_v6 = vsel %vm12500_vm5, %v3747_v56, %v3751_v37  ;;  %v456_v8 = vor.u32 %v455_v59, %v452_v58  ;;  %v3767_v12 = vshll.u32 %v9620_v53, 16  ;;  %v3773_v15 = vshll.u32 %v9621_v61, 16  ;;  %v209_v53 = vld [vmem:[%s12471_s6 + $0x64] sm:$0xf] }
  0x5f   : > { %v3762_v11 = vsel %vm12500_vm5, %v3757_v62, %v3761_v45  ;;  %v466_v13 = vor.u32 %v465_v2, %v461_v0  ;;  %v471_v14 = vrot.slane %v469_v5, 5  ;;  %v3766_v20 = vrot.slane %v3764_v10, 4 }
  0x60   : > { %v9688_v17 = vcombine.low %v3752_v6, %v3762_v11  ;;  %v457_v18 = vrot.slane %v456_v8, 4  ;;  %v3769_v25 = vrot.slane %v3767_v12, 5  ;;  %v3775_v27 = vrot.slane %v3773_v15, 5  ;;  %v211_v15 = vld [vmem:[%s12471_s6 + $0x6c] sm:$0xf] }
  0x61   : > { %v467_v26 = vrot.slane %v466_v13, 4  ;;  %v3777_v23 = vshrl.u32 %v9621_v61, 16  ;;  %v3783_v28 = vshll.u32 %v9622_v9, 16  ;;  %v473_v34 = vshrl.u32 %v207_v46, 16 }
  0x62   : > { %11118 = vmatmul.mubr.msk.bf16.gmra.mrb[12].mxu0 %vm1075_vm4, %v9688_v17  ;;  %v462_v29 = vsel %vm12500_vm5, %v457_v18, %v461_v0  ;;  %v3770_v30 = vor.u32 %v3769_v25, %v3766_v20  ;;  %v479_v35 = vshll.u32 %v208_v16, 16  ;;  %v483_v38 = vshrl.u32 %v208_v16, 16  ;;  %v9625_v16 = vld [vmem:[%s12471_s6 + $0x78] sm:$0xf] }
  0x63   : > { %v472_v57 = vsel %vm12500_vm5, %v467_v26, %v471_v14  ;;  %v3779_v36 = vrot.slane %v3777_v23, 4  ;;  %v3785_v37 = vrot.slane %v3783_v28, 5  ;;  %v475_v42 = vrot.slane %v473_v34, 4 }
  0x64   : > { %v9268_v40 = vcombine.low %v462_v29, %v472_v57  ;;  %v3771_v41 = vrot.slane %v3770_v30, 4  ;;  %v481_v43 = vrot.slane %v479_v35, 5  ;;  %v485_v45 = vrot.slane %v483_v38, 4  ;;  %v9626_v29 = vld [vmem:[%s12471_s6 + $0x7c] sm:$0xf] }
  0x65   : > { %v3780_v44 = vor.u32 %v3779_v36, %v3775_v27  ;;  %v489_v47 = vshll.u32 %v258_v31, 16  ;;  %v3787_v49 = vshrl.u32 %v9622_v9, 16  ;;  %v476_v50 = vor.u32 %v475_v42, %v471_v14  ;;  %v210_v9 = vld [vmem:[%s12471_s6 + $0x68] sm:$0xf]  ;;  %v9627_v35 = vld [vmem:[%s12471_s6 + $0x80] sm:$0xf] }
  0x66   : > { %10857 = vmatprep.mubr.msk.bf16.mxu1 %vm1075_vm4, %v9268_v40  ;;  %v3776_v46 = vsel %vm12500_vm5, %v3771_v41, %v3775_v27  ;;  %v3793_v51 = vshll.u32 %v9623_v39, 16  ;;  %v3797_v52 = vshrl.u32 %v9623_v39, 16  ;;  %v486_v56 = vor.u32 %v485_v45, %v481_v43  ;;  %v212_v40 = vld [vmem:[%s12471_s6 + $0x70] sm:$0xf] }
  0x67   : > { %v3781_v54 = vrot.slane %v3780_v44, 4  ;;  %v491_v58 = vrot.slane %v489_v47, 5  ;;  %v3789_v59 = vrot.slane %v3787_v49, 4  ;;  %v477_v61 = vrot.slane %v476_v50, 4 }
  0x68   : > { %v3795_v62 = vrot.slane %v3793_v51, 5  ;;  %v3799_v0 = vrot.slane %v3797_v52, 4  ;;  %v3803_v2 = vshll.u32 %v9624_v48, 16  ;;  %v487_v6 = vrot.slane %v486_v56, 4 }
  0x69   : > { %v3786_v5 = vsel %vm12500_vm5, %v3781_v54, %v3785_v37  ;;  %v3790_v8 = vor.u32 %v3789_v59, %v3785_v37  ;;  %v494_v10 = vshrl.u32 %v209_v53, 16  ;;  %v482_v11 = vsel %vm12500_vm5, %v477_v61, %v481_v43  ;;  %v259_v59 = vld [vmem:[%s12471_s6 + $0x74] sm:$0x1] }
  0x6a   : > { %v9689_v12 = vcombine.low %v3776_v46, %v3786_v5  ;;  %v3800_v13 = vor.u32 %v3799_v0, %v3795_v62  ;;  %v3805_v14 = vrot.slane %v3803_v2, 5  ;;  %v492_v17 = vsel %vm12500_vm5, %v487_v6, %v491_v58  ;;  %v9628_v5 = vld [vmem:[%s12471_s6 + $0x84] sm:$0xf] }
  0x6b   : > { %v3791_v18 = vrot.slane %v3790_v8, 4  ;;  %v496_v20 = vrot.slane %v494_v10, 4  ;;  %v497_v25 = vshll.u32 %v209_v53, 16  ;;  %v9269_v26 = vcombine.low %v482_v11, %v492_v17 }
  0x6c   : > { %11121 = vmatprep.mubr.msk.bf16.mxu0 %vm1075_vm4, %v9689_v12  ;;  %v3801_v27 = vrot.slane %v3800_v13, 4  ;;  %v503_v23 = vshll.u32 %v210_v9, 16  ;;  %v507_v28 = vshrl.u32 %v210_v9, 16  ;;  %v513_v34 = vshll.u32 %v211_v15, 16 }
  0x6d   : > { %v3796_v30 = vsel %vm12500_vm5, %v3791_v18, %v3795_v62  ;;  %v499_v31 = vrot.slane %v497_v25, 5  ;;  %v3808_v57 = vshrl.u32 %v9625_v16, 16  ;;  %10858 = vmatmul.mubr.msk.bf16.gmra.mrb[16].mxu1 %vm1075_vm4, %v9269_v26  ;;  %v3811_v39 = vshll.u32 %v9625_v16, 16  ;;  %v213_v16 = vld [vmem:[%s12471_s6 + $0x78] sm:$0xf] }
  0x6e   : > { %v3806_v36 = vsel %vm12500_vm5, %v3801_v27, %v3805_v14  ;;  %v505_v37 = vrot.slane %v503_v23, 5  ;;  %v509_v38 = vrot.slane %v507_v28, 4  ;;  %v515_v43 = vrot.slane %v513_v34, 5  ;;  %v9629_v14 = vld [vmem:[%s12471_s6 + $0x88] sm:$0x1] }
  0x6f   : > { %v9690_v41 = vcombine.low %v3796_v30, %v3806_v36  ;;  %v500_v42 = vor.u32 %v499_v31, %v496_v20  ;;  %v3810_v44 = vrot.slane %v3808_v57, 4  ;;  %v3813_v47 = vrot.slane %v3811_v39, 5  ;;  %v214_v26 = vld [vmem:[%s12471_s6 + $0x7c] sm:$0xf]  ;;  %v215_v30 = vld [vmem:[%s12471_s6 + $0x80] sm:$0xf] }
  0x70   : > { %v510_v45 = vor.u32 %v509_v38, %v505_v37  ;;  %v3817_v48 = vshll.u32 %v9626_v29, 16  ;;  %v3821_v49 = vshrl.u32 %v9626_v29, 16  ;;  %v3827_v50 = vshll.u32 %v9627_v35, 16 }
  0x71   : > { %11122 = vmatmul.mubr.msk.bf16.gmra.mrb[16].mxu0 %vm1075_vm4, %v9690_v41  ;;  %v501_v46 = vrot.slane %v500_v42, 4  ;;  %v517_v51 = vshrl.u32 %v211_v15, 16  ;;  %v523_v52 = vshll.u32 %v212_v40, 16  ;;  %v3814_v54 = vor.u32 %v3813_v47, %v3810_v44 }
  0x72   : > { %v511_v53 = vrot.slane %v510_v45, 4  ;;  %v3819_v56 = vrot.slane %v3817_v48, 5  ;;  %v3823_v58 = vrot.slane %v3821_v49, 4  ;;  %v3829_v62 = vrot.slane %v3827_v50, 5  ;;  %v9630_v49 = vld [vmem:[%s12471_s6 + $0x8c] sm:$0xf] }
  0x73   : > { %v506_v61 = vsel %vm12500_vm5, %v501_v46, %v505_v37  ;;  %v519_v0 = vrot.slane %v517_v51, 4  ;;  %v525_v2 = vrot.slane %v523_v52, 5  ;;  %v3815_v8 = vrot.slane %v3814_v54, 4 }
  0x74   : > { %v516_v6 = vsel %vm12500_vm5, %v511_v53, %v515_v43  ;;  %v3824_v9 = vor.u32 %v3823_v58, %v3819_v56  ;;  %v527_v10 = vshrl.u32 %v212_v40, 16  ;;  %v533_v13 = vshll.u32 %v259_v59, 16  ;;  %v9631_v53 = vld [vmem:[%s12471_s6 + $0x90] sm:$0xf] }
  0x75   : > { %v9270_v12 = vcombine.low %v506_v61, %v516_v6  ;;  %v520_v11 = vor.u32 %v519_v0, %v515_v43  ;;  %v3831_v15 = vshrl.u32 %v9627_v35, 16  ;;  %v3820_v17 = vsel %vm12500_vm5, %v3815_v8, %v3819_v56  ;;  %v9632_v61 = vld [vmem:[%s12471_s6 + $0x94] sm:$0xf]  ;;  %v216_v6 = vld [vmem:[%s12471_s6 + $0x84] sm:$0xf] }
  0x76   : > { %v3825_v18 = vrot.slane %v3824_v9, 4  ;;  %v529_v20 = vrot.slane %v527_v10, 4  ;;  %v3837_v25 = vshll.u32 %v9628_v5, 16  ;;  %v535_v23 = vrot.slane %v533_v13, 5 }
  0x77   : > { %10861 = vmatprep.mubr.msk.bf16.mxu1 %vm1075_vm4, %v9270_v12  ;;  %v521_v27 = vrot.slane %v520_v11, 4  ;;  %v3833_v28 = vrot.slane %v3831_v15, 4  ;;  %v3841_v29 = vshrl.u32 %v9628_v5, 16  ;;  %v3847_v57 = vshll.u32 %v9629_v14, 16  ;;  %v260_v11 = vld [vmem:[%s12471_s6 + $0x88] sm:$0x1] }
  0x78   : > { %v3830_v31 = vsel %vm12500_vm5, %v3825_v18, %v3829_v62  ;;  %v530_v34 = vor.u32 %v529_v20, %v525_v2  ;;  %v3839_v35 = vrot.slane %v3837_v25, 5  ;;  %v538_v42 = vshrl.u32 %v213_v16, 16 }
  0x79   : > { %v9691_v36 = vcombine.low %v3820_v17, %v3830_v31  ;;  %v526_v37 = vsel %vm12500_vm5, %v521_v27, %v525_v2  ;;  %v3834_v38 = vor.u32 %v3833_v28, %v3829_v62  ;;  %v3843_v39 = vrot.slane %v3841_v29, 4 }
  0x7a   : > { %v531_v40 = vrot.slane %v530_v34, 4  ;;  %v3849_v41 = vrot.slane %v3847_v57, 5  ;;  %v541_v43 = vshll.u32 %v213_v16, 16  ;;  %v547_v47 = vshll.u32 %v214_v26, 16  ;;  %v9633_v57 = vld [vmem:[%s12471_s6 + $0x98] sm:$0xf] }
  0x7b   : > { %11125 = vmatprep.mubr.msk.bf16.mxu0 %vm1075_vm4, %v9691_v36  ;;  %v3835_v44 = vrot.slane %v3834_v38, 4  ;;  %v3844_v45 = vor.u32 %v3843_v39, %v3839_v35  ;;  %v551_v48 = vshrl.u32 %v214_v26, 16  ;;  %v540_v50 = vrot.slane %v538_v42, 4 }
  0x7c   : > { %v536_v46 = vsel %vm12500_vm5, %v531_v40, %v535_v23  ;;  %v543_v51 = vrot.slane %v541_v43, 5  ;;  %v557_v52 = vshll.u32 %v215_v30, 16  ;;  %v549_v59 = vrot.slane %v547_v47, 5 }
  0x7d   : > { %v9271_v54 = vcombine.low %v526_v37, %v536_v46  ;;  %v3840_v56 = vsel %vm12500_vm5, %v3835_v44, %v3839_v35  ;;  %v3845_v58 = vrot.slane %v3844_v45, 4  ;;  %v553_v0 = vrot.slane %v551_v48, 4  ;;  %v9634_v44 = vld [vmem:[%s12471_s6 + $0x9c] sm:$0x1] }
  0x7e   : > { %v544_v62 = vor.u32 %v543_v51, %v540_v50  ;;  %v559_v2 = vrot.slane %v557_v52, 5  ;;  %v3852_v5 = vshrl.u32 %v9630_v49, 16  ;;  %v3855_v9 = vshll.u32 %v9630_v49, 16  ;;  %v217_v49 = vld [vmem:[%s12471_s6 + $0x8c] sm:$0xf] }
  0x7f   : > { %10862 = vmatmul.mubr.msk.bf16.gmra.mrb[20].mxu1 %vm1075_vm4, %v9271_v54  ;;  %v3850_v8 = vsel %vm12500_vm5, %v3845_v58, %v3849_v41  ;;  %v3861_v10 = vshll.u32 %v9631_v53, 16  ;;  %v3865_v12 = vshrl.u32 %v9631_v53, 16  ;;  %v554_v15 = vor.u32 %v553_v0, %v549_v59  ;;  %v218_v53 = vld [vmem:[%s12471_s6 + $0x90] sm:$0xf] }
  0x80   : > { %v9692_v13 = vcombine.low %v3840_v56, %v3850_v8  ;;  %v545_v14 = vrot.slane %v544_v62, 4  ;;  %v3854_v16 = vrot.slane %v3852_v5, 4  ;;  %v3857_v17 = vrot.slane %v3855_v9, 5  ;;  %v219_v62 = vld [vmem:[%s12471_s6 + $0x94] sm:$0xf] }
  0x81   : > { %v3863_v18 = vrot.slane %v3861_v10, 5  ;;  %v3867_v20 = vrot.slane %v3865_v12, 4  ;;  %v3871_v25 = vshll.u32 %v9632_v61, 16  ;;  %v555_v27 = vrot.slane %v554_v15, 4 }
  0x82   : > { %11126 = vmatmul.mubr.msk.bf16.gmra.mrb[20].mxu0 %vm1075_vm4, %v9692_v13  ;;  %v550_v26 = vsel %vm12500_vm5, %v545_v14, %v549_v59  ;;  %v561_v23 = vshrl.u32 %v215_v30, 16  ;;  %v567_v28 = vshll.u32 %v216_v6, 16  ;;  %v3858_v29 = vor.u32 %v3857_v17, %v3854_v16  ;;  %v9636_v16 = vld [vmem:[%s12471_s6 + $0xa4] sm:$0xf] }
  0x83   : > { %v3868_v31 = vor.u32 %v3867_v20, %v3863_v18  ;;  %v3873_v34 = vrot.slane %v3871_v25, 5  ;;  %v571_v35 = vshrl.u32 %v216_v6, 16  ;;  %v560_v36 = vsel %vm12500_vm5, %v555_v27, %v559_v2 }
  0x84   : > { %v563_v37 = vrot.slane %v561_v23, 4  ;;  %v569_v38 = vrot.slane %v567_v28, 5  ;;  %v577_v39 = vshll.u32 %v260_v11, 16  ;;  %v9272_v40 = vcombine.low %v550_v26, %v560_v36  ;;  %v220_v36 = vld [vmem:[%s12471_s6 + $0x98] sm:$0xf] }
  0x85   : > { %v3859_v41 = vrot.slane %v3858_v29, 4  ;;  %v3869_v42 = vrot.slane %v3868_v31, 4  ;;  %v573_v43 = vrot.slane %v571_v35, 4  ;;  %v3875_v47 = vshrl.u32 %v9632_v61, 16  ;;  %v9635_v61 = vld [vmem:[%s12471_s6 + $0xa0] sm:$0xf] }
  0x86   : > { %v564_v30 = vor.u32 %v563_v37, %v559_v2  ;;  %v579_v45 = vrot.slane %v577_v39, 5  ;;  %v3881_v48 = vshll.u32 %v9633_v57, 16  ;;  %10865 = vmatprep.mubr.msk.bf16.mxu1 %vm1075_vm4, %v9272_v40  ;;  %v3885_v52 = vshrl.u32 %v9633_v57, 16 }
  0x87   : > { %v3864_v46 = vsel %vm12500_vm5, %v3859_v41, %v3863_v18  ;;  %v3874_v50 = vsel %vm12500_vm5, %v3869_v42, %v3873_v34  ;;  %v574_v51 = vor.u32 %v573_v43, %v569_v38  ;;  %v3877_v58 = vrot.slane %v3875_v47, 4  ;;  %v261_v41 = vld [vmem:[%s12471_s6 + $0x9c] sm:$0x1] }
  0x88   : > { %v9693_v54 = vcombine.low %v3864_v46, %v3874_v50  ;;  %v565_v56 = vrot.slane %v564_v30, 4  ;;  %v3883_v59 = vrot.slane %v3881_v48, 5  ;;  %v3887_v2 = vrot.slane %v3885_v52, 4 }
  0x89   : > { %v575_v0 = vrot.slane %v574_v51, 4  ;;  %v3891_v5 = vshll.u32 %v9634_v44, 16  ;;  %v582_v6 = vshrl.u32 %v217_v49, 16  ;;  %v3878_v9 = vor.u32 %v3877_v58, %v3873_v34  ;;  %v9637_v34 = vld [vmem:[%s12471_s6 + $0xa8] sm:$0xf] }
  0x8a   : > { %11129 = vmatprep.mubr.msk.bf16.mxu0 %vm1075_vm4, %v9693_v54  ;;  %v570_v8 = vsel %vm12500_vm5, %v565_v56, %v569_v38  ;;  %v585_v10 = vshll.u32 %v217_v49, 16  ;;  %v591_v12 = vshll.u32 %v218_v53, 16  ;;  %v3888_v13 = vor.u32 %v3887_v2, %v3883_v59 }
  0x8b   : > { %v580_v11 = vsel %vm12500_vm5, %v575_v0, %v579_v45  ;;  %v3893_v14 = vrot.slane %v3891_v5, 5  ;;  %v584_v15 = vrot.slane %v582_v6, 4  ;;  %v3879_v18 = vrot.slane %v3878_v9, 4  ;;  %v9639_v9 = vld [vmem:[%s12471_s6 + $0xb0] sm:$0x1] }
  0x8c   : > { %v9273_v17 = vcombine.low %v570_v8, %v580_v11  ;;  %v587_v20 = vrot.slane %v585_v10, 5  ;;  %v593_v25 = vrot.slane %v591_v12, 5  ;;  %v3889_v26 = vrot.slane %v3888_v13, 4  ;;  %v221_v12 = vld [vmem:[%s12471_s6 + $0xa0] sm:$0xf] }
  0x8d   : > { %v595_v27 = vshrl.u32 %v218_v53, 16  ;;  %v601_v23 = vshll.u32 %v219_v62, 16  ;;  %v3896_v28 = vshrl.u32 %v9635_v61, 16  ;;  %v3884_v29 = vsel %vm12500_vm5, %v3879_v18, %v3883_v59 }
  0x8e   : > { %10866 = vmatmul.mubr.msk.bf16.gmra.mrb[24].mxu1 %vm1075_vm4, %v9273_v17  ;;  %v588_v31 = vor.u32 %v587_v20, %v584_v15  ;;  %v3899_v35 = vshll.u32 %v9635_v61, 16  ;;  %v3905_v57 = vshll.u32 %v9636_v16, 16  ;;  %v3894_v37 = vsel %vm12500_vm5, %v3889_v26, %v3893_v14  ;;  %v223_v26 = vld [vmem:[%s12471_s6 + $0xa8] sm:$0xf] }
  0x8f   : > { %v597_v38 = vrot.slane %v595_v27, 4  ;;  %v603_v39 = vrot.slane %v601_v23, 5  ;;  %v3898_v40 = vrot.slane %v3896_v28, 4  ;;  %v9694_v42 = vcombine.low %v3884_v29, %v3894_v37 }
  0x90   : > { %v589_v43 = vrot.slane %v588_v31, 4  ;;  %v3901_v44 = vrot.slane %v3899_v35, 5  ;;  %v3907_v30 = vrot.slane %v3905_v57, 5  ;;  %v3909_v47 = vshrl.u32 %v9636_v16, 16 }
  0x91   : > { %v598_v45 = vor.u32 %v597_v38, %v593_v25  ;;  %v3915_v48 = vshll.u32 %v9637_v34, 16  ;;  %v605_v49 = vshrl.u32 %v219_v62, 16  ;;  %11130 = vmatmul.mubr.msk.bf16.gmra.mrb[24].mxu0 %vm1075_vm4, %v9694_v42  ;;  %v611_v51 = vshll.u32 %v220_v36, 16  ;;  %v9638_v62 = vld [vmem:[%s12471_s6 + $0xac] sm:$0xf] }
  0x92   : > { %v594_v46 = vsel %vm12500_vm5, %v589_v43, %v593_v25  ;;  %v3902_v50 = vor.u32 %v3901_v44, %v3898_v40  ;;  %v615_v52 = vshrl.u32 %v220_v36, 16  ;;  %v3911_v54 = vrot.slane %v3909_v47, 4  ;;  %v222_v25 = vld [vmem:[%s12471_s6 + $0xa4] sm:$0xf]  ;;  %v9745_v44 = vld [vmem:[%s12471_s6 + $0x14] sm:$0xe] }
  0x93   : > { %v599_v53 = vrot.slane %v598_v45, 4  ;;  %v3917_v56 = vrot.slane %v3915_v48, 5  ;;  %v607_v58 = vrot.slane %v605_v49, 4  ;;  %v613_v61 = vrot.slane %v611_v51, 5  ;;  %v9908_v49 = vld [vmem:[%s15465_s1 + $0xc] sm:$0x3] }
  0x94   : > { %v3903_v59 = vrot.slane %v3902_v50, 4  ;;  %v617_v0 = vrot.slane %v615_v52, 4  ;;  %v621_v2 = vshll.u32 %v261_v41, 16  ;;  %v3912_v6 = vor.u32 %v3911_v54, %v3907_v30  ;;  %v224_v51 = vld [vmem:[%s12471_s6 + $0xac] sm:$0xf] }
  0x95   : > { %v604_v5 = vsel %vm12500_vm5, %v599_v53, %v603_v39  ;;  %v608_v8 = vor.u32 %v607_v58, %v603_v39  ;;  %v3919_v10 = vshrl.u32 %v9637_v34, 16  ;;  %v3925_v20 = vshll.u32 %v9638_v62, 16 }
  0x96   : > { %v9274_v11 = vcombine.low %v594_v46, %v604_v5  ;;  %v3908_v13 = vsel %vm12500_vm5, %v3903_v59, %v3907_v30  ;;  %v618_v14 = vor.u32 %v617_v0, %v613_v61  ;;  %v623_v15 = vrot.slane %v621_v2, 5  ;;  %v262_v59 = vld [vmem:[%s12471_s6 + $0xb0] sm:$0x1]  ;;  %v225_v5 = vld [vmem:[%s12471_s6 + $0xb4] sm:$0xf] }
  0x97   : > { %v3913_v16 = vrot.slane %v3912_v6, 4  ;;  %v609_v17 = vrot.slane %v608_v8, 4  ;;  %v3921_v18 = vrot.slane %v3919_v10, 4  ;;  %v3929_v23 = vshrl.u32 %v9638_v62, 16 }
  0x98   : > { %10869 = vmatprep.mubr.msk.bf16.mxu1 %vm1075_vm4, %v9274_v11  ;;  %v619_v27 = vrot.slane %v618_v14, 4  ;;  %v3935_v28 = vshll.u32 %v9639_v9, 16  ;;  %v626_v29 = vshrl.u32 %v221_v12, 16  ;;  %v3927_v57 = vrot.slane %v3925_v20, 5 }
  0x99   : > { %v3918_v31 = vsel %vm12500_vm5, %v3913_v16, %v3917_v56  ;;  %v614_v34 = vsel %vm12500_vm5, %v609_v17, %v613_v61  ;;  %v3922_v35 = vor.u32 %v3921_v18, %v3917_v56  ;;  %v3931_v38 = vrot.slane %v3929_v23, 4  ;;  %v227_v23 = vld [vmem:[%s12471_s6 + $0xbc] sm:$0xf] }
  0x9a   : > { %v9695_v36 = vcombine.low %v3908_v13, %v3918_v31  ;;  %v624_v37 = vsel %vm12500_vm5, %v619_v27, %v623_v15  ;;  %v3937_v39 = vrot.slane %v3935_v28, 5  ;;  %v628_v42 = vrot.slane %v626_v29, 4  ;;  %v9746_v28 = vld [vmem:[%s12471_s6 + $0x28] sm:$0xe] }
  0x9b   : > { %v9275_v40 = vcombine.low %v614_v34, %v624_v37  ;;  %v3923_v41 = vrot.slane %v3922_v35, 4  ;;  %v629_v43 = vshll.u32 %v221_v12, 16  ;;  %v3932_v30 = vor.u32 %v3931_v38, %v3927_v57  ;;  %v228_v37 = vld [vmem:[%s12471_s6 + $0xc0] sm:$0xf] }
  0x9c   : > { %11133 = vmatprep.mubr.msk.bf16.mxu0 %vm1075_vm4, %v9695_v36  ;;  %v635_v45 = vshll.u32 %v222_v25, 16  ;;  %v639_v47 = vshrl.u32 %v222_v25, 16  ;;  %v645_v48 = vshll.u32 %v223_v26, 16  ;;  %vm2065_vm7 = vcmask 1046532  }
  0x9d   : > { %10870 = vmatmul.mubr.msk.bf16.gmra.mrb[28].mxu1 %vm1075_vm4, %v9275_v40  ;;  %v3928_v46 = vsel %vm12500_vm5, %v3923_v41, %v3927_v57  ;;  %v631_v50 = vrot.slane %v629_v43, 5  ;;  %v3933_v52 = vrot.slane %v3932_v30, 4  ;;  %vm12773_vm8 = vmor %vm2064_vm6, %vm2065_vm7  ;;  %v9761_v0 = vrot.slane %v9745_v44, 9 }
  0x9e   : > { %v637_v53 = vrot.slane %v635_v45, 5  ;;  %v641_v54 = vrot.slane %v639_v47, 4  ;;  %v647_v56 = vrot.slane %v645_v48, 5  ;;  %v4941_v2 = vrot.slane %v4939_v63, 4  ;;  %v12102_v47 = vld [vmem:[%s12471_s6 + $0x30] sm:$0xf] }
  0x9f   : > { %v632_v61 = vor.u32 %v631_v50, %v628_v42  ;;  %v12781_v62 = vand.u32 %v9908_v49, %v12466_v4  ;;  %v3938_v6 = vsel %vm12500_vm5, %v3933_v52, %v3937_v39  ;;  %v649_v9 = vshrl.u32 %v223_v26, 16  ;;  %v12101_v42 = vld [vmem:[%s12471_s6 + $0x2c] sm:$0xf] }
  0xa0   : > { %v642_v8 = vor.u32 %v641_v54, %v637_v53  ;;  %v655_v10 = vshll.u32 %v224_v51, 16  ;;  %v9696_v12 = vcombine.low %v3928_v46, %v3938_v6  ;;  %v4940_v13 = vsel %vm12773_vm8, %v9761_v0, %v4939_v63  ;;  %v263_v54 = vld [vmem:[%s12471_s6 + $0xc4] sm:$0x1]  ;;  %v229_v6 = vld [vmem:[%s12471_s6 + $0xc8] sm:$0xf] }
  0xa1   : > { %v633_v11 = vrot.slane %v632_v61, 4  ;;  %v4943_v14 = vsel %vm12773_vm8, %v4941_v2, %v4942_v55  ;;  %11235 = vmatprep.subr.bf16.mxu0 %v12781_v62  ;;  %v651_v17 = vrot.slane %v649_v9, 4  ;;  %v659_v20 = vshrl.u32 %v224_v51, 16  ;;  %v226_v55 = vld [vmem:[%s12471_s6 + $0xb8] sm:$0xf] }
  0xa2   : > { %v643_v15 = vrot.slane %v642_v8, 4  ;;  %v9778_v16 = vcombine.low %v4940_v13, %v4943_v14  ;;  %v657_v18 = vrot.slane %v655_v10, 5  ;;  %11134 = vmatmul.mubr.msk.bf16.gmra.mrb[28].mxu0 %vm1075_vm4, %v9696_v12  ;;  %v665_v63 = vshll.u32 %v262_v59, 16 }
  0xa3   : > { %v638_v19 = vsel %vm12500_vm5, %v633_v11, %v637_v53  ;;  %v4946_v24 = vsel %vm12773_vm8, %v12533_v3, %v4945_v21  ;;  %v652_v26 = vor.u32 %v651_v17, %v647_v56  ;;  %v4949_v27 = vsel %vm12773_vm8, %v12552_v32, %v4948_v22  ;;  %v230_v11 = vld [vmem:[%s12471_s6 + $0xcc] sm:$0xf] }
  0xa4   : > { %v648_v25 = vsel %vm12500_vm5, %v643_v15, %v647_v56  ;;  %11171 = vmatprep.mubr.msk.bf16.mxu0 %vm1075_vm4, %v9778_v16  ;;  %v670_v60 = vshrl.u32 %v225_v5, 16  ;;  %v661_v31 = vrot.slane %v659_v20, 4  ;;  %v667_v3 = vrot.slane %v665_v63, 5  ;;  %v231_v16 = vld [vmem:[%s12471_s6 + $0xd0] sm:$0xf] }
  0xa5   : > { %v9276_v29 = vcombine.low %v638_v19, %v648_v25  ;;  %v9779_v21 = vcombine.low %v4946_v24, %v4949_v27  ;;  %v653_v34 = vrot.slane %v652_v26, 4  ;;  %v673_v57 = vshll.u32 %v225_v5, 16  ;;  %v12103_v19 = vld [vmem:[%s12471_s6 + $0x34] sm:$0xf]  ;;  %v12104_v63 = vld [vmem:[%s12471_s6 + $0x38] sm:$0x1] }
  0xa6   : > { %v672_v35 = vrot.slane %v670_v60, 4  ;;  %v679_v36 = vshll.u32 %v226_v55, 16  ;;  %v662_v1 = vor.u32 %v661_v31, %v657_v18  ;;  %v683_v38 = vshrl.u32 %v226_v55, 16 }
  0xa7   : > { %10873 = vmatprep.mubr.msk.bf16.mxu1 %vm1075_vm4, %v9276_v29  ;;  %v689_v39 = vshll.u32 %v227_v23, 16  ;;  %v9762_v22 = vrot.slane %v9746_v28, 9  ;;  %v658_v32 = vsel %vm12500_vm5, %v653_v34, %v657_v18  ;;  %v675_v40 = vrot.slane %v673_v57, 5 }
  0xa8   : > { %v681_v41 = vrot.slane %v679_v36, 5  ;;  %v4952_v43 = vrot.slane %v12101_v42, 5  ;;  %v663_v44 = vrot.slane %v662_v1, 4  ;;  %v685_v30 = vrot.slane %v683_v38, 4  ;;  %v232_v38 = vld [vmem:[%s12471_s6 + $0xd4] sm:$0xf] }
  0xa9   : > { %v691_v45 = vrot.slane %v689_v39, 5  ;;  %v4955_v48 = vrot.slane %v12102_v47, 5  ;;  %v676_v49 = vor.u32 %v675_v40, %v672_v35  ;;  %v693_v51 = vshrl.u32 %v227_v23, 16  ;;  %v9747_v23 = vld [vmem:[%s12471_s6 + $0x3c] sm:$0xe] }
  0xaa   : > { %v4953_v46 = vsel %vm12773_vm8, %v9762_v22, %v4952_v43  ;;  %v4954_v50 = vrot.slane %v4952_v43, 4  ;;  %v668_v52 = vsel %vm12500_vm5, %v663_v44, %v667_v3  ;;  %11172 = vmatmul.mubr.msk.bf16.vlgmr.msra.gmra.mrb[0].mxu0 %vm1075_vm4, %v9779_v21  ;;  %v686_v53 = vor.u32 %v685_v30, %v681_v41  ;;  %v12105_v44 = vld [vmem:[%s12471_s6 + $0x40] sm:$0xf] }
  0xab   : > { %v699_v56 = vshll.u32 %v228_v37, 16  ;;  %v703_v59 = vshrl.u32 %v228_v37, 16  ;;  %v9277_v61 = vcombine.low %v658_v32, %v668_v52  ;;  %11236 = vmatpush3.bf16.msra.mxu0 %v12781_v62  ;;  %v677_v0 = vrot.slane %v676_v49, 4 }
  0xac   : > { %v4956_v2 = vsel %vm12773_vm8, %v4954_v50, %v4955_v48  ;;  %v695_v5 = vrot.slane %v693_v51, 4  ;;  %v687_v8 = vrot.slane %v686_v53, 4  ;;  %v709_v14 = vshll.u32 %v263_v54, 16 }
  0xad   : > { %v9780_v9 = vcombine.low %v4953_v46, %v4956_v2  ;;  %v701_v10 = vrot.slane %v699_v56, 5  ;;  %v705_v12 = vrot.slane %v703_v59, 4  ;;  %10874 = vmatmul.mubr.msk.bf16.gmra.mrb[32].mxu1 %vm1075_vm4, %v9277_v61  ;;  %v682_v13 = vsel %vm12500_vm5, %v677_v0, %v681_v41  ;;  %v233_v56 = vld [vmem:[%s12471_s6 + $0xdc] sm:$0xf]  ;;  %v234_v59 = vld [vmem:[%s12471_s6 + $0xe0] sm:$0xf] }
  0xae   : > { %v696_v62 = vor.u32 %v695_v5, %v691_v45  ;;  %v4957_v15 = vrot.slane %v4955_v48, 4  ;;  %v692_v17 = vsel %vm12500_vm5, %v687_v8, %v691_v45  ;;  %v4958_v20 = vrot.slane %v12103_v19, 5  ;;  %v264_v45 = vld [vmem:[%s12471_s6 + $0xd8] sm:$0x1]  ;;  %v12106_v48 = vld [vmem:[%s12471_s6 + $0x44] sm:$0xf] }
  0xaf   : > { %11175 = vmatprep.mubr.msk.bf16.mxu0 %vm1075_vm4, %v9780_v9  ;;  %v706_v18 = vor.u32 %v705_v12, %v701_v10  ;;  %v4961_v24 = vrot.slane %v12104_v63, 5  ;;  %v9278_v55 = vcombine.low %v682_v13, %v692_v17  ;;  %v711_v26 = vrot.slane %v709_v14, 5  ;;  %v235_v14 = vld [vmem:[%s12471_s6 + $0xe4] sm:$0xf]  ;;  %v12107_v17 = vld [vmem:[%s12471_s6 + $0x48] sm:$0xf] }
  0xb0   : > { %v697_v25 = vrot.slane %v696_v62, 4  ;;  %v714_v27 = vshrl.u32 %v229_v6, 16  ;;  %v4959_v28 = vsel %vm12773_vm8, %v4957_v15, %v4958_v20  ;;  %v4960_v29 = vrot.slane %v4958_v20, 4  ;;  %v12108_v19 = vld [vmem:[%s12471_s6 + $0x4c] sm:$0x1] }
  0xb1   : > { %v707_v60 = vrot.slane %v706_v18, 4  ;;  %v717_v31 = vshll.u32 %v229_v6, 16  ;;  %10877 = vmatprep.mubr.msk.bf16.mxu1 %vm1075_vm4, %v9278_v55  ;;  %v723_v34 = vshll.u32 %v230_v11, 16  ;;  %v727_v35 = vshrl.u32 %v230_v11, 16 }
  0xb2   : > { %v702_v3 = vsel %vm12500_vm5, %v697_v25, %v701_v10  ;;  %v716_v21 = vrot.slane %v714_v27, 4  ;;  %v4962_v36 = vsel %vm12773_vm8, %v4960_v29, %v4961_v24  ;;  %v733_v1 = vshll.u32 %v231_v16, 16  ;;  %v236_v29 = vld [vmem:[%s12471_s6 + $0xe8] sm:$0xf] }
  0xb3   : > { %v712_v57 = vsel %vm12500_vm5, %v707_v60, %v711_v26  ;;  %v719_v37 = vrot.slane %v717_v31, 5  ;;  %v9781_v22 = vcombine.low %v4959_v28, %v4962_v36  ;;  %v725_v32 = vrot.slane %v723_v34, 5  ;;  %v9748_v26 = vld [vmem:[%s12471_s6 + $0x50] sm:$0xe] }
  0xb4   : > { %v9279_v39 = vcombine.low %v702_v3, %v712_v57  ;;  %v729_v40 = vrot.slane %v727_v35, 4  ;;  %v735_v42 = vrot.slane %v733_v1, 5  ;;  %v9763_v43 = vrot.slane %v9747_v23, 9  ;;  %v265_v35 = vld [vmem:[%s12471_s6 + $0xec] sm:$0x1] }
  0xb5   : > { %v720_v41 = vor.u32 %v719_v37, %v716_v21  ;;  %v4965_v30 = vrot.slane %v12105_v44, 5  ;;  %11176 = vmatmul.mubr.msk.bf16.gmra.mrb[4].mxu0 %vm1075_vm4, %v9781_v22  ;;  %v4968_v49 = vrot.slane %v12106_v48, 5  ;;  %v737_v46 = vshrl.u32 %v231_v16, 16  ;;  %v12110_v44 = vld [vmem:[%s12471_s6 + $0x58] sm:$0xf] }
  0xb6   : > { %10878 = vmatmul.mubr.msk.bf16.gmra.mrb[36].mxu1 %vm1075_vm4, %v9279_v39  ;;  %v730_v47 = vor.u32 %v729_v40, %v725_v32  ;;  %v743_v50 = vshll.u32 %v232_v38, 16  ;;  %v747_v54 = vshrl.u32 %v232_v38, 16  ;;  %v753_v5 = vshll.u32 %v264_v45, 16 }
  0xb7   : > { %v721_v51 = vrot.slane %v720_v41, 4  ;;  %v4966_v52 = vsel %vm12773_vm8, %v9763_v43, %v4965_v30  ;;  %v4967_v53 = vrot.slane %v4965_v30, 4  ;;  %v739_v0 = vrot.slane %v737_v46, 4  ;;  %v237_v46 = vld [vmem:[%s12471_s6 + $0xf0] sm:$0xf] }
  0xb8   : > { %v731_v61 = vrot.slane %v730_v47, 4  ;;  %v745_v2 = vrot.slane %v743_v50, 5  ;;  %v749_v9 = vrot.slane %v747_v54, 4  ;;  %v4970_v10 = vrot.slane %v4968_v49, 4 }
  0xb9   : > { %v726_v6 = vsel %vm12500_vm5, %v721_v51, %v725_v32  ;;  %v4969_v8 = vsel %vm12773_vm8, %v4967_v53, %v4968_v49  ;;  %v740_v13 = vor.u32 %v739_v0, %v735_v42  ;;  %v755_v62 = vrot.slane %v753_v5, 5 }
  0xba   : > { %v736_v12 = vsel %vm12500_vm5, %v731_v61, %v735_v42  ;;  %v9782_v11 = vcombine.low %v4966_v52, %v4969_v8  ;;  %v750_v16 = vor.u32 %v749_v9, %v745_v2  ;;  %v4971_v18 = vrot.slane %v12107_v17, 5  ;;  %v12109_v42 = vld [vmem:[%s12471_s6 + $0x54] sm:$0xf] }
  0xbb   : > { %v9280_v15 = vcombine.low %v726_v6, %v736_v12  ;;  %v4974_v20 = vrot.slane %v12108_v19, 5  ;;  %v741_v63 = vrot.slane %v740_v13, 4  ;;  %v758_v24 = vshrl.u32 %v233_v56, 16  ;;  %v238_v8 = vld [vmem:[%s12471_s6 + $0xf4] sm:$0xf] }
  0xbc   : > { %11179 = vmatprep.mubr.msk.bf16.mxu0 %vm1075_vm4, %v9782_v11  ;;  %v761_v55 = vshll.u32 %v233_v56, 16  ;;  %v767_v25 = vshll.u32 %v234_v59, 16  ;;  %v751_v27 = vrot.slane %v750_v16, 4  ;;  %v4972_v23 = vsel %vm12773_vm8, %v4970_v10, %v4971_v18  ;;  %v239_v13 = vld [vmem:[%s12471_s6 + $0xf8] sm:$0xf] }
  0xbd   : > { %10881 = vmatprep.mubr.msk.bf16.mxu1 %vm1075_vm4, %v9280_v15  ;;  %v4973_v60 = vrot.slane %v4971_v18, 4  ;;  %v771_v28 = vshrl.u32 %v234_v59, 16  ;;  %v746_v31 = vsel %vm12500_vm5, %v741_v63, %v745_v2  ;;  %v760_v3 = vrot.slane %v758_v24, 4  ;;  %v12112_v15 = vld [vmem:[%s12471_s6 + $0x60] sm:$0x1] }
  0xbe   : > { %v763_v21 = vrot.slane %v761_v55, 5  ;;  %v769_v34 = vrot.slane %v767_v25, 5  ;;  %v756_v57 = vsel %vm12500_vm5, %v751_v27, %v755_v62  ;;  %v777_v1 = vshll.u32 %v235_v14, 16  ;;  %v12111_v62 = vld [vmem:[%s12471_s6 + $0x5c] sm:$0xf] }
  0xbf   : > { %v4975_v36 = vsel %vm12773_vm8, %v4973_v60, %v4974_v20  ;;  %v773_v37 = vrot.slane %v771_v28, 4  ;;  %v9281_v38 = vcombine.low %v746_v31, %v756_v57  ;;  %v9764_v32 = vrot.slane %v9748_v26, 9  ;;  %v9749_v19 = vld [vmem:[%s12471_s6 + $0x64] sm:$0xe] }
  0xc0   : > { %v9783_v39 = vcombine.low %v4972_v23, %v4975_v36  ;;  %v764_v22 = vor.u32 %v763_v21, %v760_v3  ;;  %v779_v41 = vrot.slane %v777_v1, 5  ;;  %v4978_v43 = vrot.slane %v12109_v42, 5  ;;  %v240_v3 = vld [vmem:[%s12471_s6 + $0xfc] sm:$0xf] }
  0xc1   : > { %v774_v40 = vor.u32 %v773_v37, %v769_v34  ;;  %v4981_v30 = vrot.slane %v12110_v44, 5  ;;  %10882 = vmatmul.mubr.msk.bf16.gmra.mrb[40].mxu1 %vm1075_vm4, %v9281_v38  ;;  %v781_v47 = vshrl.u32 %v235_v14, 16  ;;  %v787_v48 = vshll.u32 %v236_v29, 16  ;;  %v12113_v38 = vld [vmem:[%s12471_s6 + $0x68] sm:$0xf] }
  0xc2   : > { %11180 = vmatmul.mubr.msk.bf16.gmra.mrb[8].mxu0 %vm1075_vm4, %v9783_v39  ;;  %v765_v45 = vrot.slane %v764_v22, 4  ;;  %v791_v49 = vshrl.u32 %v236_v29, 16  ;;  %v4979_v51 = vsel %vm12773_vm8, %v9764_v32, %v4978_v43  ;;  %v4980_v52 = vrot.slane %v4978_v43, 4  ;;  %v266_v22 = vld [vmem:[%s12471_s6 + $0x100] sm:$0x1] }
  0xc3   : > { %v775_v50 = vrot.slane %v774_v40, 4  ;;  %v797_v53 = vshll.u32 %v265_v35, 16  ;;  %v783_v56 = vrot.slane %v781_v47, 4  ;;  %v789_v59 = vrot.slane %v787_v48, 5  ;;  %v12916_v44 = vld [vmem:[%s12471_s6 + $0x104] sm:$0xf] }
  0xc4   : > { %v770_v54 = vsel %vm12500_vm5, %v765_v45, %v769_v34  ;;  %v793_v61 = vrot.slane %v791_v49, 4  ;;  %v4982_v2 = vsel %vm12773_vm8, %v4980_v52, %v4981_v30  ;;  %v4983_v6 = vrot.slane %v4981_v30, 4  ;;  %v12922_v49 = vld [vmem:[%s12471_s6 + $0x108] sm:$0xf] }
  0xc5   : > { %v780_v0 = vsel %vm12500_vm5, %v775_v50, %v779_v41  ;;  %v799_v5 = vrot.slane %v797_v53, 5  ;;  %v9784_v10 = vcombine.low %v4979_v51, %v4982_v2  ;;  %v784_v12 = vor.u32 %v783_v56, %v779_v41  ;;  %v12114_v41 = vld [vmem:[%s12471_s6 + $0x6c] sm:$0xf] }
  0xc6   : > { %v9282_v9 = vcombine.low %v770_v54, %v780_v0  ;;  %v794_v11 = vor.u32 %v793_v61, %v789_v59  ;;  %v4984_v14 = vrot.slane %v12111_v62, 5  ;;  %v4987_v16 = vrot.slane %v12112_v15, 5  ;;  %v9750_v62 = vld [vmem:[%s12471_s6 + $0x78] sm:$0xe] }
  0xc7   : > { %v802_v17 = vshrl.u32 %v237_v46, 16  ;;  %v805_v18 = vshll.u32 %v237_v46, 16  ;;  %11183 = vmatprep.mubr.msk.bf16.mxu0 %vm1075_vm4, %v9784_v10  ;;  %v785_v20 = vrot.slane %v784_v12, 4  ;;  %v811_v24 = vshll.u32 %v238_v8, 16  ;;  %v12116_v12 = vld [vmem:[%s12471_s6 + $0x74] sm:$0x1] }
  0xc8   : > { %10885 = vmatprep.mubr.msk.bf16.mxu1 %vm1075_vm4, %v9282_v9  ;;  %v795_v63 = vrot.slane %v794_v11, 4  ;;  %v815_v55 = vshrl.u32 %v238_v8, 16  ;;  %v4985_v25 = vsel %vm12773_vm8, %v4983_v6, %v4984_v14  ;;  %v4986_v26 = vrot.slane %v4984_v14, 4  ;;  %v12931_v6 = vld [vmem:[%s12471_s6 + $0x10c] sm:$0xf] }
  0xc9   : > { %v804_v27 = vrot.slane %v802_v17, 4  ;;  %v807_v23 = vrot.slane %v805_v18, 5  ;;  %v790_v60 = vsel %vm12500_vm5, %v785_v20, %v789_v59  ;;  %v813_v29 = vrot.slane %v811_v24, 5  ;;  %v12115_v9 = vld [vmem:[%s12471_s6 + $0x70] sm:$0xf] }
  0xca   : > { %v800_v28 = vsel %vm12500_vm5, %v795_v63, %v799_v5  ;;  %v817_v31 = vrot.slane %v815_v55, 4  ;;  %v4988_v34 = vsel %vm12773_vm8, %v4986_v26, %v4987_v16  ;;  %v821_v57 = vshll.u32 %v239_v13, 16 }
  0xcb   : > { %v9283_v21 = vcombine.low %v790_v60, %v800_v28  ;;  %v808_v35 = vor.u32 %v807_v23, %v804_v27  ;;  %v9785_v36 = vcombine.low %v4985_v25, %v4988_v34  ;;  %v9765_v1 = vrot.slane %v9749_v19, 9  ;;  %v12947_v27 = vld [vmem:[%s12471_s6 + $0x110] sm:$0xf]  ;;  %v267_v23 = vld [vmem:[%s12471_s6 + $0x114] sm:$0x1] }
  0xcc   : > { %v818_v37 = vor.u32 %v817_v31, %v813_v29  ;;  %v4991_v39 = vrot.slane %v12113_v38, 5  ;;  %v823_v40 = vrot.slane %v821_v57, 5  ;;  %v4994_v42 = vrot.slane %v12114_v41, 5  ;;  %v12118_v38 = vld [vmem:[%s12471_s6 + $0x80] sm:$0xf] }
  0xcd   : > { %10886 = vmatmul.mubr.msk.bf16.gmra.mrb[44].mxu1 %vm1075_vm4, %v9283_v21  ;;  %v809_v32 = vrot.slane %v808_v35, 4  ;;  %v825_v43 = vshrl.u32 %v239_v13, 16  ;;  %11184 = vmatmul.mubr.msk.bf16.gmra.mrb[12].mxu0 %vm1075_vm4, %v9785_v36  ;;  %v831_v48 = vshll.u32 %v240_v3, 16  ;;  %v835_v51 = vshrl.u32 %v240_v3, 16  ;;  %v12117_v35 = vld [vmem:[%s12471_s6 + $0x7c] sm:$0xf] }
  0xce   : > { %v819_v30 = vrot.slane %v818_v37, 4  ;;  %v4992_v45 = vsel %vm12773_vm8, %v9765_v1, %v4991_v39  ;;  %v4993_v47 = vrot.slane %v4991_v39, 4  ;;  %v841_v52 = vshll.u32 %v266_v22, 16 }
  0xcf   : > { %v814_v46 = vsel %vm12500_vm5, %v809_v32, %v813_v29  ;;  %v827_v50 = vrot.slane %v825_v43, 4  ;;  %v833_v56 = vrot.slane %v831_v48, 5  ;;  %v4996_v59 = vrot.slane %v4994_v42, 4  ;;  %v12968_v48 = vld [vmem:[%s12471_s6 + $0x11c] sm:$0xf] }
  0xd0   : > { %v824_v53 = vsel %vm12500_vm5, %v819_v30, %v823_v40  ;;  %v4995_v54 = vsel %vm12773_vm8, %v4993_v47, %v4994_v42  ;;  %v837_v5 = vrot.slane %v835_v51, 4  ;;  %v843_v8 = vrot.slane %v841_v52, 5  ;;  %v12962_v42 = vld [vmem:[%s12471_s6 + $0x118] sm:$0xf] }
  0xd1   : > { %v9284_v61 = vcombine.low %v814_v46, %v824_v53  ;;  %v9786_v0 = vcombine.low %v4992_v45, %v4995_v54  ;;  %v828_v2 = vor.u32 %v827_v50, %v823_v40  ;;  %v4997_v10 = vrot.slane %v12115_v9, 5 }
  0xd2   : > { %v5000_v11 = vrot.slane %v12116_v12, 5  ;;  %v846_v13 = vshrl.u32 %v12916_v44, 16  ;;  %v838_v15 = vor.u32 %v837_v5, %v833_v56  ;;  %v849_v16 = vshll.u32 %v12916_v44, 16  ;;  %v12120_v12 = vld [vmem:[%s12471_s6 + $0x88] sm:$0x1] }
  0xd3   : > { %10889 = vmatprep.mubr.msk.bf16.mxu1 %vm1075_vm4, %v9284_v61  ;;  %11187 = vmatprep.mubr.msk.bf16.mxu0 %vm1075_vm4, %v9786_v0  ;;  %v829_v14 = vrot.slane %v828_v2, 4  ;;  %v855_v17 = vshll.u32 %v12922_v49, 16  ;;  %v4998_v18 = vsel %vm12773_vm8, %v4996_v59, %v4997_v10  ;;  %v4999_v19 = vrot.slane %v4997_v10, 4  ;;  %v12977_v61 = vld [vmem:[%s12471_s6 + $0x120] sm:$0xf] }
  0xd4   : > { %v848_v20 = vrot.slane %v846_v13, 4  ;;  %v859_v63 = vshrl.u32 %v12922_v49, 16  ;;  %v839_v55 = vrot.slane %v838_v15, 4  ;;  %v851_v25 = vrot.slane %v849_v16, 5 }
  0xd5   : > { %v834_v24 = vsel %vm12500_vm5, %v829_v14, %v833_v56  ;;  %v857_v26 = vrot.slane %v855_v17, 5  ;;  %v5001_v60 = vsel %vm12773_vm8, %v4999_v19, %v5000_v11  ;;  %v865_v29 = vshll.u32 %v12931_v6, 16  ;;  %v9751_v14 = vld [vmem:[%s12471_s6 + $0x8c] sm:$0xe] }
  0xd6   : > { %v861_v28 = vrot.slane %v859_v63, 4  ;;  %v9766_v31 = vrot.slane %v9750_v62, 9  ;;  %v844_v3 = vsel %vm12500_vm5, %v839_v55, %v843_v8  ;;  %v9787_v21 = vcombine.low %v4998_v18, %v5001_v60  ;;  %v12119_v8 = vld [vmem:[%s12471_s6 + $0x84] sm:$0xf] }
  0xd7   : > { %v852_v34 = vor.u32 %v851_v25, %v848_v20  ;;  %v5004_v57 = vrot.slane %v12117_v35, 5  ;;  %v9285_v36 = vcombine.low %v834_v24, %v844_v3  ;;  %v867_v1 = vrot.slane %v865_v29, 5  ;;  %v12991_v55 = vld [vmem:[%s12471_s6 + $0x124] sm:$0xf] }
  0xd8   : > { %v862_v37 = vor.u32 %v861_v28, %v857_v26  ;;  %v5007_v39 = vrot.slane %v12118_v38, 5  ;;  %11188 = vmatmul.mubr.msk.bf16.gmra.mrb[16].mxu0 %vm1075_vm4, %v9787_v21  ;;  %v869_v41 = vshrl.u32 %v12931_v6, 16  ;;  %v875_v30 = vshll.u32 %v12947_v27, 16  ;;  %v268_v28 = vld [vmem:[%s12471_s6 + $0x128] sm:$0x1] }
  0xd9   : > { %v853_v22 = vrot.slane %v852_v34, 4  ;;  %v5005_v32 = vsel %vm12773_vm8, %v9766_v31, %v5004_v57  ;;  %v5006_v40 = vrot.slane %v5004_v57, 4  ;;  %10890 = vmatmul.mubr.msk.bf16.gmra.mrb[48].mxu1 %vm1075_vm4, %v9285_v36  ;;  %v879_v45 = vshrl.u32 %v12947_v27, 16  ;;  %v12121_v36 = vld [vmem:[%s12471_s6 + $0x90] sm:$0xf] }
  0xda   : > { %v863_v43 = vrot.slane %v862_v37, 4  ;;  %v885_v47 = vshll.u32 %v267_v23, 16  ;;  %v871_v51 = vrot.slane %v869_v41, 4  ;;  %v5009_v52 = vrot.slane %v5007_v39, 4 }
  0xdb   : > { %v858_v46 = vsel %vm12500_vm5, %v853_v22, %v857_v26  ;;  %v5008_v50 = vsel %vm12773_vm8, %v5006_v40, %v5007_v39  ;;  %v877_v56 = vrot.slane %v875_v30, 5  ;;  %v881_v59 = vrot.slane %v879_v45, 4  ;;  %v12122_v39 = vld [vmem:[%s12471_s6 + $0x94] sm:$0xf]  ;;  %v13011_v45 = vld [vmem:[%s12471_s6 + $0x12c] sm:$0xf] }
  0xdc   : > { %v868_v53 = vsel %vm12500_vm5, %v863_v43, %v867_v1  ;;  %v9788_v54 = vcombine.low %v5005_v32, %v5008_v50  ;;  %v872_v2 = vor.u32 %v871_v51, %v867_v1  ;;  %v887_v5 = vrot.slane %v885_v47, 5  ;;  %v13014_v47 = vld [vmem:[%s12471_s6 + $0x130] sm:$0xf] }
  0xdd   : > { %v9286_v0 = vcombine.low %v858_v46, %v868_v53  ;;  %v5010_v9 = vrot.slane %v12119_v8, 5  ;;  %v882_v10 = vor.u32 %v881_v59, %v877_v56  ;;  %v5013_v11 = vrot.slane %v12120_v12, 5 }
  0xde   : > { %11191 = vmatprep.mubr.msk.bf16.mxu0 %vm1075_vm4, %v9788_v54  ;;  %v890_v13 = vshrl.u32 %v12962_v42, 16  ;;  %v893_v62 = vshll.u32 %v12962_v42, 16  ;;  %v873_v15 = vrot.slane %v872_v2, 4  ;;  %v899_v18 = vshll.u32 %v12968_v48, 16 }
  0xdf   : > { %10893 = vmatprep.mubr.msk.bf16.mxu1 %vm1075_vm4, %v9286_v0  ;;  %v5011_v16 = vsel %vm12773_vm8, %v5009_v52, %v5010_v9  ;;  %v5012_v17 = vrot.slane %v5010_v9, 4  ;;  %v883_v19 = vrot.slane %v882_v10, 4  ;;  %v903_v24 = vshrl.u32 %v12968_v48, 16  ;;  %v13023_v9 = vld [vmem:[%s12471_s6 + $0x134] sm:$0xf] }
  0xe0   : > { %v892_v20 = vrot.slane %v890_v13, 4  ;;  %v895_v63 = vrot.slane %v893_v62, 5  ;;  %v878_v25 = vsel %vm12500_vm5, %v873_v15, %v877_v56  ;;  %v901_v23 = vrot.slane %v899_v18, 5  ;;  %v12124_v62 = vld [vmem:[%s12471_s6 + $0x9c] sm:$0x1] }
  0xe1   : > { %v5014_v26 = vsel %vm12773_vm8, %v5012_v17, %v5013_v11  ;;  %v909_v60 = vshll.u32 %v12977_v61, 16  ;;  %v888_v29 = vsel %vm12500_vm5, %v883_v19, %v887_v5  ;;  %v905_v21 = vrot.slane %v903_v24, 4  ;;  %v12123_v11 = vld [vmem:[%s12471_s6 + $0x98] sm:$0xf]  ;;  %v9752_v19 = vld [vmem:[%s12471_s6 + $0xa0] sm:$0xe] }
  0xe2   : > { %v9789_v31 = vcombine.low %v5011_v16, %v5014_v26  ;;  %v896_v3 = vor.u32 %v895_v63, %v892_v20  ;;  %v9287_v34 = vcombine.low %v878_v25, %v888_v29  ;;  %v9767_v57 = vrot.slane %v9751_v14, 9  ;;  %v13037_v26 = vld [vmem:[%s12471_s6 + $0x138] sm:$0xf] }
  0xe3   : > { %v911_v35 = vrot.slane %v909_v60, 5  ;;  %v5017_v37 = vrot.slane %v12121_v36, 5  ;;  %v906_v38 = vor.u32 %v905_v21, %v901_v23  ;;  %v5020_v22 = vrot.slane %v12122_v39, 5 }
  0xe4   : > { %11192 = vmatmul.mubr.msk.bf16.gmra.mrb[20].mxu0 %vm1075_vm4, %v9789_v31  ;;  %v897_v1 = vrot.slane %v896_v3, 4  ;;  %v913_v32 = vshrl.u32 %v12977_v61, 16  ;;  %10894 = vmatmul.mubr.msk.bf16.gmra.mrb[52].mxu1 %vm1075_vm4, %v9287_v34  ;;  %v919_v43 = vshll.u32 %v12991_v55, 16  ;;  %v923_v30 = vshrl.u32 %v12991_v55, 16  ;;  %v269_v31 = vld [vmem:[%s12471_s6 + $0x13c] sm:$0x1] }
  0xe5   : > { %v5018_v40 = vsel %vm12773_vm8, %v9767_v57, %v5017_v37  ;;  %v5019_v41 = vrot.slane %v5017_v37, 4  ;;  %v907_v50 = vrot.slane %v906_v38, 4  ;;  %v929_v52 = vshll.u32 %v268_v28, 16 }
  0xe6   : > { %v902_v46 = vsel %vm12500_vm5, %v897_v1, %v901_v23  ;;  %v915_v51 = vrot.slane %v913_v32, 4  ;;  %v921_v54 = vrot.slane %v919_v43, 5  ;;  %v925_v56 = vrot.slane %v923_v30, 4 }
  0xe7   : > { %v5021_v53 = vsel %vm12773_vm8, %v5019_v41, %v5020_v22  ;;  %v5022_v59 = vrot.slane %v5020_v22, 4  ;;  %v912_v0 = vsel %vm12500_vm5, %v907_v50, %v911_v35  ;;  %v931_v8 = vrot.slane %v929_v52, 5  ;;  %v12125_v22 = vld [vmem:[%s12471_s6 + $0xa4] sm:$0xf] }
  0xe8   : > { %v9790_v2 = vcombine.low %v5018_v40, %v5021_v53  ;;  %v916_v5 = vor.u32 %v915_v51, %v911_v35  ;;  %v9288_v10 = vcombine.low %v902_v46, %v912_v0  ;;  %v926_v12 = vor.u32 %v925_v56, %v921_v54  ;;  %v12126_v40 = vld [vmem:[%s12471_s6 + $0xa8] sm:$0xf]  ;;  %v9404_v51 = vld [vmem:[%s15465_s1 + $0x4] sm:$0x3]  ;;  %v9753_v0 = vld [vmem:[%s12471_s6 + $0xb4] sm:$0xe] }
  0xe9   : > { %v5023_v13 = vrot.slane %v12123_v11, 5  ;;  %v5026_v14 = vrot.slane %v12124_v62, 5  ;;  %v934_v16 = vshrl.u32 %v13011_v45, 16  ;;  %v937_v17 = vshll.u32 %v13011_v45, 16 }
  0xea   : > { %11195 = vmatprep.mubr.msk.bf16.mxu0 %vm1075_vm4, %v9790_v2  ;;  %v917_v15 = vrot.slane %v916_v5, 4  ;;  %v943_v18 = vshll.u32 %v13014_v47, 16  ;;  %10897 = vmatprep.mubr.msk.bf16.mxu1 %vm1075_vm4, %v9288_v10  ;;  %v927_v20 = vrot.slane %v926_v12, 4  ;;  %v947_v25 = vshrl.u32 %v13014_v47, 16 }
  0xeb   : > { %v5024_v63 = vsel %vm12773_vm8, %v5022_v59, %v5023_v13  ;;  %v5025_v24 = vrot.slane %v5023_v13, 4  ;;  %v936_v60 = vrot.slane %v934_v16, 4  ;;  %v939_v28 = vrot.slane %v937_v17, 5  ;;  %v9641_v59 = vld [vmem:[%s12471_s6 + $0xb8] sm:$0xf] }
  0xec   : > { %v922_v23 = vsel %vm12500_vm5, %v917_v15, %v921_v54  ;;  %v945_v29 = vrot.slane %v943_v18, 5  ;;  %v932_v3 = vsel %vm12500_vm5, %v927_v20, %v931_v8  ;;  %v949_v34 = vrot.slane %v947_v25, 4  ;;  %v9642_v18 = vld [vmem:[%s12471_s6 + $0xbc] sm:$0xf] }
  0xed   : > { %v5027_v21 = vsel %vm12773_vm8, %v5025_v24, %v5026_v14  ;;  %v953_v35 = vshll.u32 %v13023_v9, 16  ;;  %v9289_v57 = vcombine.low %v922_v23, %v932_v3  ;;  %v940_v37 = vor.u32 %v939_v28, %v936_v60 }
  0xee   : > { %v9791_v36 = vcombine.low %v5024_v63, %v5027_v21  ;;  %v9768_v1 = vrot.slane %v9752_v19, 9  ;;  %v950_v38 = vor.u32 %v949_v34, %v945_v29  ;;  %v5030_v32 = vrot.slane %v12125_v22, 5  ;;  %v12127_v19 = vld [vmem:[%s12471_s6 + $0xac] sm:$0xf]  ;;  %v12128_v63 = vld [vmem:[%s12471_s6 + $0xb0] sm:$0x1] }
  0xef   : > { %v955_v39 = vrot.slane %v953_v35, 5  ;;  %v5033_v41 = vrot.slane %v12126_v40, 5  ;;  %10898 = vmatmul.mubr.msk.bf16.gmra.mrb[56].mxu1 %vm1075_vm4, %v9289_v57  ;;  %v941_v43 = vrot.slane %v940_v37, 4  ;;  %v957_v30 = vshrl.u32 %v13023_v9, 16  ;;  %v12129_v21 = vld [vmem:[%s12471_s6] sm:$0xf] }
  0xf0   : > { %11196 = vmatmul.mubr.msk.bf16.gmra.mrb[24].mxu0 %vm1075_vm4, %v9791_v36  ;;  %v963_v46 = vshll.u32 %v13037_v26, 16  ;;  %v967_v50 = vshrl.u32 %v13037_v26, 16  ;;  %v951_v52 = vrot.slane %v950_v38, 4  ;;  %v5031_v53 = vsel %vm12773_vm8, %v9768_v1, %v5030_v32  ;;  %v13079_v34 = vld [vmem:[%s12471_s6 + $0x4] sm:$0xf] }
  0xf1   : > { %v5032_v54 = vrot.slane %v5030_v32, 4  ;;  %v973_v56 = vshll.u32 %v269_v31, 16  ;;  %v946_v2 = vsel %vm12500_vm5, %v941_v43, %v945_v29  ;;  %v959_v5 = vrot.slane %v957_v30, 4  ;;  %v13093_v22 = vld [vmem:[%s12471_s6 + $0xc4] sm:$0x1] }
  0xf2   : > { %v965_v8 = vrot.slane %v963_v46, 5  ;;  %v969_v10 = vrot.slane %v967_v50, 4  ;;  %v956_v12 = vsel %vm12500_vm5, %v951_v52, %v955_v39  ;;  %v5035_v62 = vrot.slane %v5033_v41, 4  ;;  %15481 = vst [vmem:[#allocation5_spill] sm:$0xff] %v13093_v22  ;;  %v9754_v43 = vld [vmem:[%s12471_s6 + $0xc8] sm:$0xe] }
  0xf3   : > { %v5034_v11 = vsel %vm12773_vm8, %v5032_v54, %v5033_v41  ;;  %v975_v13 = vrot.slane %v973_v56, 5  ;;  %v9290_v14 = vcombine.low %v946_v2, %v956_v12  ;;  %v960_v16 = vor.u32 %v959_v5, %v955_v39  ;;  %v13090_v39 = vld [vmem:[%s12471_s6 + $0xc0] sm:$0xf]  ;;  %v9646_v41 = vld [vmem:[%s12471_s6 + $0xcc] sm:$0xf] }
  0xf4   : > { %v9792_v15 = vcombine.low %v5031_v53, %v5034_v11  ;;  %v970_v17 = vor.u32 %v969_v10, %v965_v8  ;;  %v5036_v20 = vrot.slane %v12127_v19, 5  ;;  %v5039_v24 = vrot.slane %v12128_v63, 5  ;;  %v9648_v56 = vld [vmem:[%s12471_s6 + $0xd4] sm:$0xf]  ;;  %v9649_v11 = vld [vmem:[%s12471_s6 + $0xd8] sm:$0x1] }
  0xf5   : > { %v13071_v25 = vand.u32 %v9404_v51, %v12466_v4  ;;  %10901 = vmatprep.mubr.msk.bf16.mxu1 %vm1075_vm4, %v9290_v14  ;;  %v961_v23 = vrot.slane %v960_v16, 4  ;;  %v9769_v28 = vrot.slane %v9753_v0, 9  ;;  %v5043_v29 = vrot.slane %v9641_v59, 5  ;;  %v9647_v51 = vld [vmem:[%s12471_s6 + $0xd0] sm:$0xf] }
  0xf6   : > { %11199 = vmatprep.mubr.msk.bf16.mxu0 %vm1075_vm4, %v9792_v15  ;;  %v971_v60 = vrot.slane %v970_v17, 4  ;;  %v5037_v31 = vsel %vm12773_vm8, %v5035_v62, %v5036_v20  ;;  %v5038_v3 = vrot.slane %v5036_v20, 4  ;;  %v9324_v35 = vcombine.low %v12129_v21, %v13079_v34  ;;  %v9651_v62 = vld [vmem:[%s12471_s6 + $0xe0] sm:$0xf]  ;;  %v13116_v14 = vld [vmem:[%s12471_s6 + $0x8] sm:$0xf] }
  0xf7   : > { %10971 = vmatprep.subr.bf16.mxu1 %v13071_v25  ;;  %v5046_v57 = vrot.slane %v9642_v18, 5  ;;  %v966_v36 = vsel %vm12500_vm5, %v961_v23, %v965_v8  ;;  %v5044_v1 = vsel %vm12773_vm8, %v9769_v28, %v5043_v29  ;;  %v5045_v38 = vrot.slane %v5043_v29, 4  ;;  %v13119_v15 = vld [vmem:[%s12471_s6 + $0xc] sm:$0xf]  ;;  %v9652_v18 = vld [vmem:[%s12471_s6 + $0xe4] sm:$0xf] }
  0xf8   : > { %v976_v37 = vsel %vm12500_vm5, %v971_v60, %v975_v13  ;;  %v5040_v40 = vsel %vm12773_vm8, %v5038_v3, %v5039_v24  ;;  %v5049_v53 = vrot.slane %v13090_v39, 5  ;;  %v5052_v54 = vrot.slane %v13093_v22, 5  ;;  %v9755_v19 = vld [vmem:[%s12471_s6 + $0xdc] sm:$0xe]  ;;  %v12133_v63 = vld [vmem:[%s12471_s6 + $0x14] sm:$0xf] }
  0xf9   : > { %v9291_v32 = vcombine.low %v966_v36, %v976_v37  ;;  %v9793_v30 = vcombine.low %v5037_v31, %v5040_v40  ;;  %v5047_v46 = vsel %vm12773_vm8, %v5045_v38, %v5046_v57  ;;  %v5048_v50 = vrot.slane %v5046_v57, 4  ;;  %v13129_v24 = vld [vmem:[%s12471_s6 + $0x18] sm:$0xf]  ;;  %v9653_v36 = vld [vmem:[%s12471_s6 + $0xe8] sm:$0xf] }
  0xfa   : > { %v9794_v52 = vcombine.low %v5044_v1, %v5047_v46  ;;  %v9770_v59 = vrot.slane %v9754_v43, 9  ;;  %v5056_v0 = vrot.slane %v9646_v41, 5  ;;  %v5051_v5 = vrot.slane %v5049_v53, 4  ;;  %v9656_v1 = vld [vmem:[%s12471_s6 + $0xf4] sm:$0xf] }
  0xfb   : > { %10902 = vmatmul.mubr.msk.bf16.gmra.mrb[60].mxu1 %vm1075_vm4, %v9291_v32  ;;  %11200 = vmatmul.mubr.msk.bf16.gmra.mrb[28].mxu0 %vm1075_vm4, %v9793_v30  ;;  %v5050_v2 = vsel %vm12773_vm8, %v5048_v50, %v5049_v53  ;;  %v5059_v8 = vrot.slane %v9647_v51, 5  ;;  %v5062_v13 = vrot.slane %v9648_v56, 5  ;;  %v9325_v16 = vcombine.low %v13116_v14, %v13119_v15  ;;  %v9654_v43 = vld [vmem:[%s12471_s6 + $0xec] sm:$0x1]  ;;  %v13151_v46 = vld [vmem:[%s12471_s6 + $0x1c] sm:$0xf] }
  0xfc   : > { %10907 = vmatprep.mubr.msk.bf16.mxu1 %vm1075_vm4, %v9324_v35  ;;  %11203 = vmatprep.mubr.msk.bf16.mxu0 %vm1075_vm4, %v9794_v52  ;;  %v5057_v10 = vsel %vm12773_vm8, %v9770_v59, %v5056_v0  ;;  %v5058_v12 = vrot.slane %v5056_v0, 4  ;;  %v5053_v17 = vsel %vm12773_vm8, %v5051_v5, %v5052_v54  ;;  %v9326_v23 = vcombine.low %v12133_v63, %v13129_v24  ;;  %v13154_v50 = vld [vmem:[%s12471_s6 + $0x20] sm:$0xf]  ;;  %v9657_v52 = vld [vmem:[%s12471_s6 + $0xf8] sm:$0xf] }
  0xfd   : > { %v9795_v20 = vcombine.low %v5050_v2, %v5053_v17  ;;  %v5061_v28 = vrot.slane %v5059_v8, 4  ;;  %v5064_v31 = vrot.slane %v5062_v13, 4  ;;  %v5065_v3 = vrot.slane %v9649_v11, 5  ;;  %v9756_v53 = vld [vmem:[%s12471_s6 + $0xf0] sm:$0xe] }
  0xfe   : > { %v5060_v60 = vsel %vm12773_vm8, %v5058_v12, %v5059_v8  ;;  %v5069_v21 = vrot.slane %v9651_v62, 5  ;;  %v9771_v35 = vrot.slane %v9755_v19, 9  ;;  %v5072_v57 = vrot.slane %v9652_v18, 5  ;;  %v12137_v56 = vld [vmem:[%s12471_s6 + $0x28] sm:$0xf] }
  0xff   : > { %v9796_v29 = vcombine.low %v5057_v10, %v5060_v60  ;;  %v5063_v38 = vsel %vm12773_vm8, %v5061_v28, %v5062_v13  ;;  %v5066_v32 = vsel %vm12773_vm8, %v5064_v31, %v5065_v3  ;;  %v5075_v40 = vrot.slane %v9653_v36, 5  ;;  %v13162_v59 = vld [vmem:[%s12471_s6 + $0x2c] sm:$0xf]  ;;  %v9658_v62 = vld [vmem:[%s12471_s6 + $0xfc] sm:$0xf] }
 0x100   : > { %v5071_v37 = vrot.slane %v5069_v21, 4  ;;  %v5070_v41 = vsel %vm12773_vm8, %v9771_v35, %v5069_v21  ;;  %v5082_v30 = vrot.slane %v9656_v1, 5  ;;  %v9327_v51 = vcombine.low %v13151_v46, %v13154_v50  ;;  %v13181_v28 = vld [vmem:[%s12471_s6 + $0x30] sm:$0xf]  ;;  %v9662_v3 = vld [vmem:[%s12471_s6 + $0x10c] sm:$0xf] }
 0x101   : > { %v9797_v54 = vcombine.low %v5063_v38, %v5066_v32  ;;  %v9328_v0 = vcombine.low %v12137_v56, %v13162_v59  ;;  %v5074_v5 = vrot.slane %v5072_v57, 4  ;;  %v5077_v8 = vrot.slane %v5075_v40, 4  ;;  %v9757_v21 = vld [vmem:[%s12471_s6 + $0x104] sm:$0xe]  ;;  %v13192_v36 = vld [vmem:[%s12471_s6 + $0x40] sm:$0xf] }
 0x102   : > { %v5078_v10 = vrot.slane %v9654_v43, 5  ;;  %v9772_v12 = vrot.slane %v9756_v53, 9  ;;  %v5084_v11 = vrot.slane %v5082_v30, 4  ;;  %v5085_v13 = vrot.slane %v9657_v52, 5  ;;  %v10053_v56 = vld [vmem:[%s15465_s1 + $0xe] sm:$0x3] }
 0x103   : > { %10908 = vmatmul.mubr.msk.bf16.vlgmr.msra.gmra.mrb[0].mxu1 %vm1075_vm4, %v9325_v16  ;;  %11204 = vmatmul.mubr.msk.bf16.gmra.mrb[32].mxu0 %vm1075_vm4, %v9795_v20  ;;  %v9661_v16 = vld [vmem:[%s12471_s6 + $0x108] sm:$0xf]  ;;  %v5076_v17 = vsel %vm12773_vm8, %v5074_v5, %v5075_v40  ;;  %v5088_v19 = vrot.slane %v9658_v62, 5  ;;  %v5098_v43 = vrot.slane %v9662_v3, 5  ;;  %v9664_v5 = vld [vmem:[%s12471_s6 + $0x114] sm:$0x1] }
 0x104   : > { %10972 = vmatpush3.bf16.msra.mxu1 %v13071_v25  ;;  %10911 = vmatprep.mubr.msk.bf16.mxu1 %vm1075_vm4, %v9326_v23  ;;  %v5073_v25 = vsel %vm12773_vm8, %v5071_v37, %v5072_v57  ;;  %v5079_v18 = vsel %vm12773_vm8, %v5077_v8, %v5078_v10  ;;  %v5083_v20 = vsel %vm12773_vm8, %v9772_v12, %v5082_v30  ;;  %v9659_v23 = vld [vmem:[%s12471_s6 + $0x100] sm:$0x1]  ;;  %v5095_v60 = vrot.slane %v9661_v16, 5  ;;  %v12141_v57 = vld [vmem:[%s12471_s6 + $0x3c] sm:$0xf] }
 0x105   : > { %11207 = vmatprep.mubr.msk.bf16.mxu0 %vm1075_vm4, %v9796_v29  ;;  %v9798_v2 = vcombine.low %v5070_v41, %v5073_v25  ;;  %v5086_v63 = vsel %vm12773_vm8, %v5084_v11, %v5085_v13  ;;  %v13184_v29 = vld [vmem:[%s12471_s6 + $0x34] sm:$0xf]  ;;  %v9799_v35 = vcombine.low %v5076_v17, %v5079_v18  ;;  %v9330_v37 = vcombine.low %v12141_v57, %v13192_v36  ;;  %v9663_v30 = vld [vmem:[%s12471_s6 + $0x110] sm:$0xf]  ;;  %v13214_v10 = vld [vmem:[%s12471_s6 + $0x44] sm:$0xf] }
 0x106   : > { %v9329_v31 = vcombine.low %v13181_v28, %v13184_v29  ;;  %v9800_v1 = vcombine.low %v5083_v20, %v5086_v63  ;;  %v5087_v38 = vrot.slane %v5085_v13, 4  ;;  %v5090_v32 = vrot.slane %v5088_v19, 4  ;;  %v13217_v12 = vld [vmem:[%s12471_s6 + $0x48] sm:$0xf]  ;;  %v9667_v13 = vld [vmem:[%s12471_s6 + $0x120] sm:$0xf] }
 0x107   : > { %v5091_v40 = vrot.slane %v9659_v23, 5  ;;  %v9773_v41 = vrot.slane %v9757_v21, 9  ;;  %v5097_v25 = vrot.slane %v5095_v60, 4  ;;  %v9331_v11 = vcombine.low %v13214_v10, %v13217_v12  ;;  %v9758_v62 = vld [vmem:[%s12471_s6 + $0x118] sm:$0xe] }
 0x108   : > { %v5089_v52 = vsel %vm12773_vm8, %v5087_v38, %v5088_v19  ;;  %v12145_v17 = vld [vmem:[%s12471_s6 + $0x50] sm:$0xf]  ;;  %v13225_v18 = vld [vmem:[%s12471_s6 + $0x54] sm:$0xf]  ;;  %v13229_v20 = vand.u32 %v10053_v56, %v12466_v4  ;;  %v5100_v23 = vrot.slane %v5098_v43, 4  ;;  %v9774_v3 = vrot.slane %v9758_v62, 9 }
 0x109   : > { %v5092_v53 = vsel %vm12773_vm8, %v5090_v32, %v5091_v40  ;;  %v9332_v19 = vcombine.low %v12145_v17, %v13225_v18  ;;  %v9668_v57 = vld [vmem:[%s12471_s6 + $0x124] sm:$0xf]  ;;  %v9672_v56 = vld [vmem:[%s12471_s6 + $0x134] sm:$0xf] }
 0x10a   : > { %v9801_v16 = vcombine.low %v5089_v52, %v5092_v53  ;;  %11301 = vmatprep.subr.bf16.mxu0 %v13229_v20  ;;  %v5114_v40 = vrot.slane %v9668_v57, 5  ;;  %v13254_v52 = vld [vmem:[%s12471_s6 + $0x58] sm:$0xf]  ;;  %v13257_v53 = vld [vmem:[%s12471_s6 + $0x5c] sm:$0xf] }
 0x10b   : > { %10912 = vmatmul.mubr.msk.bf16.gmra.mrb[4].mxu1 %vm1075_vm4, %v9327_v51  ;;  %11208 = vmatmul.mubr.msk.bf16.gmra.mrb[36].mxu0 %vm1075_vm4, %v9797_v54  ;;  %v9666_v51 = vld [vmem:[%s12471_s6 + $0x11c] sm:$0xf]  ;;  %v5101_v54 = vrot.slane %v9663_v30, 5  ;;  %v2124_v22 = vrot.slane %v13254_v52, 5 }
 0x10c   : > { %10915 = vmatprep.mubr.msk.bf16.mxu1 %vm1075_vm4, %v9328_v0  ;;  %11211 = vmatprep.mubr.msk.bf16.mxu0 %vm1075_vm4, %v9798_v2  ;;  %v5096_v0 = vsel %vm12773_vm8, %v9773_v41, %v5095_v60  ;;  %v5099_v2 = vsel %vm12773_vm8, %v5097_v25, %v5098_v43  ;;  %v5108_v8 = vrot.slane %v9666_v51, 5  ;;  %v9669_v43 = vld [vmem:[%s12471_s6 + $0x128] sm:$0x1] }
 0x10d   : > { %v9802_v63 = vcombine.low %v5096_v0, %v5099_v2  ;;  %v5103_v60 = vrot.slane %v5101_v54, 4  ;;  %v5102_v38 = vsel %vm12773_vm8, %v5100_v23, %v5101_v54  ;;  %v9333_v54 = vcombine.low %v13254_v52, %v13257_v53  ;;  %v9759_v0 = vld [vmem:[%s12471_s6 + $0x12c] sm:$0xe] }
 0x10e   : > { %v5110_v21 = vrot.slane %v5108_v8, 4  ;;  %v5109_v41 = vsel %vm12773_vm8, %v9774_v3, %v5108_v8  ;;  %v13265_v8 = vld [vmem:[%s12471_s6 + $0x68] sm:$0xf]  ;;  %v5117_v17 = vrot.slane %v9669_v43, 5  ;;  %v5124_v23 = vrot.slane %v9672_v56, 5 }
 0x10f   : > { %v9760_v43 = vld [vmem:[%s12471_s6 + $0x140] sm:$0xe]  ;;  %v12153_v56 = vld [vmem:[%s12471_s6 + $0x78] sm:$0xf] }
 0x113   : > { %10916 = vmatmul.mubr.msk.bf16.gmra.mrb[8].mxu1 %vm1075_vm4, %v9329_v31  ;;  %11212 = vmatmul.mubr.msk.bf16.gmra.mrb[40].mxu0 %vm1075_vm4, %v9799_v35  ;;  %v5104_v31 = vrot.slane %v9664_v5, 5  ;;  %v5111_v35 = vrot.slane %v9667_v13, 5  ;;  %v12149_v5 = vld [vmem:[%s12471_s6 + $0x64] sm:$0xf] }
 0x114   : > { %10919 = vmatprep.mubr.msk.bf16.mxu1 %vm1075_vm4, %v9330_v37  ;;  %11215 = vmatprep.mubr.msk.bf16.mxu0 %vm1075_vm4, %v9800_v1  ;;  %v9671_v37 = vld [vmem:[%s12471_s6 + $0x130] sm:$0xf]  ;;  %v9535_v1 = vld [vmem:[%s15465_s1 + $0x6] sm:$0x3] }
 0x115   : > { %v5105_v32 = vsel %vm12773_vm8, %v5103_v60, %v5104_v31  ;;  %v5112_v25 = vsel %vm12773_vm8, %v5110_v21, %v5111_v35  ;;  %v5121_v30 = vrot.slane %v9671_v37, 5  ;;  %v13251_v51 = vand.u32 %v9535_v1, %v12466_v4  ;;  %v9673_v60 = vld [vmem:[%s12471_s6 + $0x138] sm:$0xf]  ;;  %v9676_v31 = vld [vmem:[%s12471_s6 + $0x144] sm:$0xf] }
 0x116   : > { %v9803_v2 = vcombine.low %v5102_v38, %v5105_v32  ;;  %v9804_v13 = vcombine.low %v5109_v41, %v5112_v25  ;;  %v5113_v62 = vrot.slane %v5111_v35, 4  ;;  %v5127_v35 = vrot.slane %v9673_v60, 5  ;;  %v9674_v1 = vld [vmem:[%s12471_s6 + $0x13c] sm:$0x1]  ;;  %v13285_v32 = vld [vmem:[%s12471_s6 + $0x6c] sm:$0xf] }
 0x117   : > { %11037 = vmatprep.subr.bf16.mxu1 %v13251_v51  ;;  %v5134_v38 = vrot.slane %v9676_v31, 5  ;;  %v13288_v41 = vld [vmem:[%s12471_s6 + $0x70] sm:$0xf]  ;;  %v9677_v25 = vld [vmem:[%s12471_s6 + $0x148] sm:$0xf] }
 0x118   : > { %v5115_v3 = vsel %vm12773_vm8, %v5113_v62, %v5114_v40  ;;  %v9776_v62 = vrot.slane %v9760_v43, 9 }
 0x11a   : > { %v5135_v31 = vsel %vm12773_vm8, %v9776_v62, %v5134_v38 }
 0x11b   : > { %10920 = vmatmul.mubr.msk.bf16.gmra.mrb[12].mxu1 %vm1075_vm4, %v9331_v11  ;;  %11216 = vmatmul.mubr.msk.bf16.gmra.mrb[44].mxu0 %vm1075_vm4, %v9801_v16  ;;  %v9334_v11 = vcombine.low %v12149_v5, %v13265_v8  ;;  %v5116_v16 = vrot.slane %v5114_v40, 4  ;;  %v9335_v40 = vcombine.low %v13285_v32, %v13288_v41  ;;  %v5126_v5 = vrot.slane %v5124_v23, 4 }
 0x11c   : > { %10923 = vmatprep.mubr.msk.bf16.mxu1 %vm1075_vm4, %v9332_v19  ;;  %11219 = vmatprep.mubr.msk.bf16.mxu0 %vm1075_vm4, %v9802_v63  ;;  %v9775_v19 = vrot.slane %v9759_v0, 9  ;;  %v5123_v63 = vrot.slane %v5121_v30, 4  ;;  %v13296_v0 = vld [vmem:[%s12471_s6 + $0x7c] sm:$0xf] }
 0x11d   : > { %v5118_v21 = vsel %vm12773_vm8, %v5116_v16, %v5117_v17  ;;  %v5136_v16 = vrot.slane %v5134_v38, 4  ;;  %v5137_v17 = vrot.slane %v9677_v25, 5  ;;  %v13323_v25 = vld [vmem:[%s12471_s6 + $0x90] sm:$0xf] }
 0x11e   : > { %v5122_v57 = vsel %vm12773_vm8, %v9775_v19, %v5121_v30  ;;  %v5125_v37 = vsel %vm12773_vm8, %v5123_v63, %v5124_v23  ;;  %v9336_v30 = vcombine.low %v12153_v56, %v13296_v0  ;;  %v9678_v19 = vld [vmem:[%s12471_s6 + $0x14c] sm:$0xf]  ;;  %v5128_v63 = vsel %vm12773_vm8, %v5126_v5, %v5127_v35 }
 0x11f   : > { %v5140_v60 = vrot.slane %v9678_v19, 5  ;;  %v13344_v19 = vld [vmem:[%s12471_s6 + $0xa4] sm:$0xf] }
 0x121   : > { %v5142_v56 = vrot.slane %v5140_v60, 4 }
 0x123   : > { %10924 = vmatmul.mubr.msk.bf16.gmra.mrb[16].mxu1 %vm1075_vm4, %v9333_v54  ;;  %11220 = vmatmul.mubr.msk.bf16.gmra.mrb[48].mxu0 %vm1075_vm4, %v9803_v2  ;;  %v9805_v54 = vcombine.low %v5115_v3, %v5118_v21  ;;  %v9806_v2 = vcombine.low %v5122_v57, %v5125_v37  ;;  %v5138_v3 = vsel %vm12773_vm8, %v5136_v16, %v5137_v17  ;;  %v9679_v21 = vld [vmem:[%s12471_s6 + $0x150] sm:$0x1]  ;;  %v13314_v57 = vld [vmem:[%s12471_s6 + $0x80] sm:$0xf]  ;;  %v13317_v37 = vld [vmem:[%s12471_s6 + $0x84] sm:$0xf] }
 0x124   : > { %10927 = vmatprep.mubr.msk.bf16.mxu1 %vm1075_vm4, %v9334_v11  ;;  %11223 = vmatprep.mubr.msk.bf16.mxu0 %vm1075_vm4, %v9804_v13  ;;  %v5129_v11 = vrot.slane %v5127_v35, 4  ;;  %v5130_v13 = vrot.slane %v9674_v1, 5  ;;  %v9337_v1 = vcombine.low %v13314_v57, %v13317_v37  ;;  %v9808_v43 = vcombine.low %v5135_v31, %v5138_v3  ;;  %v13356_v31 = vld [vmem:[%s12471_s6 + $0xac] sm:$0xf] }
 0x126   : > { %v5131_v23 = vsel %vm12773_vm8, %v5129_v11, %v5130_v13  ;;  %v13335_v11 = vld [vmem:[%s12471_s6 + $0x94] sm:$0xf]  ;;  %v13338_v13 = vld [vmem:[%s12471_s6 + $0x98] sm:$0xf] }
 0x127   : > { %v9807_v35 = vcombine.low %v5128_v63, %v5131_v23  ;;  %v9339_v62 = vcombine.low %v13335_v11, %v13338_v13  ;;  %v12022_v23 = vld [vmem:[%s12471_s6 + $0x28] sm:$0xff]  }
 0x12b   : > { %10928 = vmatmul.mubr.msk.bf16.gmra.mrb[20].mxu1 %vm1075_vm4, %v9335_v40  ;;  %11224 = vmatmul.mubr.msk.bf16.gmra.mrb[52].mxu0 %vm1075_vm4, %v9805_v54  ;;  %v12157_v40 = vld [vmem:[%s12471_s6 + $0x8c] sm:$0xf]  ;;  %v5139_v54 = vrot.slane %v5137_v17, 4  ;;  %v12161_v17 = vld [vmem:[%s12471_s6 + $0xa0] sm:$0xf] }
 0x12c   : > { %10931 = vmatprep.mubr.msk.bf16.mxu1 %vm1075_vm4, %v9336_v30  ;;  %11227 = vmatprep.mubr.msk.bf16.mxu0 %vm1075_vm4, %v9806_v2  ;;  %v9338_v38 = vcombine.low %v12157_v40, %v13323_v25  ;;  %v5143_v30 = vrot.slane %v9679_v21, 5  ;;  %v9340_v63 = vcombine.low %v12161_v17, %v13344_v19  ;;  %v10150_v21 = vld [vmem:[%s15465_s1 + $0x10] sm:$0x3]  ;;  %v13366_v40 = vld [vmem:[%s12471_s6 + $0xb8] sm:$0xf] }
 0x12d   : > { %v5141_v2 = vsel %vm12773_vm8, %v5139_v54, %v5140_v60  ;;  %v13353_v60 = vld [vmem:[%s12471_s6 + $0xa8] sm:$0xf]  ;;  %v13371_v54 = vand.u32 %v10150_v21, %v12466_v4  ;;  %v13383_v4 = vld [vmem:[%s12471_s6 + $0xc0] sm:$0xf]  ;;  %v13399_v17 = vld [vmem:[%s12471_s6 + $0xd0] sm:$0xf] }
 0x12e   : > { %v5144_v5 = vsel %vm12773_vm8, %v5142_v56, %v5143_v30  ;;  %v9341_v3 = vcombine.low %v13353_v60, %v13356_v31  ;;  %v13380_v56 = vld [vmem:[%s12471_s6 + $0xbc] sm:$0xf] }
 0x12f   : > { %v9809_v16 = vcombine.low %v5141_v2, %v5144_v5  ;;  %15482 = vst [vmem:[#allocation6_spill] sm:$0xff] %v13371_v54  ;;  %v9343_v30 = vcombine.low %v13380_v56, %v13383_v4  ;;  %v12028_v2 = vld [vmem:[%s12471_s6 + $0x44] sm:$0xff]   ;;  %v12173_v21 = vld [vmem:[%s12471_s6 + $0xdc] sm:$0xf] }
 0x130   : > { %v12169_v5 = vld [vmem:[%s12471_s6 + $0xc8] sm:$0xf] }
 0x133   : > { %10932 = vmatmul.mubr.msk.bf16.gmra.mrb[24].mxu1 %vm1075_vm4, %v9337_v1  ;;  %11228 = vmatmul.mubr.msk.bf16.gmra.mrb[56].mxu0 %vm1075_vm4, %v9807_v35  ;;  %v12024_v1 = vld [vmem:[%s12471_s6 + $0x30] sm:$0xff]  }
 0x134   : > { %10935 = vmatprep.mubr.msk.bf16.mxu1 %vm1075_vm4, %v9338_v38  ;;  %11231 = vmatprep.mubr.msk.bf16.mxu0 %vm1075_vm4, %v9808_v43  ;;  %v12165_v35 = vld [vmem:[%s12471_s6 + $0xb4] sm:$0xf]  ;;  %v12026_v43 = vld [vmem:[%s12471_s6 + $0x3c] sm:$0xff]  }
 0x135   : > { %v9342_v38 = vcombine.low %v12165_v35, %v13366_v40 }
 0x13b   : > { %10936 = vmatmul.mubr.msk.bf16.gmra.mrb[28].mxu1 %vm1075_vm4, %v9339_v62  ;;  %11232 = vmatmul.mubr.msk.bf16.gmra.mrb[60].mxu0 %vm1075_vm4, %v9809_v16  ;;  %v13390_v62 = vld [vmem:[%s12471_s6 + $0xcc] sm:$0xf]  ;;  %v12030_v16 = vld [vmem:[%s12471_s6 + $0x50] sm:$0xff]  }
 0x13c   : > { %10939 = vmatprep.mubr.msk.bf16.mxu1 %vm1075_vm4, %v9340_v63  ;;  %11237 = vmatprep.mubr.msk.bf16.mxu0 %vm1075_vm4, %v12022_v23  ;;  %v13402_v63 = vld [vmem:[%s12471_s6 + $0xd4] sm:$0xf] }
 0x13d   : > { %v9345_v23 = vcombine.low %v13399_v17, %v13402_v63 }
 0x143   : > { %10940 = vmatmul.mubr.msk.bf16.gmra.mrb[32].mxu1 %vm1075_vm4, %v9341_v3  ;;  %11238 = vmatmul.mubr.msk.bf16.vlgmr.msra.gmra.mrb[0].mxu0 %vm1075_vm4, %v12024_v1  ;;  %v12032_v3 = vld [vmem:[%s12471_s6 + $0x58] sm:$0xff]   ;;  %v13409_v1 = vld [vmem:[%s12471_s6 + $0xe0] sm:$0xf] }
 0x144   : > { %10943 = vmatprep.mubr.msk.bf16.mxu1 %vm1075_vm4, %v9342_v38  ;;  %11302 = vmatpush3.bf16.msra.mxu0 %v13229_v20  ;;  %v9344_v20 = vcombine.low %v12169_v5, %v13390_v62  ;;  %v9346_v35 = vcombine.low %v12173_v21, %v13409_v1  ;;  %v12034_v38 = vld [vmem:[%s12471_s6 + $0x64] sm:$0xff]   ;;  %v12036_v5 = vld [vmem:[%s12471_s6 + $0x6c] sm:$0xff]   ;;  %v13437_v21 = vld [vmem:[%s12471_s6 + $0xf8] sm:$0xf] }
 0x145   : > { %11241 = vmatprep.mubr.msk.bf16.mxu0 %vm1075_vm4, %v12026_v43  ;;  %11367 = vmatprep.subr.bf16.mxu0 %v13371_v54  ;;  %v13418_v43 = vld [vmem:[%s12471_s6 + $0xe4] sm:$0xf]  ;;  %15484 = vst [vmem:[#allocation8_spill] sm:$0xff] %v13437_v21  ;;  %v12042_v54 = vld [vmem:[%s12471_s6 + $0x8c] sm:$0xff]  }
 0x14b   : > { %10944 = vmatmul.mubr.msk.bf16.gmra.mrb[36].mxu1 %vm1075_vm4, %v9343_v30  ;;  %11242 = vmatmul.mubr.msk.bf16.gmra.mrb[4].mxu0 %vm1075_vm4, %v12028_v2  ;;  %v13421_v30 = vld [vmem:[%s12471_s6 + $0xe8] sm:$0xf] }
 0x14c   : > { %10947 = vmatprep.mubr.msk.bf16.mxu1 %vm1075_vm4, %v9344_v20  ;;  %11245 = vmatprep.mubr.msk.bf16.mxu0 %vm1075_vm4, %v12030_v16  ;;  %v9347_v2 = vcombine.low %v13418_v43, %v13421_v30  ;;  %v12177_v20 = vld [vmem:[%s12471_s6 + $0xf0] sm:$0xf]  ;;  %v13428_v16 = vld [vmem:[%s12471_s6 + $0xf4] sm:$0xf] }
 0x14d   : > { %15483 = vst [vmem:[#allocation7_spill] sm:$0xff] %v13428_v16 }
 0x153   : > { %10948 = vmatmul.mubr.msk.bf16.gmra.mrb[40].mxu1 %vm1075_vm4, %v9345_v23  ;;  %11246 = vmatmul.mubr.msk.bf16.gmra.mrb[8].mxu0 %vm1075_vm4, %v12032_v3  ;;  %v9348_v23 = vcombine.low %v12177_v20, %v13428_v16  ;;  %v12038_v3 = vld [vmem:[%s12471_s6 + $0x78] sm:$0xff]   ;;  %v12040_v20 = vld [vmem:[%s12471_s6 + $0x80] sm:$0xff]  }
 0x154   : > { %10951 = vmatprep.mubr.msk.bf16.mxu1 %vm1075_vm4, %v9346_v35  ;;  %11249 = vmatprep.mubr.msk.bf16.mxu0 %vm1075_vm4, %v12034_v38  ;;  %v13440_v35 = vld [vmem:[%s12471_s6 + $0xfc] sm:$0xf] }
 0x155   : > { %15485 = vst [vmem:[#allocation9_spill] sm:$0xff] %v13440_v35  ;;  %v9349_v38 = vcombine.low %v13437_v21, %v13440_v35  ;;  %v12046_v35 = vld [vmem:[%s12471_s6 + $0xa0] sm:$0xff]   ;;  %v12048_v21 = vld [vmem:[%s12471_s6 + $0xa8] sm:$0xff]  }
 0x15b   : > { %10952 = vmatmul.mubr.msk.bf16.gmra.mrb[44].mxu1 %vm1075_vm4, %v9347_v2  ;;  %11250 = vmatmul.mubr.msk.bf16.gmra.mrb[12].mxu0 %vm1075_vm4, %v12036_v5  ;;  %v9350_v2 = vcombine.low %v12916_v44, %v12922_v49  ;;  %v9351_v5 = vcombine.low %v12931_v6, %v12947_v27  ;;  %v2016_v44 = vld [vmem:[%s12471_s6] sm:$0xe]  ;;  %v2069_v49 = vrot.slane %v13079_v34, 5  ;;  %v2075_v6 = vrot.slane %v13119_v15, 5 }
 0x15c   : > { %10955 = vmatprep.mubr.msk.bf16.mxu1 %vm1075_vm4, %v9348_v23  ;;  %11253 = vmatprep.mubr.msk.bf16.mxu0 %vm1075_vm4, %v12038_v3  ;;  %v12044_v23 = vld [vmem:[%s12471_s6 + $0x94] sm:$0xff]   ;;  %v9352_v3 = vcombine.low %v12962_v42, %v12968_v48  ;;  %v2082_v27 = vrot.slane %v13129_v24, 5  ;;  %v3969_v42 = vshll.u32 %v13090_v39, 16  ;;  %v3973_v48 = vshrl.u32 %v13090_v39, 16 }
 0x15d   : > { %v9388_v34 = vrot.slane %v2016_v44, 9  ;;  %v2088_v15 = vrot.slane %v13154_v50, 5  ;;  %v2077_v16 = vrot.slane %v2075_v6, 4 }
 0x15e   : > { %v2084_v39 = vrot.slane %v2082_v27, 4  ;;  %v13478_v44 = vrot.slane %v3969_v42, 5 }
 0x15f   : > { %v2090_v42 = vrot.slane %v2088_v15, 4 }
 0x160   : > { %15486 = vst [vmem:[#allocation10_spill] sm:$0xff] %v13478_v44  ;;  %v2137_v44 = vrot.slane %v13285_v32, 5 }
 0x163   : > { %10956 = vmatmul.mubr.msk.bf16.gmra.mrb[48].mxu1 %vm1075_vm4, %v9349_v38  ;;  %11254 = vmatmul.mubr.msk.bf16.gmra.mrb[16].mxu0 %vm1075_vm4, %v12040_v20  ;;  %v2072_v38 = vrot.slane %v13116_v14, 5  ;;  %v2017_v20 = vld [vmem:[%s12471_s6 + $0x14] sm:$0xe] }
 0x164   : > { %10959 = vmatprep.mubr.msk.bf16.mxu1 %vm1075_vm4, %v9350_v2  ;;  %11257 = vmatprep.mubr.msk.bf16.mxu0 %vm1075_vm4, %v12042_v54  ;;  %v9389_v14 = vrot.slane %v2017_v20, 9  ;;  %v2085_v54 = vrot.slane %v13151_v46, 5  ;;  %v9353_v2 = vcombine.low %v12977_v61, %v12991_v55  ;;  %v12050_v46 = vld [vmem:[%s12471_s6 + $0xb4] sm:$0xff]   ;;  %v13481_v20 = vrot.slane %v3973_v48, 4  ;;  %v12182_v48 = vld [vmem:[%s12471_s6 + $0x24] sm:$0x1] }
 0x165   : > { %v2070_v61 = vsel %vm12773_vm8, %v9388_v34, %v2069_v49  ;;  %v2095_v34 = vrot.slane %v13162_v59, 5  ;;  %v9355_v59 = vcombine.low %v13023_v9, %v13037_v26 }
 0x166   : > { %v13487_v55 = vsel %vm12773_vm8, %v9389_v14, %v2082_v27  ;;  %v2087_v50 = vrot.slane %v2085_v54, 4  ;;  %v13505_v27 = vsel %vm12773_vm8, %v2084_v39, %v2085_v54 }
 0x167   : > { %v2097_v26 = vrot.slane %v2095_v34, 4 }
 0x16b   : > { %10960 = vmatmul.mubr.msk.bf16.gmra.mrb[52].mxu1 %vm1075_vm4, %v9351_v5  ;;  %11258 = vmatmul.mubr.msk.bf16.gmra.mrb[20].mxu0 %vm1075_vm4, %v12044_v23  ;;  %v2071_v5 = vrot.slane %v2069_v49, 4  ;;  %v2074_v23 = vrot.slane %v2072_v38, 4 }
 0x16c   : > { %10963 = vmatprep.mubr.msk.bf16.mxu1 %vm1075_vm4, %v9352_v3  ;;  %11261 = vmatprep.mubr.msk.bf16.mxu0 %vm1075_vm4, %v12046_v35  ;;  %v12181_v3 = vld [vmem:[%s12471_s6 + $0x10] sm:$0x1]  ;;  %v9354_v35 = vcombine.low %v13011_v45, %v13014_v47 }
 0x16d   : > { %v2078_v24 = vrot.slane %v12181_v3, 5  ;;  %v2073_v45 = vsel %vm12773_vm8, %v2071_v5, %v2072_v38  ;;  %v13494_v47 = vsel %vm12773_vm8, %v2074_v23, %v2075_v6  ;;  %v2091_v3 = vrot.slane %v12182_v48, 5  ;;  %v2018_v38 = vld [vmem:[%s12471_s6 + $0x28] sm:$0xe] }
 0x16e   : > { %v2098_v6 = vrot.slane %v13181_v28, 5  ;;  %v2111_v5 = vrot.slane %v13214_v10, 5  ;;  %v9405_v28 = vcombine.low %v2070_v61, %v2073_v45  ;;  %v2114_v23 = vrot.slane %v13217_v12, 5  ;;  %v12183_v45 = vld [vmem:[%s12471_s6 + $0x38] sm:$0x1] }
 0x16f   : > { %v13501_v49 = vsel %vm12773_vm8, %v2077_v16, %v2078_v24  ;;  %v2108_v16 = vrot.slane %v13192_v36, 5  ;;  %v13527_v36 = vsel %vm12773_vm8, %v2087_v50, %v2088_v15  ;;  %v9390_v10 = vrot.slane %v2018_v38, 9  ;;  %v12184_v15 = vld [vmem:[%s12471_s6 + $0x4c] sm:$0x1]  ;;  %v2020_v24 = vld [vmem:[%s12471_s6 + $0x50] sm:$0xe] }
 0x170   : > { %v13532_v9 = vsel %vm12773_vm8, %v2090_v42, %v2091_v3  ;;  %v2100_v12 = vrot.slane %v2098_v6, 4  ;;  %v2104_v48 = vrot.slane %v12183_v45, 5  ;;  %v2113_v54 = vrot.slane %v2111_v5, 4 }
 0x171   : > { %v2110_v14 = vrot.slane %v2108_v16, 4  ;;  %v2117_v50 = vrot.slane %v12184_v15, 5  ;;  %v2121_v38 = vrot.slane %v13225_v18, 5  ;;  %v13543_v42 = vsel %vm12773_vm8, %v9390_v10, %v2095_v34  ;;  %v2022_v15 = vld [vmem:[%s12471_s6 + $0x78] sm:$0xe] }
 0x172   : > { %v2127_v3 = vrot.slane %v13257_v53, 5  ;;  %v2134_v45 = vrot.slane %v13265_v8, 5  ;;  %v13553_v18 = vsel %vm12773_vm8, %v2097_v26, %v2098_v6  ;;  %v2140_v8 = vrot.slane %v13288_v41, 5 }
 0x173   : > { %10964 = vmatmul.mubr.msk.bf16.gmra.mrb[56].mxu1 %vm1075_vm4, %v9353_v2  ;;  %11262 = vmatmul.mubr.msk.bf16.gmra.mrb[24].mxu0 %vm1075_vm4, %v12048_v21  ;;  %v2101_v21 = vrot.slane %v13184_v29, 5  ;;  %v2019_v2 = vld [vmem:[%s12471_s6 + $0x3c] sm:$0xe]  ;;  %v2116_v29 = vrot.slane %v2114_v23, 4  ;;  %v13571_v34 = vsel %vm12773_vm8, %v2110_v14, %v2111_v5  ;;  %v13575_v6 = vsel %vm12773_vm8, %v2113_v54, %v2114_v23 }
 0x174   : > { %10967 = vmatprep.mubr.msk.bf16.mxu1 %vm1075_vm4, %v9354_v35  ;;  %11265 = vmatprep.mubr.msk.bf16.mxu0 %vm1075_vm4, %v12050_v46  ;;  %v12052_v35 = vld [vmem:[%s12471_s6 + $0xbc] sm:$0xff]   ;;  %v9391_v39 = vrot.slane %v2019_v2, 9  ;;  %v12053_v46 = vld [vmem:[%s12471_s6 + $0xc8] sm:$0xff]   ;;  %v2021_v2 = vld [vmem:[%s12471_s6 + $0x64] sm:$0xe]  ;;  %v2129_v10 = vrot.slane %v2127_v3, 4  ;;  %v9408_v54 = vcombine.low %v13527_v36, %v13532_v9  ;;  %v9409_v23 = vcombine.low %v13543_v42, %v13553_v18 }
 0x175   : > { %v2103_v61 = vrot.slane %v2101_v21, 4  ;;  %v13557_v52 = vsel %vm12773_vm8, %v2100_v12, %v2101_v21  ;;  %v9392_v21 = vrot.slane %v2020_v24, 9  ;;  %v13579_v41 = vsel %vm12773_vm8, %v2116_v29, %v2117_v50  ;;  %v12054_v12 = vld [vmem:[%s12471_s6 + $0xd0] sm:$0xff]   ;;  %v9974_v9 = vld [vmem:[%s12471_s6 + $0x2c] sm:$0xf] }
 0x176   : > { %v13561_v53 = vsel %vm12773_vm8, %v9391_v39, %v2108_v16  ;;  %v2123_v16 = vrot.slane %v2121_v38, 4  ;;  %v2136_v5 = vrot.slane %v2134_v45, 4  ;;  %v2139_v26 = vrot.slane %v2137_v44, 4  ;;  %v12186_v29 = vld [vmem:[%s12471_s6 + $0x74] sm:$0x1] }
 0x177   : > { %v13567_v32 = vsel %vm12773_vm8, %v2103_v61, %v2104_v48  ;;  %v2142_v24 = vrot.slane %v2140_v8, 4  ;;  %v2143_v39 = vrot.slane %v12186_v29, 5  ;;  %v12055_v61 = vld [vmem:[%s12471_s6 + $0xdc] sm:$0xff]   ;;  %v13598_v36 = vsel %vm12773_vm8, %v9392_v21, %v2121_v38 }
 0x178   : > { %v2147_v50 = vrot.slane %v13296_v0, 5  ;;  %v15487_v38 = vcombine.low %v13494_v47, %v13501_v49  ;;  %v9975_v47 = vld [vmem:[%s12471_s6 + $0x30] sm:$0xf]  ;;  %v2173_v48 = vrot.slane %v13344_v19, 5  ;;  %v2176_v18 = vrot.slane %v13353_v60, 5 }
 0x179   : > { %v13635_v0 = vsel %vm12773_vm8, %v2142_v24, %v2143_v39  ;;  %v2179_v60 = vrot.slane %v13356_v31, 5 }
 0x17b   : > { %10968 = vmatmul.mubr.msk.bf16.gmra.mrb[60].mxu1 %vm1075_vm4, %v9355_v59  ;;  %11266 = vmatmul.mubr.msk.bf16.gmra.mrb[28].mxu0 %vm1075_vm4, %v12052_v35  ;;  %v2126_v59 = vrot.slane %v2124_v22, 4  ;;  %v12185_v35 = vld [vmem:[%s12471_s6 + $0x60] sm:$0x1] }
 0x17c   : > { %10973 = vmatprep.mubr.msk.bf16.mxu1 %vm1075_vm4, %v9405_v28  ;;  %11269 = vmatprep.mubr.msk.bf16.mxu0 %vm1075_vm4, %v12053_v46  ;;  %v9393_v28 = vrot.slane %v2021_v2, 9  ;;  %v2130_v14 = vrot.slane %v12185_v35, 5  ;;  %v9973_v46 = vld [vmem:[%s12471_s6 + $0x28] sm:$0xf]  ;;  %v13603_v2 = vsel %vm12773_vm8, %v2123_v16, %v2124_v22  ;;  %v6467_v16 = vshll.u32 %v9974_v9, 16 }
 0x17d   : > { %v13607_v35 = vsel %vm12773_vm8, %v2126_v59, %v2127_v3  ;;  %v13625_v3 = vsel %vm12773_vm8, %v2136_v5, %v2137_v44  ;;  %v6458_v21 = vshrl.u32 %v9973_v46, 16  ;;  %v6461_v49 = vshll.u32 %v9973_v46, 16  ;;  %v12187_v5 = vld [vmem:[%s12471_s6 + $0x88] sm:$0x1]  ;;  %v9976_v46 = vld [vmem:[%s12471_s6 + $0x34] sm:$0xf] }
 0x17e   : > { %v13611_v29 = vsel %vm12773_vm8, %v9393_v28, %v2134_v45  ;;  %v13621_v22 = vsel %vm12773_vm8, %v2129_v10, %v2130_v14  ;;  %v13629_v45 = vsel %vm12773_vm8, %v2139_v26, %v2140_v8  ;;  %v6471_v44 = vshrl.u32 %v9974_v9, 16 }
 0x17f   : > { %v15488_v59 = vcombine.low %v13487_v55, %v13505_v27  ;;  %v9394_v8 = vrot.slane %v2022_v15, 9  ;;  %v2150_v28 = vrot.slane %v13314_v57, 5  ;;  %v2153_v10 = vrot.slane %v13317_v37, 5  ;;  %v12057_v55 = vld [vmem:[%s12471_s6 + $0xf0] sm:$0xff]  }
 0x180   : > { %v2149_v27 = vrot.slane %v2147_v50, 4  ;;  %v2156_v26 = vrot.slane %v12187_v5, 5  ;;  %v2160_v57 = vrot.slane %v13323_v25, 5  ;;  %v6460_v39 = vrot.slane %v6458_v21, 4 }
 0x181   : > { %v6477_v37 = vshll.u32 %v9975_v47, 16  ;;  %v6463_v15 = vrot.slane %v6461_v49, 5  ;;  %v13659_v9 = vrot.slane %v6467_v16, 5  ;;  %v13664_v5 = vsel %vm12773_vm8, %v9394_v8, %v2147_v50  ;;  %v12188_v50 = vld [vmem:[%s12471_s6 + $0x9c] sm:$0x1] }
 0x182   : > { %v2152_v14 = vrot.slane %v2150_v28, 4  ;;  %v2155_v24 = vrot.slane %v2153_v10, 4  ;;  %v2163_v25 = vrot.slane %v13335_v11, 5  ;;  %v13669_v21 = vsel %vm12773_vm8, %v2149_v27, %v2150_v28  ;;  %v2024_v11 = vld [vmem:[%s12471_s6 + $0xa0] sm:$0xe] }
 0x183   : > { %10974 = vmatmul.mubr.msk.bf16.vlgmr.msra.gmra.mrb[0].mxu1 %vm1075_vm4, %v15487_v38  ;;  %11270 = vmatmul.mubr.msk.bf16.gmra.mrb[32].mxu0 %vm1075_vm4, %v12054_v12  ;;  %v12056_v12 = vld [vmem:[%s12471_s6 + $0xe4] sm:$0xff]   ;;  %v6473_v38 = vrot.slane %v6471_v44, 4  ;;  %v2166_v49 = vrot.slane %v13338_v13, 5  ;;  %v6487_v16 = vshll.u32 %v9976_v46, 16  ;;  %v2162_v44 = vrot.slane %v2160_v57, 4 }
 0x184   : > { %11038 = vmatpush3.bf16.msra.mxu1 %v13251_v51  ;;  %10977 = vmatprep.mubr.msk.bf16.mxu1 %vm1075_vm4, %v15488_v59  ;;  %v6481_v59 = vshrl.u32 %v9975_v47, 16  ;;  %v6491_v51 = vshrl.u32 %v9976_v46, 16  ;;  %v2169_v8 = vrot.slane %v12188_v50, 5  ;;  %v6464_v13 = vor.u32 %v6463_v15, %v6460_v39 }
 0x185   : > { %11273 = vmatprep.mubr.msk.bf16.mxu0 %vm1075_vm4, %v12055_v61  ;;  %11433 = vmatprep.subr.bf16.mxu1 %v12478_v7  ;;  %v2023_v61 = vld [vmem:[%s12471_s6 + $0x8c] sm:$0xe]  ;;  %v6474_v28 = vor.u32 %v6473_v38, %v13659_v9  ;;  %v6479_v27 = vrot.slane %v6477_v37, 5  ;;  %v2165_v42 = vrot.slane %v2163_v25, 4  ;;  %v13693_v39 = vsel %vm12773_vm8, %v2155_v24, %v2156_v26  ;;  %v12058_v38 = vld [vmem:[%s12471_s6 + $0xf8] sm:$0xff]  }
 0x186   : > { %v9395_v47 = vrot.slane %v2023_v61, 9  ;;  %v2168_v37 = vrot.slane %v2166_v49, 4  ;;  %v13695_v46 = vrot.slane %v6487_v16, 5  ;;  %v9396_v15 = vrot.slane %v2024_v11, 9  ;;  %v12059_v16 = vld [vmem:[%s12471_s6 + $0x104] sm:$0xff]  }
 0x187   : > { %v6475_v50 = vrot.slane %v6474_v28, 4  ;;  %v2186_v11 = vrot.slane %v13366_v40, 5  ;;  %v2025_v28 = vld [vmem:[%s12471_s6 + $0xb4] sm:$0xe] }
 0x188   : > { %v13699_v61 = vsel %vm12773_vm8, %v9395_v47, %v2160_v57  ;;  %v13711_v57 = vsel %vm12773_vm8, %v2165_v42, %v2166_v49  ;;  %v2178_v47 = vrot.slane %v2176_v18, 4  ;;  %v13716_v31 = vsel %vm12773_vm8, %v2168_v37, %v2169_v8  ;;  %v12189_v8 = vld [vmem:[%s12471_s6 + $0xb0] sm:$0x1] }
 0x189   : > { %v13727_v49 = vsel %vm12773_vm8, %v9396_v15, %v2173_v48  ;;  %v2182_v42 = vrot.slane %v12189_v8, 5  ;;  %v15490_v37 = vcombine.low %v13561_v53, %v13571_v34  ;;  %v2188_v15 = vrot.slane %v2186_v11, 4 }
 0x18b   : > { %10978 = vmatmul.mubr.msk.bf16.gmra.mrb[4].mxu1 %vm1075_vm4, %v9408_v54  ;;  %11274 = vmatmul.mubr.msk.bf16.gmra.mrb[36].mxu0 %vm1075_vm4, %v12056_v12  ;;  %v6483_v54 = vrot.slane %v6481_v59, 4  ;;  %v13687_v12 = vsel %vm12773_vm8, %v2152_v14, %v2153_v10  ;;  %v2175_v10 = vrot.slane %v2173_v48, 4  ;;  %v9978_v14 = vld [vmem:[%s12471_s6 + $0x3c] sm:$0xf]  ;;  %v6465_v59 = vrot.slane %v6464_v13, 4 }
 0x18c   : > { %10981 = vmatprep.mubr.msk.bf16.mxu1 %vm1075_vm4, %v9409_v23  ;;  %11277 = vmatprep.mubr.msk.bf16.mxu0 %vm1075_vm4, %v12057_v55  ;;  %v9977_v23 = vld [vmem:[%s12471_s6 + $0x38] sm:$0x1]  ;;  %v6493_v55 = vrot.slane %v6491_v51, 4  ;;  %v13707_v51 = vsel %vm12773_vm8, %v2162_v44, %v2163_v25  ;;  %v6505_v19 = vshll.u32 %v9978_v14, 16  ;;  %v15489_v25 = vcombine.low %v13557_v52, %v13567_v32 }
 0x18d   : > { %v6484_v26 = vor.u32 %v6483_v54, %v6479_v27  ;;  %v6497_v24 = vshll.u32 %v9977_v23, 16  ;;  %v9979_v54 = vld [vmem:[%s12471_s6 + $0x40] sm:$0xf]  ;;  %v6502_v23 = vshrl.u32 %v9978_v14, 16  ;;  %v13731_v40 = vsel %vm12773_vm8, %v2175_v10, %v2176_v18  ;;  %v9980_v14 = vld [vmem:[%s12471_s6 + $0x44] sm:$0xf] }
 0x18e   : > { %v6494_v13 = vor.u32 %v6493_v55, %v13695_v46  ;;  %v2181_v44 = vrot.slane %v2179_v60, 4  ;;  %v6470_v52 = vsel %vm12500_vm5, %v6465_v59, %v13659_v9  ;;  %v6480_v32 = vsel %vm12500_vm5, %v6475_v50, %v6479_v27  ;;  %v2026_v50 = vld [vmem:[%s12471_s6 + $0xc8] sm:$0xe] }
 0x18f   : > { %v6485_v48 = vrot.slane %v6484_v26, 4  ;;  %v6499_v18 = vrot.slane %v6497_v24, 5  ;;  %v9397_v55 = vrot.slane %v2025_v28, 9  ;;  %v2189_v10 = vrot.slane %v13380_v56, 5  ;;  %v12060_v24 = vld [vmem:[%s12471_s6 + $0x10c] sm:$0xff]  }
 0x190   : > { %v6511_v53 = vshll.u32 %v9979_v54, 16  ;;  %v6495_v34 = vrot.slane %v6494_v13, 4  ;;  %v6507_v9 = vrot.slane %v6505_v19, 5  ;;  %v6515_v59 = vshrl.u32 %v9979_v54, 16  ;;  %v9981_v54 = vld [vmem:[%s12471_s6 + $0x48] sm:$0xf] }
 0x191   : > { %v9418_v27 = vcombine.low %v13687_v12, %v13693_v39  ;;  %v13755_v56 = vsel %vm12773_vm8, %v2178_v47, %v2179_v60  ;;  %v13760_v19 = vcombine.low %v6470_v52, %v6480_v32  ;;  %v13764_v13 = vsel %vm12773_vm8, %v2181_v44, %v2182_v42  ;;  %v9984_v52 = vld [vmem:[%s12471_s6 + $0x54] sm:$0xf] }
 0x192   : > { %v6490_v28 = vsel %vm12500_vm5, %v6485_v48, %v13695_v46  ;;  %v13774_v60 = vsel %vm12773_vm8, %v9397_v55, %v2186_v11  ;;  %v13776_v47 = vrot.slane %v6511_v53, 5  ;;  %v6521_v8 = vshll.u32 %v9980_v14, 16 }
 0x193   : > { %10982 = vmatmul.mubr.msk.bf16.gmra.mrb[8].mxu1 %vm1075_vm4, %v15489_v25  ;;  %11278 = vmatmul.mubr.msk.bf16.gmra.mrb[40].mxu0 %vm1075_vm4, %v12058_v38  ;;  %v6504_v38 = vrot.slane %v6502_v23, 4  ;;  %v9983_v23 = vld [vmem:[%s12471_s6 + $0x50] sm:$0xf]  ;;  %v12061_v25 = vld [vmem:[%s12471_s6 + $0x118] sm:$0xff]   ;;  %v6500_v44 = vsel %vm12500_vm5, %v6495_v34, %v6499_v18  ;;  %v13783_v42 = vsel %vm12773_vm8, %v2188_v15, %v2189_v10  ;;  %v6517_v32 = vrot.slane %v6515_v59, 4 }
 0x194   : > { %10985 = vmatprep.mubr.msk.bf16.mxu1 %vm1075_vm4, %v15490_v37  ;;  %11281 = vmatprep.mubr.msk.bf16.mxu0 %vm1075_vm4, %v12059_v16  ;;  %v6525_v37 = vshrl.u32 %v9980_v14, 16  ;;  %v15491_v48 = vcombine.low %v13575_v6, %v13579_v41  ;;  %v6531_v11 = vshll.u32 %v9981_v54, 16  ;;  %v6535_v55 = vshrl.u32 %v9981_v54, 16  ;;  %v9985_v59 = vld [vmem:[%s12471_s6 + $0x58] sm:$0xf] }
 0x195   : > { %v6508_v46 = vor.u32 %v6507_v9, %v6504_v38  ;;  %v6546_v53 = vshrl.u32 %v9983_v23, 16  ;;  %v6549_v14 = vshll.u32 %v9983_v23, 16  ;;  %v15492_v18 = vcombine.low %v13598_v36, %v13603_v2  ;;  %v12190_v23 = vld [vmem:[%s12471_s6 + $0xc4] sm:$0x1] }
 0x196   : > { %v2191_v6 = vrot.slane %v2189_v10, 4  ;;  %v6555_v41 = vshll.u32 %v9984_v52, 16  ;;  %v6559_v34 = vshrl.u32 %v9984_v52, 16  ;;  %v13799_v9 = vrot.slane %v6521_v8, 5 }
 0x197   : > { %v2192_v36 = vrot.slane %v13383_v4, 5  ;;  %v6527_v2 = vrot.slane %v6525_v37, 4  ;;  %v13805_v54 = vrot.slane %v6508_v46, 4  ;;  %v6518_v10 = vor.u32 %v6517_v32, %v13776_v47  ;;  %v12062_v4 = vld [vmem:[%s12471_s6 + $0x120] sm:$0xff]   ;;  %v12063_v46 = vld [vmem:[%s12471_s6 + $0x12c] sm:$0xff]  }
 0x198   : > { %v2195_v52 = vrot.slane %v12190_v23, 5  ;;  %v6537_v38 = vrot.slane %v6535_v55, 4  ;;  %v6548_v8 = vrot.slane %v6546_v53, 4  ;;  %v6551_v15 = vrot.slane %v6549_v14, 5 }
 0x199   : > { %v13814_v37 = vrot.slane %v6555_v41, 5  ;;  %v6569_v16 = vshrl.u32 %v9985_v59, 16  ;;  %v13819_v32 = vsel %vm12773_vm8, %v2191_v6, %v2192_v36  ;;  %v6528_v23 = vor.u32 %v6527_v2, %v13799_v9 }
 0x19a   : > { %v13822_v55 = vrot.slane %v6518_v10, 4  ;;  %v2194_v53 = vrot.slane %v2192_v36, 4  ;;  %v2199_v41 = vrot.slane %v13390_v62, 5  ;;  %v6514_v6 = vsel %vm12500_vm5, %v13805_v54, %v13776_v47  ;;  %v15500_v47 = vld [vmem:[#allocation8_spill] sm:$0xff] }
 0x19b   : > { %10986 = vmatmul.mubr.msk.bf16.gmra.mrb[12].mxu1 %vm1075_vm4, %v15491_v48  ;;  %11282 = vmatmul.mubr.msk.bf16.gmra.mrb[44].mxu0 %vm1075_vm4, %v12060_v24  ;;  %v13803_v24 = vcombine.low %v6490_v28, %v6500_v44  ;;  %v9982_v48 = vld [vmem:[%s12471_s6 + $0x4c] sm:$0x1]  ;;  %v6561_v28 = vrot.slane %v6559_v34, 4  ;;  %v6565_v44 = vshll.u32 %v9985_v59, 16  ;;  %v15493_v34 = vcombine.low %v13607_v35, %v13621_v22 }
 0x19c   : > { %10989 = vmatprep.mubr.msk.bf16.mxu1 %vm1075_vm4, %v15492_v18  ;;  %11285 = vmatprep.mubr.msk.bf16.mxu0 %vm1075_vm4, %v12061_v25  ;;  %v9986_v25 = vld [vmem:[%s12471_s6 + $0x5c] sm:$0xf]  ;;  %v13811_v18 = vrot.slane %v6531_v11, 5  ;;  %v6541_v14 = vshll.u32 %v9982_v48, 16  ;;  %v2202_v59 = vrot.slane %v13399_v17, 5  ;;  %v6552_v10 = vor.u32 %v6551_v15, %v6548_v8 }
 0x19d   : > { %v6575_v26 = vshll.u32 %v9986_v25, 16  ;;  %v6579_v11 = vshrl.u32 %v9986_v25, 16  ;;  %v15494_v62 = vcombine.low %v13611_v29, %v13625_v3  ;;  %v6562_v35 = vor.u32 %v6561_v28, %v13814_v37  ;;  %v9987_v25 = vld [vmem:[%s12471_s6 + $0x60] sm:$0x1] }
 0x19e   : > { %v6538_v2 = vor.u32 %v6537_v38, %v13811_v18  ;;  %v13842_v22 = vrot.slane %v6565_v44, 5  ;;  %v2205_v36 = vrot.slane %v13402_v63, 5  ;;  %v6571_v38 = vrot.slane %v6569_v16, 4 }
 0x19f   : > { %v6529_v17 = vrot.slane %v6528_v23, 4  ;;  %v9398_v15 = vrot.slane %v2026_v50, 9  ;;  %v13847_v48 = vrot.slane %v6575_v26, 5  ;;  %v6581_v29 = vrot.slane %v6579_v11, 4  ;;  %v9988_v26 = vld [vmem:[%s12471_s6 + $0x64] sm:$0xf] }
 0x1a0   : > { %v6524_v3 = vsel %vm12500_vm5, %v13822_v55, %v13799_v9  ;;  %v13855_v63 = vsel %vm12773_vm8, %v2194_v53, %v2195_v52  ;;  %v6543_v8 = vrot.slane %v6541_v14, 5  ;;  %v2201_v16 = vrot.slane %v2199_v41, 4  ;;  %v12065_v55 = vld [vmem:[%s12471_s6 + $0x140] sm:$0xff]  }
 0x1a1   : > { %v6553_v28 = vrot.slane %v6552_v10, 4  ;;  %v2204_v44 = vrot.slane %v2202_v59, 4  ;;  %v6585_v50 = vshll.u32 %v9987_v25, 16  ;;  %v6563_v23 = vrot.slane %v6562_v35, 4  ;;  %v2027_v10 = vld [vmem:[%s12471_s6 + $0xdc] sm:$0xe] }
 0x1a2   : > { %v2207_v11 = vrot.slane %v2205_v36, 4  ;;  %v6572_v9 = vor.u32 %v6571_v38, %v13842_v22  ;;  %v6534_v53 = vsel %vm12500_vm5, %v6529_v17, %v13811_v18  ;;  %v13869_v14 = vsel %vm12773_vm8, %v9398_v15, %v2199_v41  ;;  %v9989_v38 = vld [vmem:[%s12471_s6 + $0x68] sm:$0xf]  ;;  %v9990_v15 = vld [vmem:[%s12471_s6 + $0x6c] sm:$0xf] }
 0x1a3   : > { %10990 = vmatmul.mubr.msk.bf16.gmra.mrb[16].mxu1 %vm1075_vm4, %v15493_v34  ;;  %11286 = vmatmul.mubr.msk.bf16.gmra.mrb[48].mxu0 %vm1075_vm4, %v12062_v4  ;;  %v6539_v4 = vrot.slane %v6538_v2, 4  ;;  %v12191_v34 = vld [vmem:[%s12471_s6 + $0xd8] sm:$0x1]  ;;  %v6582_v2 = vor.u32 %v6581_v29, %v13847_v48  ;;  %v13875_v35 = vsel %vm12773_vm8, %v2201_v16, %v2202_v59  ;;  %v2212_v25 = vrot.slane %v13409_v1, 5 }
 0x1a4   : > { %10993 = vmatprep.mubr.msk.bf16.mxu1 %vm1075_vm4, %v15494_v62  ;;  %11289 = vmatprep.mubr.msk.bf16.mxu0 %vm1075_vm4, %v12063_v46  ;;  %v12064_v46 = vld [vmem:[%s12471_s6 + $0x134] sm:$0xff]   ;;  %v2208_v62 = vrot.slane %v12191_v34, 5  ;;  %v6590_v34 = vshrl.u32 %v9988_v26, 16  ;;  %v6593_v52 = vshll.u32 %v9988_v26, 16  ;;  %v15495_v18 = vcombine.low %v13629_v45, %v13635_v0 }
 0x1a5   : > { %v6544_v41 = vsel %vm12500_vm5, %v6539_v4, %v6543_v8  ;;  %v6558_v17 = vsel %vm12500_vm5, %v6553_v28, %v13814_v37  ;;  %v13890_v59 = vsel %vm12773_vm8, %v2204_v44, %v2205_v36  ;;  %v13892_v1 = vrot.slane %v6585_v50, 5  ;;  %v9991_v8 = vld [vmem:[%s12471_s6 + $0x70] sm:$0xf] }
 0x1a6   : > { %v15496_v45 = vcombine.low %v13664_v5, %v13669_v21  ;;  %v6568_v0 = vsel %vm12500_vm5, %v6563_v23, %v13842_v22  ;;  %v13905_v37 = vsel %vm12773_vm8, %v2207_v11, %v2208_v62  ;;  %v13907_v36 = vrot.slane %v6572_v9, 4  ;;  %v12066_v62 = vld [vmem:[%s12471_s6 + $0x148] sm:$0xff]  }
 0x1a7   : > { %v9399_v29 = vrot.slane %v2027_v10, 9  ;;  %v13911_v16 = vrot.slane %v6582_v2, 4  ;;  %v2215_v5 = vrot.slane %v13418_v43, 5  ;;  %v6599_v21 = vshll.u32 %v9989_v38, 16  ;;  %v12067_v43 = vld [vmem:[%s12471_s6 + $0x154] sm:$0xff]  }
 0x1a8   : > { %v6603_v4 = vshrl.u32 %v9989_v38, 16  ;;  %v2214_v28 = vrot.slane %v2212_v25, 4  ;;  %v6592_v22 = vrot.slane %v6590_v34, 4  ;;  %v6595_v44 = vrot.slane %v6593_v52, 5  ;;  %v9993_v2 = vld [vmem:[%s12471_s6 + $0x78] sm:$0xf] }
 0x1a9   : > { %v6609_v50 = vshll.u32 %v9990_v15, 16  ;;  %v13919_v26 = vcombine.low %v6514_v6, %v6524_v3  ;;  %v6619_v23 = vshll.u32 %v9991_v8, 16  ;;  %v6623_v11 = vshrl.u32 %v9991_v8, 16  ;;  %v9994_v10 = vld [vmem:[%s12471_s6 + $0x7c] sm:$0xf] }
 0x1aa   : > { %v13923_v9 = vcombine.low %v6534_v53, %v6544_v41  ;;  %v13927_v52 = vcombine.low %v6558_v17, %v6568_v0  ;;  %v6578_v54 = vsel %vm12500_vm5, %v13907_v36, %v13847_v48  ;;  %v13937_v6 = vsel %vm12773_vm8, %v9399_v29, %v2212_v25  ;;  %v9992_v25 = vld [vmem:[%s12471_s6 + $0x74] sm:$0x1]  ;;  %v9995_v41 = vld [vmem:[%s12471_s6 + $0x80] sm:$0xf]  ;;  %v9996_v0 = vld [vmem:[%s12471_s6 + $0x84] sm:$0xf] }
 0x1ab   : > { %10994 = vmatmul.mubr.msk.bf16.gmra.mrb[20].mxu1 %vm1075_vm4, %v15495_v18  ;;  %11290 = vmatmul.mubr.msk.bf16.gmra.mrb[52].mxu0 %vm1075_vm4, %v12064_v46  ;;  %v6613_v46 = vshrl.u32 %v9990_v15, 16  ;;  %v13939_v3 = vrot.slane %v6599_v21, 5  ;;  %v6605_v53 = vrot.slane %v6603_v4, 4  ;;  %v6588_v38 = vsel %vm12500_vm5, %v13911_v16, %v13892_v1  ;;  %v12192_v4 = vld [vmem:[%s12471_s6 + $0xec] sm:$0x1] }
 0x1ac   : > { %10997 = vmatprep.mubr.msk.bf16.mxu1 %vm1075_vm4, %v15496_v45  ;;  %11293 = vmatprep.mubr.msk.bf16.mxu0 %vm1075_vm4, %v12065_v55  ;;  %v9425_v55 = vcombine.low %v13869_v14, %v13875_v35  ;;  %v13949_v34 = vsel %vm12773_vm8, %v2214_v28, %v2215_v5  ;;  %v6596_v48 = vor.u32 %v6595_v44, %v6592_v22  ;;  %v13951_v18 = vrot.slane %v6609_v50, 5 }
 0x1ad   : > { %v2217_v17 = vrot.slane %v2215_v5, 4  ;;  %v6615_v15 = vrot.slane %v6613_v46, 4  ;;  %v13959_v45 = vrot.slane %v6619_v23, 5  ;;  %v6625_v1 = vrot.slane %v6623_v11, 4  ;;  %v2028_v23 = vld [vmem:[%s12471_s6 + $0xf0] sm:$0xe] }
 0x1ae   : > { %v15497_v36 = vcombine.low %v13699_v61, %v13707_v51  ;;  %v6634_v29 = vshrl.u32 %v9993_v2, 16  ;;  %v6637_v8 = vshll.u32 %v9993_v2, 16  ;;  %v6643_v12 = vshll.u32 %v9994_v10, 16  ;;  %v15498_v11 = vld [vmem:[#allocation7_spill] sm:$0xff] }
 0x1af   : > { %v6647_v39 = vshrl.u32 %v9994_v10, 16  ;;  %v2218_v16 = vrot.slane %v13421_v30, 5  ;;  %v6653_v5 = vshll.u32 %v9995_v41, 16  ;;  %v6657_v21 = vshrl.u32 %v9995_v41, 16 }
 0x1b0   : > { %v2221_v28 = vrot.slane %v12192_v4, 5  ;;  %v6629_v22 = vshll.u32 %v9992_v25, 16  ;;  %v6663_v61 = vshll.u32 %v9996_v0, 16  ;;  %v6667_v51 = vshrl.u32 %v9996_v0, 16 }
 0x1b1   : > { %v6597_v44 = vrot.slane %v6596_v48, 4  ;;  %v6616_v50 = vor.u32 %v6615_v15, %v13951_v18  ;;  %v6626_v46 = vor.u32 %v6625_v1, %v13959_v45  ;;  %v6636_v2 = vrot.slane %v6634_v29, 4 }
 0x1b2   : > { %v13976_v30 = vrot.slane %v6643_v12, 5  ;;  %v6649_v10 = vrot.slane %v6647_v39, 4  ;;  %v13978_v25 = vrot.slane %v6653_v5, 5  ;;  %v6659_v0 = vrot.slane %v6657_v21, 4 }
 0x1b3   : > { %10998 = vmatmul.mubr.msk.bf16.gmra.mrb[24].mxu1 %vm1075_vm4, %v9418_v27  ;;  %11294 = vmatmul.mubr.msk.bf16.gmra.mrb[56].mxu0 %vm1075_vm4, %v12066_v62  ;;  %v6606_v27 = vor.u32 %v6605_v53, %v13939_v3  ;;  %v2225_v62 = vrot.slane %v15498_v11, 5  ;;  %v6639_v53 = vrot.slane %v6637_v8, 5  ;;  %v6631_v48 = vrot.slane %v6629_v22, 5 }
 0x1b4   : > { %11001 = vmatprep.mubr.msk.bf16.mxu1 %vm1075_vm4, %v15497_v36  ;;  %11297 = vmatprep.mubr.msk.bf16.mxu0 %vm1075_vm4, %v12067_v43  ;;  %v12068_v43 = vld [vmem:[%s12471_s6 + $0x15c] sm:$0xff]   ;;  %v2220_v36 = vrot.slane %v2218_v16, 4  ;;  %v9400_v4 = vrot.slane %v2028_v23, 9  ;;  %v13980_v15 = vrot.slane %v6663_v61, 5  ;;  %v6669_v1 = vrot.slane %v6667_v51, 4 }
 0x1b5   : > { %v6607_v41 = vrot.slane %v6606_v27, 4  ;;  %v15499_v11 = vcombine.low %v13711_v57, %v13716_v31  ;;  %v6617_v29 = vrot.slane %v6616_v50, 4  ;;  %v6627_v8 = vrot.slane %v6626_v46, 4  ;;  %v9997_v27 = vld [vmem:[%s12471_s6 + $0x88] sm:$0x1]  ;;  %v15502_v31 = vld [vmem:[#allocation9_spill] sm:$0xff] }
 0x1b6   : > { %v2227_v12 = vrot.slane %v2225_v62, 4  ;;  %v2228_v39 = vrot.slane %v15500_v47, 5  ;;  %v15501_v5 = vcombine.low %v13727_v49, %v13731_v40  ;;  %v13993_v21 = vcombine.low %v6578_v54, %v6588_v38 }
 0x1b7   : > { %v6640_v22 = vor.u32 %v6639_v53, %v6636_v2  ;;  %v6650_v57 = vor.u32 %v6649_v10, %v13976_v30  ;;  %v2231_v61 = vrot.slane %v15502_v31, 5  ;;  %v6602_v47 = vsel %vm12500_vm5, %v6597_v44, %v13939_v3  ;;  %v9998_v44 = vld [vmem:[%s12471_s6 + $0x8c] sm:$0xf]  ;;  %v2029_v10 = vld [vmem:[%s12471_s6 + $0x104] sm:$0xe] }
 0x1b8   : > { %v14004_v49 = vsel %vm12773_vm8, %v2217_v17, %v2218_v16  ;;  %v14008_v40 = vsel %vm12773_vm8, %v2220_v36, %v2221_v28  ;;  %v6660_v54 = vor.u32 %v6659_v0, %v13978_v25  ;;  %v6612_v38 = vsel %vm12500_vm5, %v6607_v41, %v13951_v18  ;;  %v12194_v41 = vld [vmem:[%s12471_s6 + $0x108] sm:$0xf] }
 0x1b9   : > { %v6670_v3 = vor.u32 %v6669_v1, %v13980_v15  ;;  %v6673_v17 = vshll.u32 %v9997_v27, 16  ;;  %v6622_v16 = vsel %vm12500_vm5, %v6617_v29, %v13959_v45  ;;  %v6632_v28 = vsel %vm12500_vm5, %v6627_v8, %v6631_v48 }
 0x1ba   : > { %v14026_v51 = vsel %vm12773_vm8, %v2227_v12, %v2228_v39  ;;  %v2230_v18 = vrot.slane %v2228_v39, 4  ;;  %v6641_v50 = vrot.slane %v6640_v22, 4  ;;  %v6651_v46 = vrot.slane %v6650_v57, 4 }
 0x1bb   : > { %11002 = vmatmul.mubr.msk.bf16.gmra.mrb[28].mxu1 %vm1075_vm4, %v15499_v11  ;;  %11298 = vmatmul.mubr.msk.bf16.gmra.mrb[60].mxu0 %vm1075_vm4, %v12068_v43  ;;  %v2233_v23 = vrot.slane %v2231_v61, 4  ;;  %v9427_v2 = vcombine.low %v13937_v6, %v13949_v34  ;;  %v9428_v45 = vcombine.low %v14004_v49, %v14008_v40  ;;  %v6661_v53 = vrot.slane %v6660_v54, 4 }
 0x1bc   : > { %11005 = vmatprep.mubr.msk.bf16.mxu1 %vm1075_vm4, %v15501_v5  ;;  %11303 = vmatprep.mubr.msk.bf16.mxu0 %vm1075_vm4, %v13760_v19  ;;  %v14016_v19 = vsel %vm12773_vm8, %v9400_v4, %v2225_v62  ;;  %v12193_v62 = vld [vmem:[%s12471_s6 + $0x100] sm:$0x1]  ;;  %v2238_v36 = vrot.slane %v12194_v41, 5  ;;  %v6671_v0 = vrot.slane %v6670_v3, 4  ;;  %v6675_v48 = vrot.slane %v6673_v17, 5 }
 0x1bd   : > { %v2234_v43 = vrot.slane %v12193_v62, 5  ;;  %v9999_v4 = vld [vmem:[%s12471_s6 + $0x90] sm:$0xf]  ;;  %v6678_v1 = vshrl.u32 %v9998_v44, 16  ;;  %v6681_v11 = vshll.u32 %v9998_v44, 16  ;;  %v15503_v29 = vcombine.low %v13755_v56, %v13764_v13 }
 0x1be   : > { %v14041_v8 = vcombine.low %v6602_v47, %v6612_v38  ;;  %v14043_v12 = vcombine.low %v6622_v16, %v6632_v28  ;;  %v9429_v39 = vcombine.low %v14016_v19, %v14026_v51  ;;  %v14049_v27 = vsel %vm12773_vm8, %v2230_v18, %v2231_v61  ;;  %v10000_v5 = vld [vmem:[%s12471_s6 + $0x94] sm:$0xf]  ;;  %v10001_v61 = vld [vmem:[%s12471_s6 + $0x98] sm:$0xf]  ;;  %v15505_v47 = vld [vmem:[#allocation6_spill] sm:$0xff] }
 0x1bf   : > { %v15504_v56 = vcombine.low %v13774_v60, %v13783_v42  ;;  %v6646_v13 = vsel %vm12500_vm5, %v6641_v50, %v13976_v30  ;;  %v6656_v22 = vsel %vm12500_vm5, %v6651_v46, %v13978_v25  ;;  %v14066_v57 = vsel %vm12773_vm8, %v2233_v23, %v2234_v43  ;;  %v12195_v30 = vld [vmem:[%s12471_s6 + $0x10c] sm:$0xf]  ;;  %v10004_v38 = vld [vmem:[%s12471_s6 + $0xa4] sm:$0xf] }
 0x1c0   : > { %v9401_v31 = vrot.slane %v2029_v10, 9  ;;  %v6666_v60 = vsel %vm12500_vm5, %v6661_v53, %v13980_v15  ;;  %v2240_v42 = vrot.slane %v2238_v36, 4  ;;  %v2241_v54 = vrot.slane %v12195_v30, 5 }
 0x1c1   : > { %v6687_v25 = vshll.u32 %v9999_v4, 16  ;;  %v6676_v3 = vsel %vm12500_vm5, %v6671_v0, %v6675_v48  ;;  %v6680_v17 = vrot.slane %v6678_v1, 4  ;;  %v6683_v16 = vrot.slane %v6681_v11, 5  ;;  %v10005_v11 = vld [vmem:[%s12471_s6 + $0xa8] sm:$0xf] }
 0x1c2   : > { %v6691_v28 = vshrl.u32 %v9999_v4, 16  ;;  %v6697_v18 = vshll.u32 %v10000_v5, 16  ;;  %v6701_v44 = vshrl.u32 %v10000_v5, 16  ;;  %v6707_v50 = vshll.u32 %v10001_v61, 16 }
 0x1c3   : > { %11006 = vmatmul.mubr.msk.bf16.gmra.mrb[32].mxu1 %vm1075_vm4, %v15503_v29  ;;  %11304 = vmatmul.mubr.msk.bf16.vlgmr.msra.gmra.mrb[0].mxu0 %vm1075_vm4, %v13803_v24  ;;  %v10003_v24 = vld [vmem:[%s12471_s6 + $0xa0] sm:$0xf]  ;;  %v6731_v15 = vshll.u32 %v10004_v38, 16  ;;  %v6735_v62 = vshrl.u32 %v10004_v38, 16  ;;  %v14080_v43 = vcombine.low %v6646_v13, %v6656_v22  ;;  %v9430_v53 = vcombine.low %v14049_v27, %v14066_v57  ;;  %v10006_v38 = vld [vmem:[%s12471_s6 + $0xac] sm:$0xf] }
 0x1c4   : > { %11009 = vmatprep.mubr.msk.bf16.mxu1 %vm1075_vm4, %v15504_v56  ;;  %11368 = vmatpush3.bf16.msra.mxu0 %v15505_v47  ;;  %v6722_v46 = vshrl.u32 %v10003_v24, 16  ;;  %v6725_v23 = vshll.u32 %v10003_v24, 16  ;;  %v14086_v10 = vsel %vm12773_vm8, %v9401_v31, %v2238_v36  ;;  %v14090_v41 = vsel %vm12773_vm8, %v2240_v42, %v2241_v54  ;;  %v10002_v36 = vld [vmem:[%s12471_s6 + $0x9c] sm:$0x1]  ;;  %v12197_v42 = vld [vmem:[%s12471_s6 + $0x114] sm:$0x1] }
 0x1c5   : > { %11307 = vmatprep.mubr.msk.bf16.mxu0 %vm1075_vm4, %v13919_v26  ;;  %v6711_v26 = vshrl.u32 %v10001_v61, 16  ;;  %v14092_v0 = vcombine.low %v6666_v60, %v6676_v3  ;;  %v6684_v48 = vor.u32 %v6683_v16, %v6680_v17  ;;  %v14094_v4 = vrot.slane %v6687_v25, 5  ;;  %v2030_v17 = vld [vmem:[%s12471_s6 + $0x118] sm:$0xe]  ;;  %v12198_v16 = vld [vmem:[%s12471_s6 + $0x11c] sm:$0xf] }
 0x1c6   : > { %v6693_v1 = vrot.slane %v6691_v28, 4  ;;  %v15506_v29 = vcombine.low %v13819_v32, %v13855_v63  ;;  %v14101_v5 = vrot.slane %v6697_v18, 5  ;;  %v6703_v56 = vrot.slane %v6701_v44, 4  ;;  %v12199_v18 = vld [vmem:[%s12471_s6 + $0x120] sm:$0xf] }
 0x1c7   : > { %v14104_v13 = vrot.slane %v6707_v50, 5  ;;  %v6713_v22 = vrot.slane %v6711_v26, 4  ;;  %v6724_v32 = vrot.slane %v6722_v46, 4  ;;  %v6727_v63 = vrot.slane %v6725_v23, 5  ;;  %v12200_v46 = vld [vmem:[%s12471_s6 + $0x124] sm:$0xf] }
 0x1c8   : > { %v14112_v31 = vrot.slane %v6731_v15, 5  ;;  %v6737_v61 = vrot.slane %v6735_v62, 4  ;;  %v9431_v24 = vcombine.low %v14086_v10, %v14090_v41  ;;  %v6741_v47 = vshll.u32 %v10005_v11, 16  ;;  %v10012_v27 = vld [vmem:[%s12471_s6 + $0xc4] sm:$0x1] }
 0x1c9   : > { %v6745_v14 = vshrl.u32 %v10005_v11, 16  ;;  %v6694_v35 = vor.u32 %v6693_v1, %v14094_v4  ;;  %v2247_v30 = vrot.slane %v12197_v42, 5  ;;  %v6717_v25 = vshll.u32 %v10002_v36, 16  ;;  %v12201_v42 = vld [vmem:[%s12471_s6 + $0x128] sm:$0x1] }
 0x1ca   : > { %v6704_v3 = vor.u32 %v6703_v56, %v14101_v5  ;;  %v2251_v28 = vrot.slane %v12198_v16, 5  ;;  %v6685_v44 = vrot.slane %v6684_v48, 4  ;;  %v6728_v50 = vor.u32 %v6727_v63, %v6724_v32  ;;  %v10019_v41 = vld [vmem:[%s12471_s6 + $0xe0] sm:$0xf] }
 0x1cb   : > { %11010 = vmatmul.mubr.msk.bf16.gmra.mrb[36].mxu1 %vm1075_vm4, %v15506_v29  ;;  %11308 = vmatmul.mubr.msk.bf16.gmra.mrb[4].mxu0 %vm1075_vm4, %v13923_v9  ;;  %v2243_v9 = vrot.slane %v2241_v54, 4  ;;  %v2254_v54 = vrot.slane %v12199_v18, 5  ;;  %v6738_v26 = vor.u32 %v6737_v61, %v14112_v31  ;;  %v2257_v23 = vrot.slane %v12200_v46, 5 }
 0x1cc   : > { %11013 = vmatprep.mubr.msk.bf16.mxu1 %vm1075_vm4, %v9425_v55  ;;  %11311 = vmatprep.mubr.msk.bf16.mxu0 %vm1075_vm4, %v13927_v52  ;;  %v12196_v55 = vld [vmem:[%s12471_s6 + $0x110] sm:$0xf]  ;;  %v6714_v52 = vor.u32 %v6713_v22, %v14104_v13  ;;  %v6743_v15 = vrot.slane %v6741_v47, 5  ;;  %v6747_v62 = vrot.slane %v6745_v14, 4  ;;  %v6751_v1 = vshll.u32 %v10006_v38, 16 }
 0x1cd   : > { %v2244_v60 = vrot.slane %v12196_v55, 5  ;;  %v6755_v11 = vshrl.u32 %v10006_v38, 16  ;;  %v6695_v29 = vrot.slane %v6694_v35, 4  ;;  %v6719_v56 = vrot.slane %v6717_v25, 5 }
 0x1ce   : > { %v9402_v22 = vrot.slane %v2030_v17, 9  ;;  %v15507_v55 = vcombine.low %v13890_v59, %v13905_v37  ;;  %v6705_v48 = vrot.slane %v6704_v3, 4  ;;  %v6715_v32 = vrot.slane %v6714_v52, 4  ;;  %v10007_v37 = vld [vmem:[%s12471_s6 + $0xb0] sm:$0x1] }
 0x1cf   : > { %v2246_v36 = vrot.slane %v2244_v60, 4  ;;  %v2253_v63 = vrot.slane %v2251_v28, 4  ;;  %v2256_v61 = vrot.slane %v2254_v54, 4  ;;  %v6729_v47 = vrot.slane %v6728_v50, 4  ;;  %v10009_v17 = vld [vmem:[%s12471_s6 + $0xb8] sm:$0xf] }
 0x1d0   : > { %v6739_v14 = vrot.slane %v6738_v26, 4  ;;  %v2259_v35 = vrot.slane %v2257_v23, 4  ;;  %v2260_v59 = vrot.slane %v12201_v42, 5  ;;  %v6748_v25 = vor.u32 %v6747_v62, %v6743_v15  ;;  %v12202_v26 = vld [vmem:[%s12471_s6 + $0x130] sm:$0xf] }
 0x1d1   : > { %v14147_v6 = vrot.slane %v6751_v1, 5  ;;  %v6757_v34 = vrot.slane %v6755_v11, 4  ;;  %v6700_v38 = vsel %vm12500_vm5, %v6695_v29, %v14101_v5  ;;  %v14157_v3 = vsel %vm12773_vm8, %v2246_v36, %v2247_v30  ;;  %v10008_v30 = vld [vmem:[%s12471_s6 + $0xb4] sm:$0xf]  ;;  %v10010_v36 = vld [vmem:[%s12471_s6 + $0xbc] sm:$0xf] }
 0x1d2   : > { %v14171_v5 = vsel %vm12773_vm8, %v2253_v63, %v2254_v54  ;;  %v6761_v52 = vshll.u32 %v10007_v37, 16  ;;  %v6734_v16 = vsel %vm12500_vm5, %v6729_v47, %v14112_v31  ;;  %v14186_v18 = vsel %vm12773_vm8, %v2259_v35, %v2260_v59  ;;  %v10014_v63 = vld [vmem:[%s12471_s6 + $0xcc] sm:$0xf] }
 0x1d3   : > { %11014 = vmatmul.mubr.msk.bf16.gmra.mrb[40].mxu1 %vm1075_vm4, %v15507_v55  ;;  %11312 = vmatmul.mubr.msk.bf16.gmra.mrb[8].mxu0 %vm1075_vm4, %v13993_v21  ;;  %v14145_v21 = vsel %vm12773_vm8, %v2243_v9, %v2244_v60  ;;  %v2031_v9 = vld [vmem:[%s12471_s6 + $0x12c] sm:$0xe]  ;;  %v6710_v60 = vsel %vm12500_vm5, %v6705_v48, %v14104_v13  ;;  %v14182_v13 = vsel %vm12773_vm8, %v2256_v61, %v2257_v23  ;;  %v14188_v54 = vrot.slane %v6748_v25, 4  ;;  %v10011_v48 = vld [vmem:[%s12471_s6 + $0xc0] sm:$0xf] }
 0x1d4   : > { %11017 = vmatprep.mubr.msk.bf16.mxu1 %vm1075_vm4, %v9427_v2  ;;  %11315 = vmatprep.mubr.msk.bf16.mxu0 %vm1075_vm4, %v14041_v8  ;;  %v6690_v2 = vsel %vm12500_vm5, %v6685_v44, %v14094_v4  ;;  %v14161_v8 = vsel %vm12773_vm8, %v9402_v22, %v2251_v28  ;;  %v6720_v4 = vsel %vm12500_vm5, %v6715_v32, %v6719_v56  ;;  %v9403_v50 = vrot.slane %v2031_v9, 9  ;;  %v12203_v22 = vld [vmem:[%s12471_s6 + $0x134] sm:$0xf]  ;;  %v10013_v32 = vld [vmem:[%s12471_s6 + $0xc8] sm:$0xf] }
 0x1d5   : > { %v6744_v28 = vsel %vm12500_vm5, %v6739_v14, %v6743_v15  ;;  %v6758_v44 = vor.u32 %v6757_v34, %v14147_v6  ;;  %v2264_v46 = vrot.slane %v12202_v26, 5  ;;  %v9432_v31 = vcombine.low %v14145_v21, %v14157_v3  ;;  %v10016_v34 = vld [vmem:[%s12471_s6 + $0xd4] sm:$0xf] }
 0x1d6   : > { %v6766_v15 = vshrl.u32 %v10008_v30, 16  ;;  %v6769_v62 = vshll.u32 %v10008_v30, 16  ;;  %v6775_v23 = vshll.u32 %v10009_v17, 16  ;;  %v10064_v1 = vcombine.low %v6690_v2, %v6700_v38 }
 0x1d7   : > { %v14198_v11 = vcombine.low %v6710_v60, %v6720_v4  ;;  %v9433_v29 = vcombine.low %v14161_v8, %v14171_v5  ;;  %v6779_v56 = vshrl.u32 %v10009_v17, 16  ;;  %v14209_v49 = vcombine.low %v6734_v16, %v6744_v28 }
 0x1d8   : > { %v9434_v40 = vcombine.low %v14182_v13, %v14186_v18  ;;  %v2267_v55 = vrot.slane %v12203_v22, 5  ;;  %v6754_v19 = vsel %vm12500_vm5, %v14188_v54, %v14147_v6  ;;  %v6759_v51 = vrot.slane %v6758_v44, 4  ;;  %v10025_v13 = vld [vmem:[%s12471_s6 + $0xf8] sm:$0xf] }
 0x1d9   : > { %v6768_v61 = vrot.slane %v6766_v15, 4  ;;  %v6771_v47 = vrot.slane %v6769_v62, 5  ;;  %v14227_v14 = vrot.slane %v6775_v23, 5  ;;  %v6785_v35 = vshll.u32 %v10010_v36, 16  ;;  %v10018_v15 = vld [vmem:[%s12471_s6 + $0xdc] sm:$0xf] }
 0x1da   : > { %v6781_v42 = vrot.slane %v6779_v56, 4  ;;  %v6789_v59 = vshrl.u32 %v10010_v36, 16  ;;  %v6795_v37 = vshll.u32 %v10011_v48, 16  ;;  %v6799_v25 = vshrl.u32 %v10011_v48, 16 }
 0x1db   : > { %11018 = vmatmul.mubr.msk.bf16.gmra.mrb[44].mxu1 %vm1075_vm4, %v9428_v45  ;;  %11316 = vmatmul.mubr.msk.bf16.gmra.mrb[12].mxu0 %vm1075_vm4, %v14043_v12  ;;  %v6763_v45 = vrot.slane %v6761_v52, 5  ;;  %v14223_v12 = vsel %vm12773_vm8, %v9403_v50, %v2264_v46  ;;  %v6810_v6 = vshrl.u32 %v10013_v32, 16  ;;  %v6813_v2 = vshll.u32 %v10013_v32, 16 }
 0x1dc   : > { %11021 = vmatprep.mubr.msk.bf16.mxu1 %vm1075_vm4, %v9429_v39  ;;  %11319 = vmatprep.mubr.msk.bf16.mxu0 %vm1075_vm4, %v14080_v43  ;;  %v2266_v39 = vrot.slane %v2264_v46, 4  ;;  %v10015_v43 = vld [vmem:[%s12471_s6 + $0xd0] sm:$0xf]  ;;  %v6819_v38 = vshll.u32 %v10014_v63, 16  ;;  %v6823_v9 = vshrl.u32 %v10014_v63, 16  ;;  %v6772_v17 = vor.u32 %v6771_v47, %v6768_v61 }
 0x1dd   : > { %v6764_v60 = vsel %vm12500_vm5, %v6759_v51, %v6763_v45  ;;  %v6829_v52 = vshll.u32 %v10015_v43, 16  ;;  %v6833_v30 = vshrl.u32 %v10015_v43, 16  ;;  %v14237_v16 = vrot.slane %v6785_v35, 5  ;;  %v12204_v63 = vld [vmem:[%s12471_s6 + $0x138] sm:$0xf] }
 0x1de   : > { %v14235_v4 = vsel %vm12773_vm8, %v2266_v39, %v2267_v55  ;;  %v6839_v28 = vshll.u32 %v10016_v34, 16  ;;  %v6843_v54 = vshrl.u32 %v10016_v34, 16  ;;  %v6782_v44 = vor.u32 %v6781_v42, %v14227_v14 }
 0x1df   : > { %v6791_v50 = vrot.slane %v6789_v59, 4  ;;  %v14244_v26 = vrot.slane %v6795_v37, 5  ;;  %v6801_v46 = vrot.slane %v6799_v25, 4  ;;  %v6812_v57 = vrot.slane %v6810_v6, 4  ;;  %v12205_v25 = vld [vmem:[%s12471_s6 + $0x13c] sm:$0x1] }
 0x1e0   : > { %v14254_v62 = vrot.slane %v6819_v38, 5  ;;  %v6825_v23 = vrot.slane %v6823_v9, 4  ;;  %v14257_v36 = vcombine.low %v6754_v19, %v6764_v60  ;;  %v2269_v56 = vrot.slane %v2267_v55, 4 }
 0x1e1   : > { %v14259_v45 = vrot.slane %v6829_v52, 5  ;;  %v6835_v22 = vrot.slane %v6833_v30, 4  ;;  %v14262_v48 = vrot.slane %v6839_v28, 5  ;;  %v6845_v10 = vrot.slane %v6843_v54, 4 }
 0x1e2   : > { %v6857_v51 = vshll.u32 %v10018_v15, 16  ;;  %v6773_v39 = vrot.slane %v6772_v17, 4  ;;  %v6783_v32 = vrot.slane %v6782_v44, 4  ;;  %v2270_v61 = vrot.slane %v12204_v63, 5  ;;  %v10020_v17 = vld [vmem:[%s12471_s6 + $0xe4] sm:$0xf] }
 0x1e3   : > { %11022 = vmatmul.mubr.msk.bf16.gmra.mrb[48].mxu1 %vm1075_vm4, %v9430_v53  ;;  %11320 = vmatmul.mubr.msk.bf16.gmra.mrb[16].mxu0 %vm1075_vm4, %v14092_v0  ;;  %v6815_v53 = vrot.slane %v6813_v2, 5  ;;  %v10017_v0 = vld [vmem:[%s12471_s6 + $0xd8] sm:$0x1]  ;;  %v6805_v47 = vshll.u32 %v10012_v27, 16  ;;  %v6802_v55 = vor.u32 %v6801_v46, %v14244_v26  ;;  %v6826_v35 = vor.u32 %v6825_v23, %v14254_v62 }
 0x1e4   : > { %11025 = vmatprep.mubr.msk.bf16.mxu1 %vm1075_vm4, %v9431_v24  ;;  %11323 = vmatprep.mubr.msk.bf16.mxu0 %vm1075_vm4, %v10064_v1  ;;  %v6854_v24 = vshrl.u32 %v10018_v15, 16  ;;  %v6792_v1 = vor.u32 %v6791_v50, %v14237_v16  ;;  %v6836_v43 = vor.u32 %v6835_v22, %v14259_v45  ;;  %v6849_v42 = vshll.u32 %v10017_v0, 16  ;;  %v10023_v22 = vld [vmem:[%s12471_s6 + $0xf0] sm:$0xf] }
 0x1e5   : > { %v6816_v19 = vor.u32 %v6815_v53, %v6812_v57  ;;  %v6863_v59 = vshll.u32 %v10019_v41, 16  ;;  %v6867_v37 = vshrl.u32 %v10019_v41, 16  ;;  %v2273_v34 = vrot.slane %v12205_v25, 5 }
 0x1e6   : > { %v6846_v6 = vor.u32 %v6845_v10, %v14262_v48  ;;  %v6856_v2 = vrot.slane %v6854_v24, 4  ;;  %v6859_v38 = vrot.slane %v6857_v51, 5  ;;  %v6778_v9 = vsel %vm12500_vm5, %v6773_v39, %v14227_v14  ;;  %v10021_v14 = vld [vmem:[%s12471_s6 + $0xe8] sm:$0xf] }
 0x1e7   : > { %v6788_v60 = vsel %vm12500_vm5, %v6783_v32, %v14237_v16  ;;  %v2272_v52 = vrot.slane %v2270_v61, 4  ;;  %v6807_v30 = vrot.slane %v6805_v47, 5  ;;  %v6793_v21 = vrot.slane %v6792_v1, 4 }
 0x1e8   : > { %v6803_v3 = vrot.slane %v6802_v55, 4  ;;  %v6827_v28 = vrot.slane %v6826_v35, 4  ;;  %v6837_v16 = vrot.slane %v6836_v43, 4  ;;  %v6851_v54 = vrot.slane %v6849_v42, 5  ;;  %v15510_v55 = vld [vmem:[#allocation5_spill] sm:$0xff] }
 0x1e9   : > { %v14292_v44 = vrot.slane %v6863_v59, 5  ;;  %v6869_v50 = vrot.slane %v6867_v37, 4  ;;  %v6860_v46 = vor.u32 %v6859_v38, %v6856_v2  ;;  %v6873_v8 = vshll.u32 %v10020_v17, 16  ;;  %v10026_v37 = vld [vmem:[%s12471_s6 + $0xfc] sm:$0xf] }
 0x1ea   : > { %v6877_v5 = vshrl.u32 %v10020_v17, 16  ;;  %v2271_v15 = vsel %vm12773_vm8, %v2269_v56, %v2270_v61  ;;  %v6883_v27 = vshll.u32 %v10021_v14, 16  ;;  %v10068_v57 = vcombine.low %v6778_v9, %v6788_v60  ;;  %v15508_v61 = vld [vmem:[#allocation10_spill] sm:$0xff]  ;;  %v10028_v2 = vld [vmem:[%s12471_s6 + $0x104] sm:$0xf]  ;;  %v12069_v17 = vld [vmem:[%s12471_s6 + $0x14] sm:$0xff]  }
 0x1eb   : > { %11026 = vmatmul.mubr.msk.bf16.gmra.mrb[52].mxu1 %vm1075_vm4, %v9432_v31  ;;  %11324 = vmatmul.mubr.msk.bf16.gmra.mrb[20].mxu0 %vm1075_vm4, %v14198_v11  ;;  %v6817_v31 = vrot.slane %v6816_v19, 4  ;;  %v6847_v11 = vrot.slane %v6846_v6, 4  ;;  %v2274_v53 = vsel %vm12773_vm8, %v2272_v52, %v2273_v34  ;;  %v6798_v23 = vsel %vm12500_vm5, %v6793_v21, %v14244_v26  ;;  %v10024_v26 = vld [vmem:[%s12471_s6 + $0xf4] sm:$0xf] }
 0x1ec   : > { %11029 = vmatprep.mubr.msk.bf16.mxu1 %vm1075_vm4, %v9433_v29  ;;  %11327 = vmatprep.mubr.msk.bf16.mxu0 %vm1075_vm4, %v14209_v49  ;;  %v9435_v29 = vcombine.low %v14223_v12, %v14235_v4  ;;  %v6887_v49 = vshrl.u32 %v10021_v14, 16  ;;  %v6808_v0 = vsel %vm12500_vm5, %v6803_v3, %v6807_v30  ;;  %v6832_v4 = vsel %vm12500_vm5, %v6827_v28, %v14259_v45  ;;  %v10029_v30 = vld [vmem:[%s12471_s6 + $0x108] sm:$0xf] }
 0x1ed   : > { %v6822_v12 = vsel %vm12500_vm5, %v6817_v31, %v14254_v62  ;;  %v6842_v56 = vsel %vm12500_vm5, %v6837_v16, %v14262_v48  ;;  %v6870_v10 = vor.u32 %v6869_v50, %v14292_v44  ;;  %v6852_v41 = vsel %vm12500_vm5, %v6847_v11, %v6851_v54  ;;  %v10022_v62 = vld [vmem:[%s12471_s6 + $0xec] sm:$0x1] }
 0x1ee   : > { %v14319_v24 = vrot.slane %v6860_v46, 4  ;;  %v14321_v51 = vrot.slane %v6873_v8, 5  ;;  %v6879_v39 = vrot.slane %v6877_v5, 4  ;;  %v14328_v45 = vrot.slane %v6883_v27, 5 }
 0x1ef   : > { %v6889_v48 = vrot.slane %v6887_v49, 4  ;;  %v6898_v32 = vshrl.u32 %v10023_v22, 16  ;;  %v6901_v63 = vshll.u32 %v10023_v22, 16  ;;  %v15509_v47 = vor.u32 %v13481_v20, %v15508_v61  ;;  %v10030_v22 = vld [vmem:[%s12471_s6 + $0x10c] sm:$0xf] }
 0x1f0   : > { %v15511_v19 = vshll.u32 %v15510_v55, 16  ;;  %v6907_v18 = vshll.u32 %v10024_v26, 16  ;;  %v9436_v20 = vcombine.low %v2271_v15, %v2274_v53  ;;  %v10069_v43 = vcombine.low %v6798_v23, %v6808_v0  ;;  %v12206_v15 = vld [vmem:[%s12471_s6 + $0xbc] sm:$0xf] }
 0x1f1   : > { %v14333_v1 = vrot.slane %v15509_v47, 4  ;;  %v6871_v42 = vrot.slane %v6870_v10, 4  ;;  %v6893_v59 = vshll.u32 %v10022_v62, 16  ;;  %v10070_v25 = vcombine.low %v6822_v12, %v6832_v4  ;;  %v10031_v12 = vld [vmem:[%s12471_s6 + $0x110] sm:$0xf] }
 0x1f2   : > { %v14337_v35 = vrot.slane %v15511_v19, 5  ;;  %v14345_v34 = vcombine.low %v6842_v56, %v6852_v41  ;;  %v6880_v6 = vor.u32 %v6879_v39, %v14321_v51  ;;  %v6890_v38 = vor.u32 %v6889_v48, %v14328_v45  ;;  %v10027_v41 = vld [vmem:[%s12471_s6 + $0x100] sm:$0x1] }
 0x1f3   : > { %11030 = vmatmul.mubr.msk.bf16.gmra.mrb[56].mxu1 %vm1075_vm4, %v9434_v40  ;;  %11328 = vmatmul.mubr.msk.bf16.gmra.mrb[24].mxu0 %vm1075_vm4, %v14257_v36  ;;  %v6911_v40 = vshrl.u32 %v10024_v26, 16  ;;  %v6866_v36 = vsel %vm12500_vm5, %v14319_v24, %v14292_v44  ;;  %v6900_v9 = vrot.slane %v6898_v32, 4  ;;  %v6903_v60 = vrot.slane %v6901_v63, 5  ;;  %v12070_v48 = vld [vmem:[%s12471_s6 + $0x1c] sm:$0xff]  }
 0x1f4   : > { %11033 = vmatprep.mubr.msk.bf16.mxu1 %vm1075_vm4, %v9435_v29  ;;  %11331 = vmatprep.mubr.msk.bf16.mxu0 %vm1075_vm4, %v10068_v57  ;;  %v6917_v52 = vshll.u32 %v10025_v13, 16  ;;  %v14356_v21 = vrot.slane %v6907_v18, 5  ;;  %v6921_v31 = vshrl.u32 %v10025_v13, 16  ;;  %v6927_v28 = vshll.u32 %v10026_v37, 16 }
 0x1f5   : > { %v6913_v3 = vrot.slane %v6911_v40, 4  ;;  %v6876_v14 = vsel %vm12500_vm5, %v6871_v42, %v14321_v51  ;;  %v14361_v16 = vrot.slane %v6893_v59, 5  ;;  %v6931_v54 = vshrl.u32 %v10026_v37, 16  ;;  %v10033_v42 = vld [vmem:[%s12471_s6 + $0x118] sm:$0xf] }
 0x1f6   : > { %v6942_v44 = vshrl.u32 %v10028_v2, 16  ;;  %v14363_v50 = vrot.slane %v6880_v6, 4  ;;  %v6945_v11 = vshll.u32 %v10028_v2, 16  ;;  %v6951_v46 = vshll.u32 %v10029_v30, 16 }
 0x1f7   : > { %v6955_v8 = vshrl.u32 %v10029_v30, 16  ;;  %v6891_v5 = vrot.slane %v6890_v38, 4  ;;  %v14366_v29 = vrot.slane %v6917_v52, 5  ;;  %v3959_v27 = vshll.u32 %v12206_v15, 16  ;;  %v10032_v52 = vld [vmem:[%s12471_s6 + $0x114] sm:$0x1] }
 0x1f8   : > { %v3963_v49 = vshrl.u32 %v12206_v15, 16  ;;  %v6904_v57 = vor.u32 %v6903_v60, %v6900_v9  ;;  %v6914_v53 = vor.u32 %v6913_v3, %v14356_v21  ;;  %v6923_v23 = vrot.slane %v6921_v31, 4 }
 0x1f9   : > { %v14372_v0 = vrot.slane %v6927_v28, 5  ;;  %v6933_v4 = vrot.slane %v6931_v54, 4  ;;  %v6944_v56 = vrot.slane %v6942_v44, 4  ;;  %v14377_v10 = vrot.slane %v3959_v27, 5  ;;  %v10036_v27 = vld [vmem:[%s12471_s6 + $0x124] sm:$0xf] }
 0x1fa   : > { %v3965_v26 = vrot.slane %v3963_v49, 4  ;;  %v6947_v24 = vrot.slane %v6945_v11, 5  ;;  %v14380_v51 = vrot.slane %v6951_v46, 5  ;;  %v6957_v62 = vrot.slane %v6955_v8, 4  ;;  %v12072_v11 = vld [vmem:[%s12471_s6 + $0x30] sm:$0xff]   ;;  %v12073_v49 = vld [vmem:[%s12471_s6 + $0x3c] sm:$0xff]  }
 0x1fb   : > { %11034 = vmatmul.mubr.msk.bf16.gmra.mrb[60].mxu1 %vm1075_vm4, %v9436_v20  ;;  %11332 = vmatmul.mubr.msk.bf16.gmra.mrb[28].mxu0 %vm1075_vm4, %v10069_v43  ;;  %v3982_v39 = vsel %vm12500_vm5, %v14333_v1, %v14337_v35  ;;  %v6961_v32 = vshll.u32 %v10030_v22, 16  ;;  %v6965_v63 = vshrl.u32 %v10030_v22, 16  ;;  %v6971_v47 = vshll.u32 %v10031_v12, 16  ;;  %v12071_v20 = vld [vmem:[%s12471_s6 + $0x28] sm:$0xff]  }
 0x1fc   : > { %11039 = vmatprep.mubr.msk.bf16.mxu1 %vm1075_vm4, %v12069_v17  ;;  %11335 = vmatprep.mubr.msk.bf16.mxu0 %vm1075_vm4, %v10070_v25  ;;  %v3966_v55 = vor.u32 %v3965_v26, %v14377_v10  ;;  %v10072_v19 = vcombine.low %v6866_v36, %v6876_v14  ;;  %v6886_v13 = vsel %vm12500_vm5, %v14363_v50, %v14328_v45  ;;  %v6975_v40 = vshrl.u32 %v10031_v12, 16  ;;  %v10034_v45 = vld [vmem:[%s12471_s6 + $0x11c] sm:$0xf] }
 0x1fd   : > { %v6896_v18 = vsel %vm12500_vm5, %v6891_v5, %v14361_v16  ;;  %v6905_v1 = vrot.slane %v6904_v57, 4  ;;  %v6924_v35 = vor.u32 %v6923_v23, %v14366_v29  ;;  %v6937_v43 = vshll.u32 %v10027_v41, 16 }
 0x1fe   : > { %v3967_v59 = vrot.slane %v3966_v55, 4  ;;  %v6915_v37 = vrot.slane %v6914_v53, 4  ;;  %v6934_v25 = vor.u32 %v6933_v4, %v14372_v0  ;;  %v6948_v36 = vor.u32 %v6947_v24, %v6944_v56  ;;  %v10038_v4 = vld [vmem:[%s12471_s6 + $0x12c] sm:$0xf] }
 0x1ff   : > { %v6958_v6 = vor.u32 %v6957_v62, %v14380_v51  ;;  %v14402_v2 = vrot.slane %v6961_v32, 5  ;;  %v6967_v38 = vrot.slane %v6965_v63, 4  ;;  %v14404_v9 = vrot.slane %v6971_v47, 5  ;;  %v10039_v62 = vld [vmem:[%s12471_s6 + $0x130] sm:$0xf] }
 0x200   : > { %v3972_v60 = vsel %vm12500_vm5, %v3967_v59, %v15508_v61  ;;  %v6977_v30 = vrot.slane %v6975_v40, 4  ;;  %v6986_v17 = vshrl.u32 %v10033_v42, 16  ;;  %v6989_v3 = vshll.u32 %v10033_v42, 16  ;;  %v12074_v42 = vld [vmem:[%s12471_s6 + $0x44] sm:$0xff]  }
 0x201   : > { %v14413_v31 = vcombine.low %v3972_v60, %v3982_v39  ;;  %v10073_v28 = vcombine.low %v6886_v13, %v6896_v18  ;;  %v6925_v61 = vrot.slane %v6924_v35, 4  ;;  %v6939_v14 = vrot.slane %v6937_v43, 5  ;;  %v10041_v60 = vld [vmem:[%s12471_s6 + $0x138] sm:$0xf] }
 0x202   : > { %v6995_v16 = vshll.u32 %v10034_v45, 16  ;;  %v6920_v54 = vsel %vm12500_vm5, %v6915_v37, %v14366_v29  ;;  %v6935_v44 = vrot.slane %v6934_v25, 4  ;;  %v6999_v50 = vshrl.u32 %v10034_v45, 16  ;;  %v10037_v37 = vld [vmem:[%s12471_s6 + $0x128] sm:$0x1] }
 0x203   : > { %11040 = vmatmul.mubr.msk.bf16.vlgmr.msra.gmra.mrb[0].mxu1 %vm1075_vm4, %v12070_v48  ;;  %11336 = vmatmul.mubr.msk.bf16.gmra.mrb[32].mxu0 %vm1075_vm4, %v14345_v34  ;;  %v6910_v34 = vsel %vm12500_vm5, %v6905_v1, %v14356_v21  ;;  %v6949_v46 = vrot.slane %v6948_v36, 4  ;;  %v6959_v8 = vrot.slane %v6958_v6, 4  ;;  %v6968_v5 = vor.u32 %v6967_v38, %v14402_v2  ;;  %v10040_v25 = vld [vmem:[%s12471_s6 + $0x134] sm:$0xf] }
 0x204   : > { %11434 = vmatpush3.bf16.msra.mxu1 %v12478_v7  ;;  %11043 = vmatprep.mubr.msk.bf16.mxu1 %vm1075_vm4, %v12071_v20  ;;  %v10035_v7 = vld [vmem:[%s12471_s6 + $0x120] sm:$0xf]  ;;  %v6981_v15 = vshll.u32 %v10032_v52, 16  ;;  %v6978_v57 = vor.u32 %v6977_v30, %v14404_v9  ;;  %v6988_v53 = vrot.slane %v6986_v17, 4  ;;  %v6991_v21 = vrot.slane %v6989_v3, 5  ;;  %v12075_v36 = vld [vmem:[%s12471_s6 + $0x50] sm:$0xff]  }
 0x205   : > { %11339 = vmatprep.mubr.msk.bf16.mxu0 %vm1075_vm4, %v10072_v19  ;;  %v7005_v23 = vshll.u32 %v10035_v7, 16  ;;  %v10074_v22 = vcombine.low %v6910_v34, %v6920_v54  ;;  %v6930_v29 = vsel %vm12500_vm5, %v6925_v61, %v14372_v0  ;;  %v14432_v12 = vrot.slane %v6995_v16, 5  ;;  %v10043_v52 = vld [vmem:[%s12471_s6 + $0x140] sm:$0xf]  ;;  %v10044_v61 = vld [vmem:[%s12471_s6 + $0x144] sm:$0xf] }
 0x206   : > { %v7001_v56 = vrot.slane %v6999_v50, 4  ;;  %v7009_v26 = vshrl.u32 %v10035_v7, 16  ;;  %v7015_v41 = vshll.u32 %v10036_v27, 16  ;;  %v7019_v24 = vshrl.u32 %v10036_v27, 16 }
 0x207   : > { %v6940_v39 = vsel %vm12500_vm5, %v6935_v44, %v6939_v14  ;;  %v6954_v48 = vsel %vm12500_vm5, %v6949_v46, %v14380_v51  ;;  %v6964_v0 = vsel %vm12500_vm5, %v6959_v8, %v14402_v2  ;;  %v6969_v32 = vrot.slane %v6968_v5, 4 }
 0x208   : > { %v6979_v63 = vrot.slane %v6978_v57, 4  ;;  %v6983_v47 = vrot.slane %v6981_v15, 5  ;;  %v6992_v55 = vor.u32 %v6991_v21, %v6988_v53  ;;  %v14447_v19 = vrot.slane %v7005_v23, 5 }
 0x209   : > { %v7030_v51 = vshrl.u32 %v10038_v4, 16  ;;  %v7033_v13 = vshll.u32 %v10038_v4, 16  ;;  %v7039_v18 = vshll.u32 %v10039_v62, 16  ;;  %v7043_v40 = vshrl.u32 %v10039_v62, 16  ;;  %v12076_v4 = vld [vmem:[%s12471_s6 + $0x58] sm:$0xff]  }
 0x20a   : > { %v7002_v20 = vor.u32 %v7001_v56, %v14432_v12  ;;  %v7011_v1 = vrot.slane %v7009_v26, 4  ;;  %v14451_v35 = vrot.slane %v7015_v41, 5  ;;  %v7021_v43 = vrot.slane %v7019_v24, 4  ;;  %v12077_v56 = vld [vmem:[%s12471_s6 + $0x64] sm:$0xff]  }
 0x20b   : > { %11044 = vmatmul.mubr.msk.bf16.gmra.mrb[4].mxu1 %vm1075_vm4, %v12072_v11  ;;  %11340 = vmatmul.mubr.msk.bf16.gmra.mrb[36].mxu0 %vm1075_vm4, %v10073_v28  ;;  %v10075_v59 = vcombine.low %v6930_v29, %v6940_v39  ;;  %v10076_v6 = vcombine.low %v6954_v48, %v6964_v0  ;;  %v6974_v45 = vsel %vm12500_vm5, %v6969_v32, %v14404_v9  ;;  %v6993_v38 = vrot.slane %v6992_v55, 4  ;;  %v10042_v29 = vld [vmem:[%s12471_s6 + $0x13c] sm:$0x1] }
 0x20c   : > { %11047 = vmatprep.mubr.msk.bf16.mxu1 %vm1075_vm4, %v12073_v49  ;;  %11343 = vmatprep.mubr.msk.bf16.mxu0 %vm1075_vm4, %v10074_v22  ;;  %v6984_v2 = vsel %vm12500_vm5, %v6979_v63, %v6983_v47  ;;  %v7032_v30 = vrot.slane %v7030_v51, 4  ;;  %v7035_v17 = vrot.slane %v7033_v13, 5  ;;  %v14464_v3 = vrot.slane %v7039_v18, 5  ;;  %v10046_v51 = vld [vmem:[%s12471_s6 + $0x14c] sm:$0xf] }
 0x20d   : > { %v7045_v28 = vrot.slane %v7043_v40, 4  ;;  %v7003_v14 = vrot.slane %v7002_v20, 4  ;;  %v7012_v7 = vor.u32 %v7011_v1, %v14447_v19  ;;  %v7022_v16 = vor.u32 %v7021_v43, %v14451_v35 }
 0x20e   : > { %v7025_v34 = vshll.u32 %v10037_v37, 16  ;;  %v7049_v9 = vshll.u32 %v10040_v25, 16  ;;  %v7053_v54 = vshrl.u32 %v10040_v25, 16  ;;  %v7059_v44 = vshll.u32 %v10041_v60, 16 }
 0x20f   : > { %v7063_v50 = vshrl.u32 %v10041_v60, 16  ;;  %v7074_v11 = vshrl.u32 %v10043_v52, 16  ;;  %v7077_v46 = vshll.u32 %v10043_v52, 16  ;;  %v7083_v8 = vshll.u32 %v10044_v61, 16 }
 0x210   : > { %v7087_v5 = vshrl.u32 %v10044_v61, 16  ;;  %v10077_v15 = vcombine.low %v6974_v45, %v6984_v2  ;;  %v6998_v27 = vsel %vm12500_vm5, %v6993_v38, %v14432_v12  ;;  %v7036_v49 = vor.u32 %v7035_v17, %v7032_v30  ;;  %v10045_v12 = vld [vmem:[%s12471_s6 + $0x148] sm:$0xf] }
 0x211   : > { %v7046_v57 = vor.u32 %v7045_v28, %v14464_v3  ;;  %v7008_v53 = vsel %vm12500_vm5, %v7003_v14, %v14447_v19  ;;  %v7013_v21 = vrot.slane %v7012_v7, 4  ;;  %v7023_v23 = vrot.slane %v7022_v16, 4  ;;  %v12078_v28 = vld [vmem:[%s12471_s6 + $0x6c] sm:$0xff]  }
 0x212   : > { %v7027_v22 = vrot.slane %v7025_v34, 5  ;;  %v7051_v26 = vrot.slane %v7049_v9, 5  ;;  %v7055_v41 = vrot.slane %v7053_v54, 4  ;;  %v14483_v24 = vrot.slane %v7059_v44, 5  ;;  %v12079_v34 = vld [vmem:[%s12471_s6 + $0x78] sm:$0xff]  }
 0x213   : > { %11048 = vmatmul.mubr.msk.bf16.gmra.mrb[8].mxu1 %vm1075_vm4, %v12074_v42  ;;  %11344 = vmatmul.mubr.msk.bf16.gmra.mrb[40].mxu0 %vm1075_vm4, %v10075_v59  ;;  %v7065_v62 = vrot.slane %v7063_v50, 4  ;;  %v7076_v39 = vrot.slane %v7074_v11, 4  ;;  %v7079_v48 = vrot.slane %v7077_v46, 5  ;;  %v14486_v0 = vrot.slane %v7083_v8, 5  ;;  %v10048_v42 = vld [vmem:[%s12471_s6 + $0x154] sm:$0xf] }
 0x214   : > { %11051 = vmatprep.mubr.msk.bf16.mxu1 %vm1075_vm4, %v12075_v36  ;;  %11347 = vmatprep.mubr.msk.bf16.mxu0 %vm1075_vm4, %v10076_v6  ;;  %v7089_v32 = vrot.slane %v7087_v5, 4  ;;  %v10078_v63 = vcombine.low %v6998_v27, %v7008_v53  ;;  %v7037_v47 = vrot.slane %v7036_v49, 4  ;;  %v7047_v55 = vrot.slane %v7046_v57, 4  ;;  %v10049_v59 = vld [vmem:[%s12471_s6 + $0x158] sm:$0xf] }
 0x215   : > { %v7069_v19 = vshll.u32 %v10042_v29, 16  ;;  %v7018_v13 = vsel %vm12500_vm5, %v7013_v21, %v14451_v35  ;;  %v7028_v18 = vsel %vm12500_vm5, %v7023_v23, %v7027_v22  ;;  %v7056_v40 = vor.u32 %v7055_v41, %v7051_v26  ;;  %v10047_v11 = vld [vmem:[%s12471_s6 + $0x150] sm:$0x1]  ;;  %v10050_v46 = vld [vmem:[%s12471_s6 + $0x15c] sm:$0xf] }
 0x216   : > { %v7066_v20 = vor.u32 %v7065_v62, %v14483_v24  ;;  %v7093_v1 = vshll.u32 %v10045_v12, 16  ;;  %v7097_v43 = vshrl.u32 %v10045_v12, 16  ;;  %v7080_v37 = vor.u32 %v7079_v48, %v7076_v39  ;;  %v10051_v49 = vld [vmem:[%s12471_s6 + $0x160] sm:$0xf] }
 0x217   : > { %v7090_v35 = vor.u32 %v7089_v32, %v14486_v0  ;;  %v7103_v25 = vshll.u32 %v10046_v51, 16  ;;  %v7107_v36 = vshrl.u32 %v10046_v51, 16  ;;  %v10079_v6 = vcombine.low %v7018_v13, %v7028_v18  ;;  %v12080_v39 = vld [vmem:[%s12471_s6 + $0x80] sm:$0xff]   ;;  %v12081_v32 = vld [vmem:[%s12471_s6 + $0x8c] sm:$0xff]  }
 0x218   : > { %v7042_v45 = vsel %vm12500_vm5, %v7037_v47, %v14464_v3  ;;  %v7052_v2 = vsel %vm12500_vm5, %v7047_v55, %v7051_v26  ;;  %v7071_v38 = vrot.slane %v7069_v19, 5  ;;  %v7118_v60 = vshrl.u32 %v10048_v42, 16 }
 0x219   : > { %v7121_v52 = vshll.u32 %v10048_v42, 16  ;;  %v7127_v30 = vshll.u32 %v10049_v59, 16  ;;  %v7131_v17 = vshrl.u32 %v10049_v59, 16  ;;  %v7057_v61 = vrot.slane %v7056_v40, 4 }
 0x21a   : > { %v7067_v14 = vrot.slane %v7066_v20, 4  ;;  %v7095_v7 = vrot.slane %v7093_v1, 5  ;;  %v7099_v16 = vrot.slane %v7097_v43, 4  ;;  %v7081_v9 = vrot.slane %v7080_v37, 4  ;;  %v10052_v1 = vld [vmem:[%s12471_s6 + $0x164] sm:$0x1] }
 0x21b   : > { %11052 = vmatmul.mubr.msk.bf16.gmra.mrb[12].mxu1 %vm1075_vm4, %v12076_v4  ;;  %11348 = vmatmul.mubr.msk.bf16.gmra.mrb[44].mxu0 %vm1075_vm4, %v10077_v15  ;;  %v7091_v54 = vrot.slane %v7090_v35, 4  ;;  %v7105_v3 = vrot.slane %v7103_v25, 5  ;;  %v7109_v44 = vrot.slane %v7107_v36, 4  ;;  %v10080_v50 = vcombine.low %v7042_v45, %v7052_v2  ;;  %v12082_v2 = vld [vmem:[%s12471_s6 + $0x94] sm:$0xff]  }
 0x21c   : > { %11055 = vmatprep.mubr.msk.bf16.mxu1 %vm1075_vm4, %v12077_v56  ;;  %11351 = vmatprep.mubr.msk.bf16.mxu0 %vm1075_vm4, %v10078_v63  ;;  %v7120_v8 = vrot.slane %v7118_v60, 4  ;;  %v7123_v5 = vrot.slane %v7121_v52, 5  ;;  %v7129_v15 = vrot.slane %v7127_v30, 5  ;;  %v7133_v27 = vrot.slane %v7131_v17, 4  ;;  %v12083_v52 = vld [vmem:[%s12471_s6 + $0xa0] sm:$0xff]  }
 0x21d   : > { %v7062_v57 = vsel %vm12500_vm5, %v7057_v61, %v14483_v24  ;;  %v7072_v53 = vsel %vm12500_vm5, %v7067_v14, %v7071_v38  ;;  %v7100_v21 = vor.u32 %v7099_v16, %v7095_v7  ;;  %v7086_v23 = vsel %vm12500_vm5, %v7081_v9, %v14486_v0  ;;  %v10118_v38 = vld [vmem:[%s12471_s6 + $0x28] sm:$0xe]  ;;  %v12208_v16 = vld [vmem:[%s12471_s6 + $0x30] sm:$0xf] }
 0x21e   : > { %v7096_v22 = vsel %vm12500_vm5, %v7091_v54, %v7095_v7  ;;  %v7110_v29 = vor.u32 %v7109_v44, %v7105_v3  ;;  %v7113_v4 = vshll.u32 %v10047_v11, 16  ;;  %v7137_v56 = vshll.u32 %v10050_v46, 16 }
 0x21f   : > { %v7141_v26 = vshrl.u32 %v10050_v46, 16  ;;  %v7147_v41 = vshll.u32 %v10051_v49, 16  ;;  %v7151_v24 = vshrl.u32 %v10051_v49, 16  ;;  %v7124_v62 = vor.u32 %v7123_v5, %v7120_v8  ;;  %v12210_v46 = vld [vmem:[%s12471_s6 + $0x40] sm:$0xf]  ;;  %v12084_v5 = vld [vmem:[%s12471_s6 + $0xa8] sm:$0xff]  }
 0x220   : > { %v7134_v12 = vor.u32 %v7133_v27, %v7129_v15  ;;  %v10081_v48 = vcombine.low %v7062_v57, %v7072_v53  ;;  %v10082_v63 = vcombine.low %v7086_v23, %v7096_v22  ;;  %v7101_v47 = vrot.slane %v7100_v21, 4  ;;  %v12085_v49 = vld [vmem:[%s12471_s6 + $0xb4] sm:$0xff]  }
 0x221   : > { %v7111_v0 = vrot.slane %v7110_v29, 4  ;;  %v7115_v55 = vrot.slane %v7113_v4, 5  ;;  %v7139_v19 = vrot.slane %v7137_v56, 5  ;;  %v7143_v51 = vrot.slane %v7141_v26, 4  ;;  %v12211_v23 = vld [vmem:[%s12471_s6 + $0x38] sm:$0x1] }
 0x222   : > { %v7149_v13 = vrot.slane %v7147_v41, 5  ;;  %v7153_v18 = vrot.slane %v7151_v24, 4  ;;  %v7125_v40 = vrot.slane %v7124_v62, 4  ;;  %v7135_v20 = vrot.slane %v7134_v12, 4  ;;  %v12212_v56 = vld [vmem:[%s12471_s6 + $0x44] sm:$0xf] }
 0x223   : > { %11056 = vmatmul.mubr.msk.bf16.gmra.mrb[16].mxu1 %vm1075_vm4, %v12078_v28  ;;  %11352 = vmatmul.mubr.msk.bf16.gmra.mrb[48].mxu0 %vm1075_vm4, %v10079_v6  ;;  %v7106_v43 = vsel %vm12500_vm5, %v7101_v47, %v7105_v3  ;;  %v7116_v42 = vsel %vm12500_vm5, %v7111_v0, %v7115_v55  ;;  %v7144_v59 = vor.u32 %v7143_v51, %v7139_v19  ;;  %v7157_v35 = vshll.u32 %v10052_v1, 16  ;;  %v12207_v6 = vld [vmem:[%s12471_s6 + $0x2c] sm:$0xf]  ;;  %v12209_v3 = vld [vmem:[%s12471_s6 + $0x34] sm:$0xf]  ;;  %v12086_v0 = vld [vmem:[%s12471_s6 + $0xbc] sm:$0xff]  }
 0x224   : > { %11059 = vmatprep.mubr.msk.bf16.mxu1 %vm1075_vm4, %v12079_v34  ;;  %11355 = vmatprep.mubr.msk.bf16.mxu0 %vm1075_vm4, %v10080_v50  ;;  %v7154_v37 = vor.u32 %v7153_v18, %v7149_v13  ;;  %v7130_v25 = vsel %vm12500_vm5, %v7125_v40, %v7129_v15  ;;  %v7140_v36 = vsel %vm12500_vm5, %v7135_v20, %v7139_v19  ;;  %v7809_v45 = vrot.slane %v12207_v6, 5  ;;  %v10119_v15 = vld [vmem:[%s12471_s6 + $0x3c] sm:$0xe]  ;;  %v12213_v62 = vld [vmem:[%s12471_s6 + $0x48] sm:$0xf] }
 0x225   : > { %v10083_v60 = vcombine.low %v7106_v43, %v7116_v42  ;;  %v10084_v30 = vcombine.low %v7130_v25, %v7140_v36  ;;  %v7145_v17 = vrot.slane %v7144_v59, 4  ;;  %v7159_v61 = vrot.slane %v7157_v35, 5  ;;  %v12087_v19 = vld [vmem:[%s12471_s6 + $0xc8] sm:$0xff]   ;;  %v12216_v43 = vld [vmem:[%s12471_s6 + $0x58] sm:$0xf] }
 0x226   : > { %v7155_v28 = vrot.slane %v7154_v37, 4  ;;  %v10134_v14 = vrot.slane %v10118_v38, 9  ;;  %v7811_v7 = vrot.slane %v7809_v45, 4  ;;  %v7812_v34 = vrot.slane %v12208_v16, 5  ;;  %v12217_v37 = vld [vmem:[%s12471_s6 + $0x5c] sm:$0xf] }
 0x227   : > { %v7150_v9 = vsel %vm12500_vm5, %v7145_v17, %v7149_v13  ;;  %v7815_v44 = vrot.slane %v12209_v3, 5  ;;  %v7822_v8 = vrot.slane %v12210_v46, 5  ;;  %v7818_v22 = vrot.slane %v12211_v23, 5  ;;  %v12215_v13 = vld [vmem:[%s12471_s6 + $0x4c] sm:$0x1] }
 0x228   : > { %v7160_v54 = vsel %vm12500_vm5, %v7155_v28, %v7159_v61  ;;  %v7810_v50 = vsel %vm12773_vm8, %v10134_v14, %v7809_v45  ;;  %v7813_v11 = vsel %vm12773_vm8, %v7811_v7, %v7812_v34  ;;  %v7814_v57 = vrot.slane %v7812_v34, 4  ;;  %v12218_v25 = vld [vmem:[%s12471_s6 + $0x68] sm:$0xf]  ;;  %v10121_v6 = vld [vmem:[%s12471_s6 + $0x64] sm:$0xe] }
 0x229   : > { %v10085_v27 = vcombine.low %v7150_v9, %v7160_v54  ;;  %v10151_v53 = vcombine.low %v7810_v50, %v7813_v11  ;;  %v7817_v21 = vrot.slane %v7815_v44, 4  ;;  %v10135_v29 = vrot.slane %v10119_v15, 9  ;;  %v12219_v45 = vld [vmem:[%s12471_s6 + $0x6c] sm:$0xf]  ;;  %v12221_v61 = vld [vmem:[%s12471_s6 + $0x60] sm:$0x1] }
 0x22a   : > { %v7824_v4 = vrot.slane %v7822_v8, 4  ;;  %v7825_v26 = vrot.slane %v12212_v56, 5  ;;  %v7816_v41 = vsel %vm12773_vm8, %v7814_v57, %v7815_v44  ;;  %v7828_v12 = vrot.slane %v12213_v62, 5  ;;  %v12088_v54 = vld [vmem:[%s12471_s6 + $0xd0] sm:$0xff]   ;;  %v10122_v44 = vld [vmem:[%s12471_s6 + $0x78] sm:$0xe] }
 0x22b   : > { %11060 = vmatmul.mubr.msk.bf16.gmra.mrb[20].mxu1 %vm1075_vm4, %v12080_v39  ;;  %11356 = vmatmul.mubr.msk.bf16.gmra.mrb[52].mxu0 %vm1075_vm4, %v10081_v48  ;;  %v7819_v24 = vsel %vm12773_vm8, %v7817_v21, %v7818_v22  ;;  %v7823_v39 = vsel %vm12773_vm8, %v10135_v29, %v7822_v8  ;;  %v7831_v18 = vrot.slane %v12215_v13, 5  ;;  %v7838_v42 = vrot.slane %v12216_v43, 5  ;;  %v12222_v50 = vld [vmem:[%s12471_s6 + $0x7c] sm:$0xf]  ;;  %v12223_v46 = vld [vmem:[%s12471_s6 + $0x80] sm:$0xf] }
 0x22c   : > { %11063 = vmatprep.mubr.msk.bf16.mxu1 %vm1075_vm4, %v12081_v32  ;;  %11359 = vmatprep.mubr.msk.bf16.mxu0 %vm1075_vm4, %v10082_v63  ;;  %v7826_v48 = vsel %vm12773_vm8, %v7824_v4, %v7825_v26  ;;  %v10120_v32 = vld [vmem:[%s12471_s6 + $0x50] sm:$0xe]  ;;  %v12214_v63 = vld [vmem:[%s12471_s6 + $0x54] sm:$0xf]  ;;  %v10152_v55 = vcombine.low %v7816_v41, %v7819_v24  ;;  %v7827_v51 = vrot.slane %v7825_v26, 4  ;;  %v7830_v20 = vrot.slane %v7828_v12, 4 }
 0x22d   : > { %v7835_v47 = vrot.slane %v12214_v63, 5  ;;  %v10153_v40 = vcombine.low %v7823_v39, %v7826_v48  ;;  %v10136_v1 = vrot.slane %v10120_v32, 9  ;;  %v7841_v35 = vrot.slane %v12217_v37, 5  ;;  %v12089_v15 = vld [vmem:[%s12471_s6 + $0xdc] sm:$0xff]   ;;  %v10123_v63 = vld [vmem:[%s12471_s6 + $0x8c] sm:$0xe] }
 0x22e   : > { %v7848_v36 = vrot.slane %v12218_v25, 5  ;;  %v7829_v38 = vsel %vm12773_vm8, %v7827_v51, %v7828_v12  ;;  %v7840_v28 = vrot.slane %v7838_v42, 4  ;;  %v7844_v14 = vrot.slane %v12221_v61, 5  ;;  %v12226_v12 = vld [vmem:[%s12471_s6 + $0x88] sm:$0x1] }
 0x22f   : > { %v7837_v59 = vrot.slane %v7835_v47, 4  ;;  %v7836_v17 = vsel %vm12773_vm8, %v10136_v1, %v7835_v47  ;;  %v7843_v16 = vrot.slane %v7841_v35, 4  ;;  %v10137_v34 = vrot.slane %v10121_v6, 9  ;;  %v12227_v47 = vld [vmem:[%s12471_s6 + $0x90] sm:$0xf] }
 0x230   : > { %v7850_v9 = vrot.slane %v7848_v36, 4  ;;  %v7861_v11 = vrot.slane %v12222_v50, 5  ;;  %v7864_v8 = vrot.slane %v12223_v46, 5  ;;  %v14611_v22 = vsel %vm12773_vm8, %v7840_v28, %v7841_v35  ;;  %v12229_v13 = vld [vmem:[%s12471_s6 + $0x98] sm:$0xf] }
 0x231   : > { %v7839_v7 = vsel %vm12773_vm8, %v7837_v59, %v7838_v42  ;;  %v14615_v29 = vsel %vm12773_vm8, %v7843_v16, %v7844_v14  ;;  %v14619_v4 = vsel %vm12773_vm8, %v10137_v34, %v7848_v36  ;;  %v10138_v26 = vrot.slane %v10122_v44, 9  ;;  %v10124_v42 = vld [vmem:[%s12471_s6 + $0xa0] sm:$0xe]  ;;  %v12231_v59 = vld [vmem:[%s12471_s6 + $0xa8] sm:$0xf] }
 0x232   : > { %v10155_v23 = vcombine.low %v7836_v17, %v7839_v7  ;;  %v7863_v24 = vrot.slane %v7861_v11, 4  ;;  %v7866_v62 = vrot.slane %v7864_v8, 4  ;;  %v7870_v39 = vrot.slane %v12226_v12, 5  ;;  %v12232_v35 = vld [vmem:[%s12471_s6 + $0xac] sm:$0xf]  ;;  %v12090_v36 = vld [vmem:[%s12471_s6 + $0xe4] sm:$0xff]  }
 0x233   : > { %11064 = vmatmul.mubr.msk.bf16.gmra.mrb[24].mxu1 %vm1075_vm4, %v12082_v2  ;;  %11360 = vmatmul.mubr.msk.bf16.gmra.mrb[56].mxu0 %vm1075_vm4, %v10083_v60  ;;  %v7851_v2 = vrot.slane %v12219_v45, 5  ;;  %v12220_v60 = vld [vmem:[%s12471_s6 + $0x70] sm:$0xf]  ;;  %v10156_v51 = vcombine.low %v14611_v22, %v14615_v29  ;;  %v14649_v43 = vsel %vm12773_vm8, %v10138_v26, %v7861_v11  ;;  %v7890_v37 = vrot.slane %v12231_v59, 5  ;;  %v12233_v61 = vld [vmem:[%s12471_s6 + $0xb8] sm:$0xf] }
 0x234   : > { %11067 = vmatprep.mubr.msk.bf16.mxu1 %vm1075_vm4, %v12083_v52  ;;  %11363 = vmatprep.mubr.msk.bf16.mxu0 %vm1075_vm4, %v10084_v30  ;;  %v7854_v52 = vrot.slane %v12220_v60, 5  ;;  %v7832_v30 = vsel %vm12773_vm8, %v7830_v20, %v7831_v18  ;;  %v7880_v18 = vrot.slane %v12229_v13, 5  ;;  %v7893_v25 = vrot.slane %v12232_v35, 5  ;;  %v9640_v60 = vld [vmem:[%s12471_s6 + $0xb4] sm:$0xf]  ;;  %v12093_v13 = vld [vmem:[%s12471_s6 + $0x104] sm:$0xff]  }
 0x235   : > { %v7853_v3 = vrot.slane %v7851_v2, 4  ;;  %v14623_v56 = vsel %vm12773_vm8, %v7850_v9, %v7851_v2  ;;  %v14659_v45 = vsel %vm12773_vm8, %v7863_v24, %v7864_v8  ;;  %v7900_v14 = vrot.slane %v12233_v61, 5  ;;  %v12234_v16 = vld [vmem:[%s12471_s6 + $0x9c] sm:$0x1]  ;;  %v12235_v8 = vld [vmem:[%s12471_s6 + $0xb0] sm:$0x1] }
 0x236   : > { %v10157_v1 = vcombine.low %v14619_v4, %v14623_v56  ;;  %v7882_v7 = vrot.slane %v7880_v18, 4  ;;  %v7883_v34 = vrot.slane %v12234_v16, 5  ;;  %v10140_v9 = vrot.slane %v10124_v42, 9  ;;  %v12238_v29 = vld [vmem:[%s12471_s6 + $0xc0] sm:$0xf] }
 0x237   : > { %v14628_v41 = vsel %vm12773_vm8, %v7853_v3, %v7854_v52  ;;  %v10125_v3 = vld [vmem:[%s12471_s6 + $0xb4] sm:$0xe]  ;;  %v7892_v44 = vrot.slane %v7890_v37, 4  ;;  %v7895_v50 = vrot.slane %v7893_v25, 4  ;;  %v3940_v11 = vshrl.u32 %v9640_v60, 16 }
 0x238   : > { %v3943_v46 = vshll.u32 %v9640_v60, 16  ;;  %v7902_v22 = vrot.slane %v7900_v14, 4  ;;  %v7906_v4 = vrot.slane %v12238_v29, 5  ;;  %v14696_v24 = vsel %vm12773_vm8, %v7882_v7, %v7883_v34  ;;  %v9645_v59 = vld [vmem:[%s12471_s6 + $0xc8] sm:$0xf] }
 0x239   : > { %v3984_v61 = vshrl.u32 %v9645_v59, 16  ;;  %v3987_v7 = vshll.u32 %v9645_v59, 16  ;;  %v12241_v16 = vld [vmem:[%s12471_s6 + $0xcc] sm:$0xf] }
 0x23a   : > { %v3993_v34 = vshll.u32 %v12241_v16, 16 }
 0x23b   : > { %11068 = vmatmul.mubr.msk.bf16.gmra.mrb[28].mxu1 %vm1075_vm4, %v12084_v5  ;;  %11364 = vmatmul.mubr.msk.bf16.gmra.mrb[60].mxu0 %vm1075_vm4, %v10085_v27  ;;  %v10154_v5 = vcombine.low %v7829_v38, %v7832_v30  ;;  %v7856_v27 = vrot.slane %v7854_v52, 4  ;;  %v10139_v38 = vrot.slane %v10123_v63, 9  ;;  %v12091_v52 = vld [vmem:[%s12471_s6 + $0xf0] sm:$0xff]   ;;  %v3945_v63 = vrot.slane %v3943_v46, 5 }
 0x23c   : > { %11071 = vmatprep.mubr.msk.bf16.mxu1 %vm1075_vm4, %v12085_v49  ;;  %11369 = vmatprep.mubr.msk.bf16.mxu0 %vm1075_vm4, %v10151_v53  ;;  %v12224_v49 = vld [vmem:[%s12471_s6 + $0x74] sm:$0x1]  ;;  %v12225_v53 = vld [vmem:[%s12471_s6 + $0x84] sm:$0xf]  ;;  %v3989_v29 = vrot.slane %v3987_v7, 5 }
 0x23d   : > { %v7857_v57 = vrot.slane %v12224_v49, 5  ;;  %v7867_v21 = vrot.slane %v12225_v53, 5  ;;  %v12237_v49 = vld [vmem:[%s12471_s6 + $0xb8] sm:$0xf]  ;;  %v12244_v46 = vld [vmem:[%s12471_s6 + $0xd4] sm:$0xf] }
 0x23e   : > { %v3953_v53 = vshrl.u32 %v12237_v49, 16 }
 0x23f   : > { %v14635_v48 = vsel %vm12773_vm8, %v7856_v27, %v7857_v57  ;;  %v7869_v32 = vrot.slane %v7867_v21, 4  ;;  %v14663_v2 = vsel %vm12773_vm8, %v7866_v62, %v7867_v21  ;;  %v3949_v57 = vshll.u32 %v12237_v49, 16 }
 0x240   : > { %v10158_v6 = vcombine.low %v14628_v41, %v14635_v48  ;;  %v12242_v41 = vld [vmem:[%s12471_s6 + $0xd0] sm:$0xf] }
 0x241   : > { %v14669_v30 = vsel %vm12773_vm8, %v7869_v32, %v7870_v39  ;;  %v14708_v39 = vsel %vm12773_vm8, %v7892_v44, %v7893_v25  ;;  %v3942_v32 = vrot.slane %v3940_v11, 4  ;;  %v7916_v48 = vrot.slane %v12242_v41, 5 }
 0x242   : > { %v10160_v35 = vcombine.low %v14663_v2, %v14669_v30 }
 0x243   : > { %11072 = vmatmul.mubr.msk.bf16.gmra.mrb[32].mxu1 %vm1075_vm4, %v12086_v0  ;;  %11370 = vmatmul.mubr.msk.bf16.vlgmr.msra.gmra.mrb[0].mxu0 %vm1075_vm4, %v10152_v55  ;;  %v7874_v0 = vrot.slane %v12227_v47, 5  ;;  %v12228_v55 = vld [vmem:[%s12471_s6 + $0x94] sm:$0xf]  ;;  %v12092_v47 = vld [vmem:[%s12471_s6 + $0xf8] sm:$0xff]  }
 0x244   : > { %11075 = vmatprep.mubr.msk.bf16.mxu1 %vm1075_vm4, %v12087_v19  ;;  %11373 = vmatprep.mubr.msk.bf16.mxu0 %vm1075_vm4, %v10153_v40  ;;  %v7877_v19 = vrot.slane %v12228_v55, 5  ;;  %v12230_v40 = vld [vmem:[%s12471_s6 + $0xa4] sm:$0xf] }
 0x245   : > { %v7887_v20 = vrot.slane %v12230_v40, 5  ;;  %v7876_v17 = vrot.slane %v7874_v0, 4  ;;  %v14682_v21 = vsel %vm12773_vm8, %v10139_v38, %v7874_v0 }
 0x246   : > { %v7879_v28 = vrot.slane %v7877_v19, 4 }
 0x247   : > { %v14688_v56 = vsel %vm12773_vm8, %v7876_v17, %v7877_v19  ;;  %v14700_v62 = vsel %vm12773_vm8, %v10140_v9, %v7887_v20  ;;  %v14715_v19 = vrot.slane %v3949_v57, 5  ;;  %v10126_v17 = vld [vmem:[%s12471_s6 + $0xc8] sm:$0xe]  ;;  %v3997_v9 = vshrl.u32 %v12241_v16, 16 }
 0x248   : > { %v14692_v26 = vsel %vm12773_vm8, %v7879_v28, %v7880_v18  ;;  %v10161_v25 = vcombine.low %v14682_v21, %v14688_v56  ;;  %v12240_v28 = vld [vmem:[%s12471_s6 + $0xcc] sm:$0xf]  ;;  %v12096_v56 = vld [vmem:[%s12471_s6 + $0x120] sm:$0xff]  }
 0x24b   : > { %11076 = vmatmul.mubr.msk.bf16.gmra.mrb[36].mxu1 %vm1075_vm4, %v12088_v54  ;;  %11374 = vmatmul.mubr.msk.bf16.gmra.mrb[4].mxu0 %vm1075_vm4, %v10154_v5  ;;  %v7889_v54 = vrot.slane %v7887_v20, 4  ;;  %v7896_v5 = vrot.slane %v12235_v8, 5  ;;  %v7908_v20 = vrot.slane %v7906_v4, 4  ;;  %v4013_v8 = vshll.u32 %v12244_v46, 16 }
 0x24c   : > { %11079 = vmatprep.mubr.msk.bf16.mxu1 %vm1075_vm4, %v12089_v15  ;;  %11377 = vmatprep.mubr.msk.bf16.mxu0 %vm1075_vm4, %v10155_v23  ;;  %v12236_v15 = vld [vmem:[%s12471_s6 + $0xbc] sm:$0xf]  ;;  %v10141_v23 = vrot.slane %v10125_v3, 9 }
 0x24d   : > { %v7903_v27 = vrot.slane %v12236_v15, 5  ;;  %v14704_v12 = vsel %vm12773_vm8, %v7889_v54, %v7890_v37  ;;  %v14713_v0 = vsel %vm12773_vm8, %v7895_v50, %v7896_v5  ;;  %v10159_v37 = vcombine.low %v14649_v43, %v14659_v45  ;;  %v12094_v15 = vld [vmem:[%s12471_s6 + $0x10c] sm:$0xff]  }
 0x24e   : > { %v14720_v18 = vsel %vm12773_vm8, %v10141_v23, %v7900_v14  ;;  %v10163_v38 = vcombine.low %v14700_v62, %v14704_v12  ;;  %v10164_v60 = vcombine.low %v14708_v39, %v14713_v0  ;;  %v7913_v43 = vrot.slane %v12240_v28, 5  ;;  %v12261_v0 = vld [vmem:[%s12471_s6 + $0xfc] sm:$0xf] }
 0x24f   : > { %v7905_v55 = vrot.slane %v7903_v27, 4  ;;  %v14724_v40 = vsel %vm12773_vm8, %v7902_v22, %v7903_v27  ;;  %v10142_v54 = vrot.slane %v10126_v17, 9  ;;  %v4017_v5 = vshrl.u32 %v12244_v46, 16  ;;  %v12095_v27 = vld [vmem:[%s12471_s6 + $0x118] sm:$0xff]  }
 0x250   : > { %v10165_v45 = vcombine.low %v14720_v18, %v14724_v40  ;;  %v7915_v11 = vrot.slane %v7913_v43, 4  ;;  %v3986_v22 = vrot.slane %v3984_v61, 4  ;;  %v12100_v40 = vld [vmem:[%s12471_s6 + $0x148] sm:$0xff]  }
 0x251   : > { %v14747_v2 = vsel %vm12773_vm8, %v7905_v55, %v7906_v4  ;;  %v14769_v4 = vrot.slane %v3993_v34, 5 }
 0x252   : > { %v14784_v59 = vsel %vm12773_vm8, %v7915_v11, %v7916_v48  ;;  %v3990_v7 = vor.u32 %v3989_v29, %v3986_v22 }
 0x253   : > { %11080 = vmatmul.mubr.msk.bf16.gmra.mrb[40].mxu1 %vm1075_vm4, %v12090_v36  ;;  %11378 = vmatmul.mubr.msk.bf16.gmra.mrb[8].mxu0 %vm1075_vm4, %v10156_v51  ;;  %v3955_v51 = vrot.slane %v3953_v53, 4  ;;  %v10162_v36 = vcombine.low %v14692_v26, %v14696_v24  ;;  %v12245_v53 = vld [vmem:[%s12471_s6 + $0xd4] sm:$0xf] }
 0x254   : > { %11083 = vmatprep.mubr.msk.bf16.mxu1 %vm1075_vm4, %v12091_v52  ;;  %11381 = vmatprep.mubr.msk.bf16.mxu0 %vm1075_vm4, %v10157_v1  ;;  %v12239_v1 = vld [vmem:[%s12471_s6 + $0xc4] sm:$0x1]  ;;  %v3946_v52 = vor.u32 %v3945_v63, %v3942_v32  ;;  %v7919_v23 = vrot.slane %v12245_v53, 5  ;;  %v3999_v32 = vrot.slane %v3997_v9, 4  ;;  %v10127_v63 = vld [vmem:[%s12471_s6 + $0xdc] sm:$0xe] }
 0x255   : > { %v7909_v42 = vrot.slane %v12239_v1, 5  ;;  %v3956_v30 = vor.u32 %v3955_v51, %v14715_v19  ;;  %v14775_v51 = vsel %vm12773_vm8, %v10142_v54, %v7913_v43  ;;  %v12247_v43 = vld [vmem:[%s12471_s6 + $0xd8] sm:$0x1]  ;;  %v10143_v61 = vrot.slane %v10127_v63, 9  ;;  %v12248_v9 = vld [vmem:[%s12471_s6 + $0xe4] sm:$0xf] }
 0x256   : > { %v3947_v50 = vrot.slane %v3946_v52, 4  ;;  %v4019_v52 = vrot.slane %v4017_v5, 4  ;;  %v7921_v28 = vrot.slane %v7919_v23, 4  ;;  %v4000_v16 = vor.u32 %v3999_v32, %v14769_v4 }
 0x257   : > { %v14757_v14 = vsel %vm12773_vm8, %v7908_v20, %v7909_v42  ;;  %v3957_v57 = vrot.slane %v3956_v30, 4  ;;  %v7922_v30 = vrot.slane %v12247_v43, 5  ;;  %v7929_v54 = vrot.slane %v12248_v9, 5  ;;  %v12253_v43 = vld [vmem:[%s12471_s6 + $0xe4] sm:$0xf] }
 0x258   : > { %v10166_v49 = vcombine.low %v14747_v2, %v14757_v14  ;;  %v3952_v42 = vsel %vm12500_vm5, %v3947_v50, %v14715_v19  ;;  %v9650_v19 = vld [vmem:[%s12471_s6 + $0xdc] sm:$0xf]  ;;  %v4001_v53 = vrot.slane %v4000_v16, 4  ;;  %v10128_v16 = vld [vmem:[%s12471_s6 + $0xf0] sm:$0xe] }
 0x259   : > { %v3962_v17 = vsel %vm12500_vm5, %v3957_v57, %v14377_v10  ;;  %v10167_v10 = vcombine.low %v14775_v51, %v14784_v59  ;;  %v4028_v11 = vshrl.u32 %v9650_v19, 16  ;;  %v4031_v21 = vshll.u32 %v9650_v19, 16 }
 0x25a   : > { %v14817_v46 = vsel %vm12773_vm8, %v7921_v28, %v7922_v30  ;;  %v3991_v57 = vrot.slane %v3990_v7, 4  ;;  %v7931_v63 = vrot.slane %v7929_v54, 4  ;;  %v4047_v30 = vshll.u32 %v12253_v43, 16 }
 0x25b   : > { %11084 = vmatmul.mubr.msk.bf16.gmra.mrb[44].mxu1 %vm1075_vm4, %v12092_v47  ;;  %11382 = vmatmul.mubr.msk.bf16.gmra.mrb[12].mxu0 %vm1075_vm4, %v10158_v6  ;;  %v12243_v6 = vld [vmem:[%s12471_s6 + $0xd0] sm:$0xf]  ;;  %v12246_v47 = vld [vmem:[%s12471_s6 + $0xe0] sm:$0xf] }
 0x25c   : > { %11087 = vmatprep.mubr.msk.bf16.mxu1 %vm1075_vm4, %v12093_v13  ;;  %11385 = vmatprep.mubr.msk.bf16.mxu0 %vm1075_vm4, %v10159_v37  ;;  %v4003_v3 = vshll.u32 %v12243_v6, 16  ;;  %v4007_v44 = vshrl.u32 %v12243_v6, 16  ;;  %v7926_v55 = vrot.slane %v12246_v47, 5  ;;  %v7918_v13 = vrot.slane %v7916_v48, 4  ;;  %v12249_v48 = vld [vmem:[%s12471_s6 + $0xd8] sm:$0x1] }
 0x25d   : > { %v14786_v37 = vrot.slane %v4013_v8, 5  ;;  %v4023_v6 = vshll.u32 %v12249_v48, 16  ;;  %v12251_v8 = vld [vmem:[%s12471_s6 + $0xe0] sm:$0xf]  ;;  %v12252_v47 = vld [vmem:[%s12471_s6 + $0xec] sm:$0x1]  ;;  %v3996_v7 = vsel %vm12500_vm5, %v3991_v57, %v14769_v4 }
 0x25e   : > { %v14777_v20 = vrot.slane %v4003_v3, 5  ;;  %v4009_v1 = vrot.slane %v4007_v44, 4  ;;  %v7928_v34 = vrot.slane %v7926_v55, 4  ;;  %v12250_v44 = vld [vmem:[%s12471_s6 + $0xe8] sm:$0xf]  ;;  %v4037_v5 = vshll.u32 %v12251_v8, 16 }
 0x25f   : > { %v4020_v3 = vor.u32 %v4019_v52, %v14786_v37  ;;  %v7932_v50 = vrot.slane %v12250_v44, 5  ;;  %v4025_v32 = vrot.slane %v4023_v6, 5  ;;  %v4030_v52 = vrot.slane %v4028_v11, 4  ;;  %v12098_v6 = vld [vmem:[%s12471_s6 + $0x134] sm:$0xff]   ;;  %v12099_v11 = vld [vmem:[%s12471_s6 + $0x140] sm:$0xff]  }
 0x260   : > { %v4010_v41 = vor.u32 %v4009_v1, %v14777_v20  ;;  %v14827_v22 = vsel %vm12773_vm8, %v7928_v34, %v7929_v54  ;;  %v14831_v28 = vrot.slane %v4037_v5, 5  ;;  %v12254_v34 = vld [vmem:[%s12471_s6 + $0xe8] sm:$0xf]  ;;  %v4006_v26 = vsel %vm12500_vm5, %v4001_v53, %v14777_v20  ;;  %v12255_v20 = vld [vmem:[%s12471_s6 + $0xf4] sm:$0xf] }
 0x261   : > { %v4021_v1 = vrot.slane %v4020_v3, 4  ;;  %v4057_v9 = vshll.u32 %v12254_v34, 16  ;;  %v4061_v54 = vshrl.u32 %v12254_v34, 16  ;;  %v14860_v4 = vsel %vm12773_vm8, %v7931_v63, %v7932_v50  ;;  %v12256_v53 = vld [vmem:[%s12471_s6 + $0xf8] sm:$0xf] }
 0x262   : > { %v4011_v29 = vrot.slane %v4010_v41, 4  ;;  %v9655_v41 = vld [vmem:[%s12471_s6 + $0xf0] sm:$0xf]  ;;  %v7939_v48 = vrot.slane %v12255_v20, 5  ;;  %v10144_v44 = vrot.slane %v10128_v16, 9 }
 0x263   : > { %11088 = vmatmul.mubr.msk.bf16.gmra.mrb[48].mxu1 %vm1075_vm4, %v12094_v15  ;;  %11386 = vmatmul.mubr.msk.bf16.gmra.mrb[16].mxu0 %vm1075_vm4, %v10160_v35  ;;  %v14806_v35 = vsel %vm12773_vm8, %v7918_v13, %v7919_v23  ;;  %v4041_v15 = vshrl.u32 %v12251_v8, 16  ;;  %v14823_v23 = vsel %vm12773_vm8, %v10143_v61, %v7926_v55  ;;  %v7935_v13 = vrot.slane %v12252_v47, 5  ;;  %v12257_v47 = vld [vmem:[%s12471_s6 + $0xf4] sm:$0xf] }
 0x264   : > { %11091 = vmatprep.mubr.msk.bf16.mxu1 %vm1075_vm4, %v12095_v27  ;;  %11389 = vmatprep.mubr.msk.bf16.mxu0 %vm1075_vm4, %v10161_v25  ;;  %v14813_v25 = vcombine.low %v3952_v42, %v3962_v17  ;;  %v12097_v27 = vld [vmem:[%s12471_s6 + $0x12c] sm:$0xff]   ;;  %v7934_v42 = vrot.slane %v7932_v50, 4  ;;  %v4033_v17 = vrot.slane %v4031_v21, 5  ;;  %v4051_v61 = vshrl.u32 %v12253_v43, 16 }
 0x265   : > { %v4043_v55 = vrot.slane %v4041_v15, 4  ;;  %v10168_v19 = vcombine.low %v14806_v35, %v14817_v46  ;;  %v10169_v24 = vcombine.low %v14823_v23, %v14827_v22  ;;  %v4026_v62 = vsel %vm12500_vm5, %v4021_v1, %v4025_v32  ;;  %v12271_v22 = vld [vmem:[%s12471_s6 + $0x11c] sm:$0xf] }
 0x266   : > { %v14867_v12 = vsel %vm12773_vm8, %v7934_v42, %v7935_v13  ;;  %v4053_v50 = vrot.slane %v4051_v61, 4  ;;  %v14875_v21 = vrot.slane %v4057_v9, 5  ;;  %v4072_v8 = vshrl.u32 %v9655_v41, 16  ;;  %v12259_v61 = vld [vmem:[%s12471_s6 + $0xfc] sm:$0xf] }
 0x267   : > { %v4044_v3 = vor.u32 %v4043_v55, %v14831_v28  ;;  %v4075_v5 = vshll.u32 %v9655_v41, 16  ;;  %v14877_v15 = vcombine.low %v3996_v7, %v4006_v26  ;;  %v10170_v57 = vcombine.low %v14860_v4, %v14867_v12  ;;  %v12258_v55 = vld [vmem:[%s12471_s6 + $0xec] sm:$0x1]  ;;  %v12260_v9 = vld [vmem:[%s12471_s6 + $0xf8] sm:$0xf] }
 0x268   : > { %v7941_v63 = vrot.slane %v7939_v48, 4  ;;  %v4081_v13 = vshll.u32 %v12257_v47, 16  ;;  %v4085_v1 = vshrl.u32 %v12257_v47, 16  ;;  %v4067_v43 = vshll.u32 %v12258_v55, 16 }
 0x269   : > { %v4045_v42 = vrot.slane %v4044_v3, 4  ;;  %v7945_v7 = vrot.slane %v12259_v61, 5  ;;  %v4074_v16 = vrot.slane %v4072_v8, 4  ;;  %v4077_v34 = vrot.slane %v4075_v5, 5 }
 0x26a   : > { %v4095_v39 = vshrl.u32 %v12260_v9, 16  ;;  %v4105_v26 = vshrl.u32 %v12261_v0, 16  ;;  %v4087_v18 = vrot.slane %v4085_v1, 4  ;;  %v4069_v20 = vrot.slane %v4067_v43, 5  ;;  %v12263_v1 = vld [vmem:[%s12471_s6 + $0x108] sm:$0xf] }
 0x26b   : > { %11092 = vmatmul.mubr.msk.bf16.gmra.mrb[52].mxu1 %vm1075_vm4, %v12096_v56  ;;  %11390 = vmatmul.mubr.msk.bf16.gmra.mrb[20].mxu0 %vm1075_vm4, %v10162_v36  ;;  %v4016_v36 = vsel %vm12500_vm5, %v4011_v29, %v14786_v37  ;;  %v14872_v37 = vrot.slane %v4047_v30, 5  ;;  %v4063_v56 = vrot.slane %v4061_v54, 4  ;;  %v7942_v29 = vrot.slane %v12256_v53, 5 }
 0x26c   : > { %11095 = vmatprep.mubr.msk.bf16.mxu1 %vm1075_vm4, %v12097_v27  ;;  %11393 = vmatprep.mubr.msk.bf16.mxu0 %vm1075_vm4, %v10163_v38  ;;  %v4034_v38 = vor.u32 %v4033_v17, %v4030_v52  ;;  %v14879_v27 = vcombine.low %v4016_v36, %v4026_v62  ;;  %v14888_v52 = vsel %vm12773_vm8, %v10144_v44, %v7939_v48  ;;  %v4091_v54 = vshll.u32 %v12260_v9, 16 }
 0x26d   : > { %v4054_v17 = vor.u32 %v4053_v50, %v14872_v37  ;;  %v4064_v30 = vor.u32 %v4063_v56, %v14875_v21  ;;  %v14910_v41 = vsel %vm12773_vm8, %v7941_v63, %v7942_v29  ;;  %v14912_v62 = vrot.slane %v4081_v13, 5 }
 0x26e   : > { %v4035_v32 = vrot.slane %v4034_v38, 4  ;;  %v7944_v48 = vrot.slane %v7942_v29, 4  ;;  %v7947_v44 = vrot.slane %v7945_v7, 4  ;;  %v14920_v56 = vrot.slane %v4091_v54, 5  ;;  %v12266_v54 = vld [vmem:[%s12471_s6 + $0x10c] sm:$0xf] }
 0x26f   : > { %v4055_v38 = vrot.slane %v4054_v17, 4  ;;  %v4065_v3 = vrot.slane %v4064_v30, 4  ;;  %v4097_v8 = vrot.slane %v4095_v39, 4  ;;  %v4107_v53 = vrot.slane %v4105_v26, 4  ;;  %v12264_v30 = vld [vmem:[%s12471_s6 + $0x108] sm:$0xf] }
 0x270   : > { %v4040_v36 = vsel %vm12500_vm5, %v4035_v32, %v14831_v28  ;;  %v12262_v28 = vld [vmem:[%s12471_s6 + $0x100] sm:$0x1]  ;;  %v4088_v29 = vor.u32 %v4087_v18, %v14912_v62  ;;  %v4129_v17 = vshrl.u32 %v12263_v1, 16  ;;  %v7952_v61 = vrot.slane %v12264_v30, 5 }
 0x271   : > { %v7948_v50 = vrot.slane %v12262_v28, 5  ;;  %v4060_v13 = vsel %vm12500_vm5, %v4055_v38, %v14875_v21  ;;  %v4070_v55 = vsel %vm12500_vm5, %v4065_v3, %v4069_v20  ;;  %v12265_v21 = vld [vmem:[%s12471_s6 + $0x100] sm:$0x1]  ;;  %v14950_v2 = vsel %vm12773_vm8, %v7944_v48, %v7945_v7  ;;  %v12267_v7 = vld [vmem:[%s12471_s6 + $0x110] sm:$0xf] }
 0x272   : > { %v4089_v9 = vrot.slane %v4088_v29, 4  ;;  %v7955_v39 = vrot.slane %v12266_v54, 5  ;;  %v4131_v26 = vrot.slane %v4129_v17, 4  ;;  %v12268_v48 = vld [vmem:[%s12471_s6 + $0x10c] sm:$0xf] }
 0x273   : > { %11096 = vmatmul.mubr.msk.bf16.gmra.mrb[56].mxu1 %vm1075_vm4, %v12098_v6  ;;  %11394 = vmatmul.mubr.msk.bf16.gmra.mrb[24].mxu0 %vm1075_vm4, %v10164_v60  ;;  %v4101_v60 = vshll.u32 %v12261_v0, 16  ;;  %v9660_v6 = vld [vmem:[%s12471_s6 + $0x104] sm:$0xf]  ;;  %v14954_v14 = vsel %vm12773_vm8, %v7947_v44, %v7948_v50  ;;  %v7958_v0 = vrot.slane %v12267_v7, 5  ;;  %v4139_v3 = vshrl.u32 %v12268_v48, 16 }
 0x274   : > { %11099 = vmatprep.mubr.msk.bf16.mxu1 %vm1075_vm4, %v12099_v11  ;;  %11397 = vmatprep.mubr.msk.bf16.mxu0 %vm1075_vm4, %v10165_v45  ;;  %v4050_v45 = vsel %vm12500_vm5, %v4045_v42, %v14872_v37  ;;  %v4078_v11 = vor.u32 %v4077_v34, %v4074_v16  ;;  %v10171_v37 = vcombine.low %v14888_v52, %v14910_v41  ;;  %v4116_v32 = vshrl.u32 %v9660_v6, 16  ;;  %v12269_v50 = vld [vmem:[%s12471_s6 + $0x114] sm:$0x1]  ;;  %v12270_v29 = vld [vmem:[%s12471_s6 + $0x110] sm:$0xf] }
 0x275   : > { %v14922_v5 = vrot.slane %v4101_v60, 5  ;;  %v4119_v63 = vshll.u32 %v9660_v6, 16  ;;  %v14928_v47 = vcombine.low %v4040_v36, %v4050_v45  ;;  %v4125_v42 = vshll.u32 %v12263_v1, 16  ;;  %v9665_v1 = vld [vmem:[%s12471_s6 + $0x118] sm:$0xf] }
 0x276   : > { %v4079_v43 = vrot.slane %v4078_v11, 4  ;;  %v4111_v16 = vshll.u32 %v12265_v21, 16  ;;  %v4118_v51 = vrot.slane %v4116_v32, 4  ;;  %v4135_v6 = vshll.u32 %v12268_v48, 16 }
 0x277   : > { %v4108_v34 = vor.u32 %v4107_v53, %v14922_v5  ;;  %v4121_v59 = vrot.slane %v4119_v63, 5  ;;  %v14963_v60 = vrot.slane %v4125_v42, 5  ;;  %v4094_v44 = vsel %vm12500_vm5, %v4089_v9, %v14920_v56 }
 0x278   : > { %v4084_v36 = vsel %vm12500_vm5, %v4079_v43, %v14912_v62  ;;  %v4113_v45 = vrot.slane %v4111_v16, 5  ;;  %v7957_v28 = vrot.slane %v7955_v39, 4  ;;  %v7961_v11 = vrot.slane %v12269_v50, 5  ;;  %v10130_v43 = vld [vmem:[%s12471_s6 + $0x118] sm:$0xe] }
 0x279   : > { %v4109_v20 = vrot.slane %v4108_v34, 4  ;;  %v7960_v62 = vrot.slane %v7958_v0, 4  ;;  %v4132_v53 = vor.u32 %v4131_v26, %v14963_v60  ;;  %v4145_v32 = vshll.u32 %v12270_v29, 16  ;;  %v12272_v34 = vld [vmem:[%s12471_s6 + $0x120] sm:$0xf] }
 0x27a   : > { %v4149_v63 = vshrl.u32 %v12270_v29, 16  ;;  %v15003_v42 = vcombine.low %v4084_v36, %v4094_v44  ;;  %v15007_v17 = vsel %vm12773_vm8, %v7957_v28, %v7958_v0  ;;  %v7968_v9 = vrot.slane %v12272_v34, 5 }
 0x27b   : > { %11100 = vmatmul.mubr.msk.bf16.gmra.mrb[60].mxu1 %vm1075_vm4, %v12100_v40  ;;  %11398 = vmatmul.mubr.msk.bf16.gmra.mrb[28].mxu0 %vm1075_vm4, %v10166_v49  ;;  %v10129_v49 = vld [vmem:[%s12471_s6 + $0x104] sm:$0xe]  ;;  %v7954_v40 = vrot.slane %v7952_v61, 4  ;;  %v4114_v46 = vsel %vm12500_vm5, %v4109_v20, %v4113_v45  ;;  %v15015_v30 = vrot.slane %v4145_v32, 5  ;;  %v10146_v26 = vrot.slane %v10130_v43, 9 }
 0x27c   : > { %11137 = vmatprep.mubr.msk.bf16.mxu1 %vm1075_vm4, %v14813_v25  ;;  %11401 = vmatprep.mubr.msk.bf16.mxu0 %vm1075_vm4, %v10167_v10  ;;  %v4098_v25 = vor.u32 %v4097_v8, %v14920_v56  ;;  %v14960_v10 = vcombine.low %v4060_v13, %v4070_v55  ;;  %v10145_v18 = vrot.slane %v10129_v49, 9  ;;  %v4122_v8 = vor.u32 %v4121_v59, %v4118_v51  ;;  %v12274_v45 = vld [vmem:[%s12471_s6 + $0x114] sm:$0x1]  ;;  %v12275_v20 = vld [vmem:[%s12471_s6 + $0x124] sm:$0xf] }
 0x27d   : > { %v10172_v56 = vcombine.low %v14950_v2, %v14954_v14  ;;  %v14991_v13 = vsel %vm12773_vm8, %v7954_v40, %v7955_v39  ;;  %v4133_v55 = vrot.slane %v4132_v53, 4  ;;  %v4160_v49 = vshrl.u32 %v9665_v1, 16  ;;  %v12273_v39 = vld [vmem:[%s12471_s6 + $0x11c] sm:$0xf]  ;;  %v12278_v53 = vld [vmem:[%s12471_s6 + $0x128] sm:$0x1] }
 0x27e   : > { %v4099_v38 = vrot.slane %v4098_v25, 4  ;;  %v4123_v23 = vrot.slane %v4122_v8, 4  ;;  %v4163_v25 = vshll.u32 %v9665_v1, 16  ;;  %v4169_v51 = vshll.u32 %v12273_v39, 16  ;;  %v9670_v32 = vld [vmem:[%s12471_s6 + $0x12c] sm:$0xf] }
 0x27f   : > { %v4173_v59 = vshrl.u32 %v12273_v39, 16  ;;  %v7971_v48 = vrot.slane %v12275_v20, 5  ;;  %v7970_v50 = vrot.slane %v7968_v9, 4  ;;  %v7974_v29 = vrot.slane %v12278_v53, 5 }
 0x280   : > { %v4104_v35 = vsel %vm12500_vm5, %v4099_v38, %v14922_v5  ;;  %v15012_v5 = vsel %vm12773_vm8, %v7960_v62, %v7961_v11  ;;  %v4128_v0 = vsel %vm12500_vm5, %v4123_v23, %v14963_v60  ;;  %v4155_v38 = vshll.u32 %v12274_v45, 16  ;;  %v12277_v11 = vld [vmem:[%s12471_s6 + $0x124] sm:$0xf] }
 0x281   : > { %v15019_v16 = vcombine.low %v4104_v35, %v4114_v46  ;;  %v10174_v7 = vcombine.low %v15007_v17, %v15012_v5  ;;  %v4162_v60 = vrot.slane %v4160_v49, 4  ;;  %v15046_v4 = vrot.slane %v4169_v51, 5  ;;  %v10132_v17 = vld [vmem:[%s12471_s6 + $0x140] sm:$0xe] }
 0x282   : > { %v4175_v12 = vrot.slane %v4173_v59, 4  ;;  %v4189_v8 = vshll.u32 %v12277_v11, 16  ;;  %v4193_v52 = vshrl.u32 %v12277_v11, 16  ;;  %v7973_v62 = vrot.slane %v7971_v48, 4  ;;  %v12281_v59 = vld [vmem:[%s12471_s6 + $0x134] sm:$0xf] }
 0x283   : > { %11138 = vmatmul.mubr.msk.bf16.vlgmr.msra.gmra.mrb[32].mxu1 %vm1075_vm4, %v14413_v31  ;;  %11402 = vmatmul.mubr.msk.bf16.gmra.mrb[32].mxu0 %vm1075_vm4, %v10168_v19  ;;  %v14987_v31 = vsel %vm12773_vm8, %v10145_v18, %v7952_v61  ;;  %v4137_v19 = vrot.slane %v4135_v6, 5  ;;  %v4151_v61 = vrot.slane %v4149_v63, 4  ;;  %v12276_v6 = vld [vmem:[%s12471_s6 + $0x120] sm:$0xf]  ;;  %v15069_v23 = vsel %vm12773_vm8, %v7970_v50, %v7971_v48 }
 0x284   : > { %11141 = vmatprep.mubr.msk.bf16.mxu1 %vm1075_vm4, %v14877_v15  ;;  %11405 = vmatprep.mubr.msk.bf16.mxu0 %vm1075_vm4, %v10169_v24  ;;  %v4141_v15 = vrot.slane %v4139_v3, 4  ;;  %v7965_v24 = vrot.slane %v12271_v22, 5  ;;  %v10173_v21 = vcombine.low %v14987_v31, %v14991_v13  ;;  %v4179_v3 = vshll.u32 %v12276_v6, 16 }
 0x285   : > { %v4138_v18 = vsel %vm12500_vm5, %v4133_v55, %v4137_v19  ;;  %v4152_v40 = vor.u32 %v4151_v61, %v15015_v30  ;;  %v4183_v44 = vshrl.u32 %v12276_v6, 16  ;;  %v4176_v22 = vor.u32 %v4175_v12, %v15046_v4  ;;  %v12284_v12 = vld [vmem:[%s12471_s6 + $0x13c] sm:$0x1] }
 0x286   : > { %v4142_v54 = vor.u32 %v4141_v15, %v4137_v19  ;;  %v7967_v36 = vrot.slane %v7965_v24, 4  ;;  %v15057_v41 = vcombine.low %v4128_v0, %v4138_v18  ;;  %v15061_v46 = vrot.slane %v4179_v3, 5  ;;  %v10131_v19 = vld [vmem:[%s12471_s6 + $0x12c] sm:$0xe] }
 0x287   : > { %v4153_v63 = vrot.slane %v4152_v40, 4  ;;  %v4185_v15 = vrot.slane %v4183_v44, 4  ;;  %v15073_v43 = vrot.slane %v4189_v8, 5  ;;  %v4195_v61 = vrot.slane %v4193_v52, 4  ;;  %v12283_v40 = vld [vmem:[%s12471_s6 + $0x138] sm:$0xf] }
 0x288   : > { %v4143_v28 = vrot.slane %v4142_v54, 4  ;;  %v4204_v49 = vshrl.u32 %v9670_v32, 16  ;;  %v10147_v34 = vrot.slane %v10131_v19, 9  ;;  %v7981_v0 = vrot.slane %v12281_v59, 5  ;;  %v12285_v8 = vld [vmem:[%s12471_s6 + $0x134] sm:$0xf] }
 0x289   : > { %v4177_v14 = vrot.slane %v4176_v22, 4  ;;  %v4196_v18 = vor.u32 %v4195_v61, %v15073_v43  ;;  %v7984_v45 = vrot.slane %v12283_v40, 5  ;;  %v4223_v52 = vshll.u32 %v12285_v8, 16  ;;  %v12287_v19 = vld [vmem:[%s12471_s6 + $0x144] sm:$0xf] }
 0x28a   : > { %v4148_v1 = vsel %vm12500_vm5, %v4143_v28, %v15015_v30  ;;  %v15079_v30 = vsel %vm12773_vm8, %v7973_v62, %v7974_v29  ;;  %v7983_v3 = vrot.slane %v7981_v0, 4  ;;  %v4227_v53 = vshrl.u32 %v12285_v8, 16  ;;  %v12286_v29 = vld [vmem:[%s12471_s6 + $0x138] sm:$0xf] }
 0x28b   : > { %11142 = vmatmul.mubr.msk.bf16.gmra.mrb[36].mxu1 %vm1075_vm4, %v14879_v27  ;;  %11406 = vmatmul.mubr.msk.bf16.gmra.mrb[36].mxu0 %vm1075_vm4, %v10170_v57  ;;  %v4165_v27 = vrot.slane %v4163_v25, 5  ;;  %v15050_v57 = vsel %vm12773_vm8, %v10146_v26, %v7965_v24  ;;  %v12279_v24 = vld [vmem:[%s12471_s6 + $0x130] sm:$0xf]  ;;  %v4207_v25 = vshll.u32 %v9670_v32, 16  ;;  %v4186_v26 = vor.u32 %v4185_v15, %v15061_v46 }
 0x28c   : > { %11145 = vmatprep.mubr.msk.bf16.mxu1 %vm1075_vm4, %v14928_v47  ;;  %11409 = vmatprep.mubr.msk.bf16.mxu0 %vm1075_vm4, %v10171_v37  ;;  %v15054_v47 = vsel %vm12773_vm8, %v7967_v36, %v7968_v9  ;;  %v4157_v37 = vrot.slane %v4155_v38, 5  ;;  %v7978_v55 = vrot.slane %v12279_v24, 5  ;;  %v12280_v9 = vld [vmem:[%s12471_s6 + $0x130] sm:$0xf]  ;;  %v4206_v38 = vrot.slane %v4204_v49, 4 }
 0x28d   : > { %v4166_v35 = vor.u32 %v4165_v27, %v4162_v60  ;;  %v4213_v54 = vshll.u32 %v12280_v9, 16  ;;  %v4217_v39 = vshrl.u32 %v12280_v9, 16  ;;  %v10175_v2 = vcombine.low %v15050_v57, %v15054_v47 }
 0x28e   : > { %v4209_v20 = vrot.slane %v4207_v25, 5  ;;  %v10176_v31 = vcombine.low %v15069_v23, %v15079_v30  ;;  %v15113_v27 = vsel %vm12773_vm8, %v10147_v34, %v7978_v55  ;;  %v4187_v6 = vrot.slane %v4186_v26, 4 }
 0x28f   : > { %v15090_v51 = vrot.slane %v4166_v35, 4  ;;  %v15105_v13 = vrot.slane %v4213_v54, 5  ;;  %v4182_v44 = vsel %vm12500_vm5, %v4177_v14, %v15061_v46  ;;  %v7987_v57 = vrot.slane %v12284_v12, 5 }
 0x290   : > { %v4197_v47 = vrot.slane %v4196_v18, 4  ;;  %v4210_v11 = vor.u32 %v4209_v20, %v4206_v38  ;;  %v4233_v32 = vshll.u32 %v12286_v29, 16  ;;  %v15142_v46 = vsel %vm12773_vm8, %v7983_v3, %v7984_v45  ;;  %v12290_v18 = vld [vmem:[%s12471_s6 + $0x13c] sm:$0x1] }
 0x291   : > { %v4172_v60 = vsel %vm12500_vm5, %v15090_v51, %v15046_v4  ;;  %v7986_v4 = vrot.slane %v7984_v45, 4  ;;  %v7991_v15 = vrot.slane %v12287_v19, 5  ;;  %v4225_v61 = vrot.slane %v4223_v52, 5  ;;  %v12289_v51 = vld [vmem:[%s12471_s6 + $0x148] sm:$0xf] }
 0x292   : > { %v4229_v25 = vrot.slane %v4227_v53, 4  ;;  %v15154_v34 = vrot.slane %v4233_v32, 5  ;;  %v9707_v54 = vcombine.low %v4172_v60, %v4182_v44  ;;  %v7994_v59 = vrot.slane %v12289_v51, 5  ;;  %v10133_v53 = vld [vmem:[%s12471_s6 + $0x154] sm:$0xe] }
 0x293   : > { %11146 = vmatmul.mubr.msk.bf16.gmra.mrb[40].mxu1 %vm1075_vm4, %v14960_v10  ;;  %11410 = vmatmul.mubr.msk.bf16.gmra.mrb[40].mxu0 %vm1075_vm4, %v10172_v56  ;;  %v4158_v10 = vsel %vm12500_vm5, %v4153_v63, %v4157_v37  ;;  %v7980_v56 = vrot.slane %v7978_v55, 4  ;;  %v9675_v37 = vld [vmem:[%s12471_s6 + $0x140] sm:$0xf]  ;;  %v4237_v63 = vshrl.u32 %v12286_v29, 16  ;;  %v15152_v55 = vsel %vm12773_vm8, %v7986_v4, %v7987_v57 }
 0x294   : > { %11149 = vmatprep.mubr.msk.bf16.mxu1 %vm1075_vm4, %v15003_v42  ;;  %11413 = vmatprep.mubr.msk.bf16.mxu0 %vm1075_vm4, %v10173_v21  ;;  %v12282_v42 = vld [vmem:[%s12471_s6 + $0x128] sm:$0x1]  ;;  %v9706_v48 = vcombine.low %v4148_v1, %v4158_v10  ;;  %v4219_v21 = vrot.slane %v4217_v39, 4  ;;  %v4248_v5 = vshrl.u32 %v9675_v37, 16  ;;  %v10148_v39 = vrot.slane %v10132_v17, 9 }
 0x295   : > { %v4199_v36 = vshll.u32 %v12282_v42, 16  ;;  %v15120_v28 = vsel %vm12773_vm8, %v7980_v56, %v7981_v0  ;;  %v4239_v9 = vrot.slane %v4237_v63, 4  ;;  %v7993_v10 = vrot.slane %v7991_v15, 4 }
 0x296   : > { %v4220_v62 = vor.u32 %v4219_v21, %v15105_v13  ;;  %v10177_v35 = vcombine.low %v15113_v27, %v15120_v28  ;;  %v4250_v0 = vrot.slane %v4248_v5, 4  ;;  %v10178_v42 = vcombine.low %v15142_v46, %v15152_v55  ;;  %v12291_v21 = vld [vmem:[%s12471_s6 + $0x14c] sm:$0xf]  ;;  %v12296_v5 = vld [vmem:[%s12471_s6 + $0x15c] sm:$0xf] }
 0x297   : > { %v4201_v50 = vrot.slane %v4199_v36, 5  ;;  %v4243_v40 = vshll.u32 %v12290_v18, 16  ;;  %v4230_v38 = vor.u32 %v4229_v25, %v4225_v61  ;;  %v4240_v20 = vor.u32 %v4239_v9, %v15154_v34  ;;  %v12298_v9 = vld [vmem:[%s12471_s6 + $0x160] sm:$0xf]  ;;  %v12299_v18 = vld [vmem:[%s12471_s6 + $0x164] sm:$0x1] }
 0x298   : > { %v4221_v49 = vrot.slane %v4220_v62, 4  ;;  %v7997_v60 = vrot.slane %v12291_v21, 5  ;;  %v7992_v28 = vsel %vm12773_vm8, %v10148_v39, %v7991_v15  ;;  %v7995_v23 = vsel %vm12773_vm8, %v7993_v10, %v7994_v59 }
 0x299   : > { %v4202_v24 = vsel %vm12500_vm5, %v4197_v47, %v4201_v50  ;;  %v4245_v12 = vrot.slane %v4243_v40, 5  ;;  %v7996_v57 = vrot.slane %v7994_v59, 4  ;;  %v12294_v47 = vld [vmem:[%s12471_s6 + $0x158] sm:$0xf]  ;;  %v4241_v8 = vrot.slane %v4240_v20, 4 }
 0x29a   : > { %v4226_v45 = vsel %vm12500_vm5, %v4221_v49, %v4225_v61  ;;  %v8004_v4 = vrot.slane %v12294_v47, 5  ;;  %v7999_v52 = vrot.slane %v7997_v60, 4  ;;  %v10149_v15 = vrot.slane %v10133_v53, 9  ;;  %v12297_v61 = vld [vmem:[%s12471_s6 + $0x150] sm:$0x1] }
 0x29b   : > { %11150 = vmatmul.mubr.msk.bf16.gmra.mrb[44].mxu1 %vm1075_vm4, %v15019_v16  ;;  %11414 = vmatmul.mubr.msk.bf16.gmra.mrb[44].mxu0 %vm1075_vm4, %v10174_v7  ;;  %v4192_v16 = vsel %vm12500_vm5, %v4187_v6, %v15073_v43  ;;  %v4251_v7 = vshll.u32 %v9675_v37, 16  ;;  %v4211_v43 = vrot.slane %v4210_v11, 4  ;;  %v4231_v11 = vrot.slane %v4230_v38, 4  ;;  %v12295_v37 = vld [vmem:[%s12471_s6 + $0x150] sm:$0x1] }
 0x29c   : > { %11153 = vmatprep.mubr.msk.bf16.mxu1 %vm1075_vm4, %v15057_v41  ;;  %11417 = vmatprep.mubr.msk.bf16.mxu0 %vm1075_vm4, %v10175_v2  ;;  %v12288_v41 = vld [vmem:[%s12471_s6 + $0x144] sm:$0xf]  ;;  %v9708_v56 = vcombine.low %v4192_v16, %v4202_v24  ;;  %v8000_v62 = vrot.slane %v12295_v37, 5  ;;  %v10179_v16 = vcombine.low %v7992_v28, %v7995_v23  ;;  %v8006_v17 = vrot.slane %v8004_v4, 4 }
 0x29d   : > { %v4257_v1 = vshll.u32 %v12288_v41, 16  ;;  %v4261_v22 = vshrl.u32 %v12288_v41, 16  ;;  %v4253_v26 = vrot.slane %v4251_v7, 5  ;;  %v4216_v36 = vsel %vm12500_vm5, %v4211_v43, %v15105_v13  ;;  %v12292_v13 = vld [vmem:[%s12471_s6 + $0x148] sm:$0xf] }
 0x29e   : > { %v4267_v27 = vshll.u32 %v12292_v13, 16  ;;  %v4271_v6 = vshrl.u32 %v12292_v13, 16  ;;  %v9709_v50 = vcombine.low %v4216_v36, %v4226_v45  ;;  %v8007_v7 = vrot.slane %v12296_v5, 5 }
 0x29f   : > { %v15157_v2 = vrot.slane %v4257_v1, 5  ;;  %v4263_v14 = vrot.slane %v4261_v22, 4  ;;  %v4254_v30 = vor.u32 %v4253_v26, %v4250_v0  ;;  %v4236_v41 = vsel %vm12500_vm5, %v4231_v11, %v15154_v34 }
 0x2a0   : > { %v4269_v29 = vrot.slane %v4267_v27, 5  ;;  %v4273_v32 = vrot.slane %v4271_v6, 4  ;;  %v4246_v1 = vsel %vm12500_vm5, %v4241_v8, %v4245_v12  ;;  %v7998_v22 = vsel %vm12773_vm8, %v7996_v57, %v7997_v60 }
 0x2a1   : > { %v4255_v46 = vrot.slane %v4254_v30, 4  ;;  %v8001_v24 = vsel %vm12773_vm8, %v7999_v52, %v8000_v62  ;;  %v4287_v49 = vshll.u32 %v12297_v61, 16  ;;  %v8005_v39 = vsel %vm12773_vm8, %v10149_v15, %v8004_v4 }
 0x2a2   : > { %v4274_v55 = vor.u32 %v4273_v32, %v4269_v29  ;;  %v8008_v10 = vsel %vm12773_vm8, %v8006_v17, %v8007_v7  ;;  %v9710_v51 = vcombine.low %v4236_v41, %v4246_v1  ;;  %v10180_v59 = vcombine.low %v7998_v22, %v8001_v24  ;;  %v15279_v41 = vld [vmem:[%s15466_s2] ss:$0 sm:$0xff] }
 0x2a3   : > { %11154 = vmatmul.mubr.msk.bf16.gmra.mrb[48].mxu1 %vm1075_vm4, %v9706_v48  ;;  %11418 = vmatmul.mubr.msk.bf16.gmra.mrb[48].mxu0 %vm1075_vm4, %v10176_v31  ;;  %v12293_v48 = vld [vmem:[%s12471_s6 + $0x14c] sm:$0xf]  ;;  %v4264_v31 = vor.u32 %v4263_v14, %v15157_v2  ;;  %v4260_v25 = vsel %vm12500_vm5, %v4255_v46, %v15157_v2  ;;  %v8009_v36 = vrot.slane %v8007_v7, 4  ;;  %v8013_v40 = vrot.slane %v12299_v18, 5  ;;  %s175_s6 = sand.u32 1, %s12362_s13  }
 0x2a4   : > { %11157 = vmatprep.mubr.msk.bf16.mxu1 %vm1075_vm4, %v9707_v54  ;;  %v4277_v3 = vshll.u32 %v12293_v48, 16  ;;  %v4281_v44 = vshrl.u32 %v12293_v48, 16  ;;  %11421 = vmatprep.mubr.msk.bf16.mxu0 %vm1075_vm4, %v10177_v35  ;;  %v8010_v54 = vrot.slane %v12298_v9, 5  ;;  %v4275_v26 = vrot.slane %v4274_v55, 4  ;;  %s9255_s7 = sshll.u32 %s175_s6, 8  ;;  %s15418_s15 = scalar_lea.sflag [#allocation3], %s175_s6 }
 0x2a5   : > { %v4265_v19 = vrot.slane %v4264_v31, 4  ;;  %s15289_s8 = scalar_lea.vmem [#allocation2], %s9255_s7 }
 0x2a6   : > { %v4279_v63 = vrot.slane %v4277_v3, 5  ;;  %v4283_v35 = vrot.slane %v4281_v44, 4  ;;  %v8012_v2 = vrot.slane %v8010_v54, 4  ;;  %v8011_v20 = vsel %vm12773_vm8, %v8009_v36, %v8010_v54  ;;  %s9164_s10 = sshll.u32 %s15289_s8, 4  ;;  %s15412_s10 = int_to_ptr.vmem [resolvable:$true] %s9164_s10 }
 0x2a7   : > { %v4270_v34 = vsel %vm12500_vm5, %v4265_v19, %v4269_v29  ;;  %s12300_s21 = scalar_lea.vmem %s15412_s10, 4096  ;;  %p12307_p0 = scmp.lt.s32.totalorder %s15412_s10, %s12305_s26 }
 0x2a8   : > { %v4284_v43 = vor.u32 %v4283_v35, %v4279_v63  ;;  %v9711_v0 = vcombine.low %v4260_v25, %v4270_v34  ;;  %v4280_v45 = vsel %vm12500_vm5, %v4275_v26, %v4279_v63  ;;  %v8014_v21 = vsel %vm12773_vm8, %v8012_v2, %v8013_v40  ;;  %p12301_p11 = scmp.ne.s32.totalorder %s15412_s10, %s12300_s21  ;;  %p12308_p1 = scmp.lt.s32.totalorder %s12306_s27, %s12300_s21 }
 0x2a9   : > { %v10182_v13 = vcombine.low %v8011_v20, %v8014_v21 }
 0x2aa   : > { %v4285_v14 = vrot.slane %v4284_v43, 4  ;;  %p12302_p12 = pnand %p12301_p11, %p12444_p4  ;;  %p12309_p2 = por %p12308_p1, %p12307_p0 }
 0x2ab   : > { %11158 = vmatmul.mubr.msk.bf16.gmra.mrb[52].mxu1 %vm1075_vm4, %v9708_v56  ;;  %11422 = vmatmul.mubr.msk.bf16.gmra.mrb[52].mxu0 %vm1075_vm4, %v10178_v42  ;;  %v4289_v56 = vrot.slane %v4287_v49, 5  ;;  %v10181_v42 = vcombine.low %v8005_v39, %v8008_v10 }
 0x2ac   : > { %11161 = vmatprep.mubr.msk.bf16.mxu1 %vm1075_vm4, %v9709_v50  ;;  %11425 = vmatprep.mubr.msk.bf16.mxu0 %vm1075_vm4, %v10179_v16  ;;  %p12303_p13 = pneg %p12302_p12 }
 0x2ad   : > { %v4290_v38 = vsel %vm12500_vm5, %v4285_v14, %v4289_v56 }
 0x2ae   : > { %v9712_v60 = vcombine.low %v4280_v45, %v4290_v38  ;;  %p12310_p3 = pnand %p12309_p2, %p12303_p13 }
 0x2b3   : > { %11162 = vmatmul.mubr.msk.bf16.gmra.mrb[56].mxu1 %vm1075_vm4, %v9710_v51  ;;  %11426 = vmatmul.mubr.msk.bf16.gmra.mrb[56].mxu0 %vm1075_vm4, %v10180_v59 }
 0x2b4   : > { %11165 = vmatprep.mubr.msk.bf16.mxu1 %vm1075_vm4, %v9711_v0  ;;  %11429 = vmatprep.mubr.msk.bf16.mxu0 %vm1075_vm4, %v10181_v42 }
 0x2bb   : > { %11166 = vmatmul.mubr.msk.bf16.gmra.mrb[60].mxu1 %vm1075_vm4, %v9712_v60  ;;  %11430 = vmatmul.mubr.msk.bf16.gmra.mrb[60].mxu0 %vm1075_vm4, %v10182_v13 }
 0x2d6   : > { %v11041_v27 = vpop.f32.mrb[0].mxu1 }
 0x2d7   : > { %v3188_v6 = vpop.f32.mrb[1].mxu1 }
 0x2d8   : > { %v11042_v48 = vpop.f32.mrb[2].mxu1 }
 0x2d9   : > { %v3191_v3 = vpop.f32.mrb[3].mxu1 }
 0x2de   : > { %v11045_v33 = vpop.f32.mrb[4].mxu1 }
 0x2df   : > { %v3204_v44 = vpop.f32.mrb[5].mxu1 }
 0x2e0   : > { %v11046_v28 = vpop.f32.mrb[6].mxu1 }
 0x2e1   : > { %v15226_v23 = vpop.f32.mrb[7].mxu1 }
 0x2e6   : > { %v15228_v30 = vpop.f32.mrb[8].mxu1 }
 0x2e7   : > { %v15230_v31 = vpop.f32.mrb[9].mxu1 }
 0x2e8   : > { %v15232_v58 = vpop.f32.mrb[10].mxu1 }
 0x2e9   : > { %v15234_v50 = vpop.f32.mrb[11].mxu1 }
 0x2ee   : > { %v15236_v12 = vpop.f32.mrb[12].mxu1 }
 0x2ef   : > { %v15238_v57 = vpop.f32.mrb[13].mxu1 }
 0x2f0   : > { %v15240_v47 = vpop.f32.mrb[14].mxu1 }
 0x2f1   : > { %v15242_v4 = vpop.f32.mrb[15].mxu1 }
 0x2f6   : > { %v15244_v11 = vpop.f32.mrb[16].mxu1 }
 0x2f7   : > { %v15246_v8 = vpop.f32.mrb[17].mxu1 }
 0x2f8   : > { %v15248_v52 = vpop.f32.mrb[18].mxu1 }
 0x2f9   : > { %v15250_v37 = vpop.f32.mrb[19].mxu1 }
 0x2fe   : > { %v15252_v62 = vpop.f32.mrb[20].mxu1 }
 0x2ff   : > { %v15254_v53 = vpop.f32.mrb[21].mxu1 }
 0x300   : > { %v15256_v29 = vpop.f32.mrb[22].mxu1 }
 0x301   : > { %v15258_v32 = vpop.f32.mrb[23].mxu1 }
 0x306   : > { %v15260_v63 = vpop.f32.mrb[24].mxu1 }
 0x307   : > { %v15262_v35 = vpop.f32.mrb[25].mxu1 }
 0x308   : > { %v15264_v16 = vpop.f32.mrb[26].mxu1 }
 0x309   : > { %v15266_v46 = vpop.f32.mrb[27].mxu1 }
 0x30e   : > { %v15268_v19 = vpop.f32.mrb[28].mxu1 }
 0x30f   : > { %v15270_v15 = vpop.f32.mrb[29].mxu1 }
 0x310   : > { %v15272_v17 = vpop.f32.mrb[30].mxu1 }
 0x311   : > { %v15274_v5 = vpop.f32.mrb[31].mxu1 }
 0x316   : > { %v11371_v7 = vpop.f32.mrb[0].mxu0 }
 0x317   : > { %v11435_v1 = vadd.f32 %v11371_v7, %v11041_v27  ;;  %v8246_v22 = vpop.f32.mrb[1].mxu0 }
 0x318   : > { %v11436_v24 = vadd.f32 %v8246_v22, %v3188_v6  ;;  %v11372_v55 = vpop.f32.mrb[2].mxu0 }
 0x319   : > { %v8574_v43 = vadd.f32 %v11435_v1, %v15279_v41  ;;  %v11437_v61 = vadd.f32 %v11372_v55, %v11042_v48  ;;  %v8249_v49 = vpop.f32.mrb[3].mxu0 }
 0x31a   : > { %v8572_v25 = vadd.f32 %v11436_v24, %v15279_v41  ;;  %v11438_v34 = vadd.f32 %v8249_v49, %v3191_v3 }
 0x31b   : > { %v8702_v9 = vmul.f32 0.2, %v8574_v43  ;;  %v8575_v54 = vadd.f32 %v11437_v61, %v15279_v41  ;;  %vm8638_vm9 = vcmp.ge.f32.partialorder %v8574_v43, 0.0 }
 0x31c   : > { %v8700_v39 = vmul.f32 0.2, %v8572_v25  ;;  %v8573_v10 = vadd.f32 %v11438_v34, %v15279_v41  ;;  %vm8636_vm10 = vcmp.ge.f32.partialorder %v8572_v25, 0.0 }
 0x31d   : > { %vm8639_vm11 = vcmp.ge.f32.partialorder %v8575_v54, 0.0  ;;  %v8703_v51 = vmul.f32 0.2, %v8575_v54  ;;  %v8766_v26 = vsel %vm8638_vm9, %v8574_v43, %v8702_v9 }
 0x31e   : > { %vm8637_vm12 = vcmp.ge.f32.partialorder %v8573_v10, 0.0  ;;  %v8701_v59 = vmul.f32 0.2, %v8573_v10  ;;  %v11375_v0 = vpop.f32.mrb[4].mxu0  ;;  %v8764_v36 = vsel %vm8636_vm10, %v8572_v25, %v8700_v39 }
 0x31f   : > { %v8767_v14 = vsel %vm8639_vm11, %v8575_v54, %v8703_v51  ;;  %v11439_v56 = vadd.f32 %v11375_v0, %v11045_v33  ;;  %v8262_v42 = vpop.f32.mrb[5].mxu0 }
 0x320   : > { %v10359_v2 = vpack.c.bf16 %v8767_v14, %v8766_v26  ;;  %v8765_v18 = vsel %vm8637_vm12, %v8573_v10, %v8701_v59  ;;  %v11440_v40 = vadd.f32 %v8262_v42, %v3204_v44  ;;  %v11376_v45 = vpop.f32.mrb[6].mxu0 }
 0x321   : > { %v10354_v38 = vpack.c.bf16 %v8765_v18, %v8764_v36  ;;  %v8578_v20 = vadd.f32 %v11439_v56, %v15279_v41  ;;  %v11441_v21 = vadd.f32 %v11376_v45, %v11046_v28  ;;  %v8265_v60 = vpop.f32.mrb[7].mxu0 }
 0x322   : > { %10511 = vst [vmem:[%s15289_s8 + $0x8] sm:$0xff] %v10359_v2   ;;  %v8576_v13 = vadd.f32 %v11440_v40, %v15279_v41  ;;  %v11442_v27 = vadd.f32 %v8265_v60, %v15226_v23 }
 0x323   : > { %10355 = vst [vmem:[%s15289_s8] sm:$0xff] %v10354_v38   ;;  %v8706_v6 = vmul.f32 0.2, %v8578_v20  ;;  %v8579_v48 = vadd.f32 %v11441_v21, %v15279_v41  ;;  %vm8642_vm13 = vcmp.ge.f32.partialorder %v8578_v20, 0.0 }
 0x324   : > { %v8704_v3 = vmul.f32 0.2, %v8576_v13  ;;  %v8577_v33 = vadd.f32 %v11442_v27, %v15279_v41  ;;  %vm8640_vm14 = vcmp.ge.f32.partialorder %v8576_v13, 0.0 }
 0x325   : > { %vm8643_vm15 = vcmp.ge.f32.partialorder %v8579_v48, 0.0  ;;  %v8707_v44 = vmul.f32 0.2, %v8579_v48  ;;  %v8770_v1 = vsel %vm8642_vm13, %v8578_v20, %v8706_v6 }
 0x326   : > { %vm8641_vm0 = vcmp.ge.f32.partialorder %v8577_v33, 0.0  ;;  %v8705_v28 = vmul.f32 0.2, %v8577_v33  ;;  %v11379_v7 = vpop.f32.mrb[8].mxu0  ;;  %v8768_v55 = vsel %vm8640_vm14, %v8576_v13, %v8704_v3 }
 0x327   : > { %v8771_v22 = vsel %vm8643_vm15, %v8579_v48, %v8707_v44  ;;  %v11443_v23 = vadd.f32 %v11379_v7, %v15228_v30  ;;  %v8278_v24 = vpop.f32.mrb[9].mxu0 }
 0x328   : > { %v10369_v43 = vpack.c.bf16 %v8771_v22, %v8770_v1  ;;  %v8769_v61 = vsel %vm8641_vm0, %v8577_v33, %v8705_v28  ;;  %v11444_v49 = vadd.f32 %v8278_v24, %v15230_v31  ;;  %v11380_v25 = vpop.f32.mrb[10].mxu0 }
 0x329   : > { %v10364_v34 = vpack.c.bf16 %v8769_v61, %v8768_v55  ;;  %v8582_v9 = vadd.f32 %v11443_v23, %v15279_v41  ;;  %v11445_v54 = vadd.f32 %v11380_v25, %v15232_v58  ;;  %v8281_v39 = vpop.f32.mrb[11].mxu0 }
 0x32a   : > { %10513 = vst [vmem:[%s15289_s8 + $0x18] sm:$0xff] %v10369_v43   ;;  %v8580_v10 = vadd.f32 %v11444_v49, %v15279_v41  ;;  %v11446_v51 = vadd.f32 %v8281_v39, %v15234_v50 }
 0x32b   : > { %10512 = vst [vmem:[%s15289_s8 + $0x10] sm:$0xff] %v10364_v34   ;;  %v8710_v30 = vmul.f32 0.2, %v8582_v9  ;;  %v8583_v59 = vadd.f32 %v11445_v54, %v15279_v41  ;;  %vm8646_vm1 = vcmp.ge.f32.partialorder %v8582_v9, 0.0 }
 0x32c   : > { %v8708_v0 = vmul.f32 0.2, %v8580_v10  ;;  %v8581_v31 = vadd.f32 %v11446_v51, %v15279_v41  ;;  %vm8644_vm2 = vcmp.ge.f32.partialorder %v8580_v10, 0.0 }
 0x32d   : > { %vm8647_vm3 = vcmp.ge.f32.partialorder %v8583_v59, 0.0  ;;  %v8711_v26 = vmul.f32 0.2, %v8583_v59  ;;  %v8774_v56 = vsel %vm8646_vm1, %v8582_v9, %v8710_v30 }
 0x32e   : > { %vm8645_vm4 = vcmp.ge.f32.partialorder %v8581_v31, 0.0  ;;  %v8709_v58 = vmul.f32 0.2, %v8581_v31  ;;  %v11383_v14 = vpop.f32.mrb[12].mxu0  ;;  %v8772_v2 = vsel %vm8644_vm2, %v8580_v10, %v8708_v0 }
 0x32f   : > { %v8775_v42 = vsel %vm8647_vm3, %v8583_v59, %v8711_v26  ;;  %v11447_v50 = vadd.f32 %v11383_v14, %v15236_v12  ;;  %v8294_v36 = vpop.f32.mrb[13].mxu0 }
 0x330   : > { %v10379_v18 = vpack.c.bf16 %v8775_v42, %v8774_v56  ;;  %v8773_v40 = vsel %vm8645_vm4, %v8581_v31, %v8709_v58  ;;  %v11448_v45 = vadd.f32 %v8294_v36, %v15238_v57  ;;  %v11384_v38 = vpop.f32.mrb[14].mxu0 }
 0x331   : > { %v10374_v20 = vpack.c.bf16 %v8773_v40, %v8772_v2  ;;  %v8586_v21 = vadd.f32 %v11447_v50, %v15279_v41  ;;  %v11449_v60 = vadd.f32 %v11384_v38, %v15240_v47  ;;  %v8297_v13 = vpop.f32.mrb[15].mxu0 }
 0x332   : > { %10515 = vst [vmem:[%s15289_s8 + $0x28] sm:$0xff] %v10379_v18   ;;  %v8584_v27 = vadd.f32 %v11448_v45, %v15279_v41  ;;  %v11450_v6 = vadd.f32 %v8297_v13, %v15242_v4 }
 0x333   : > { %10514 = vst [vmem:[%s15289_s8 + $0x20] sm:$0xff] %v10374_v20   ;;  %v8714_v12 = vmul.f32 0.2, %v8586_v21  ;;  %v8587_v48 = vadd.f32 %v11449_v60, %v15279_v41  ;;  %vm8650_vm5 = vcmp.ge.f32.partialorder %v8586_v21, 0.0 }
 0x334   : > { %v8712_v3 = vmul.f32 0.2, %v8584_v27  ;;  %v8585_v57 = vadd.f32 %v11450_v6, %v15279_v41  ;;  %vm8648_vm6 = vcmp.ge.f32.partialorder %v8584_v27, 0.0 }
 0x335   : > { %vm8651_vm7 = vcmp.ge.f32.partialorder %v8587_v48, 0.0  ;;  %v8715_v33 = vmul.f32 0.2, %v8587_v48  ;;  %v8778_v28 = vsel %vm8650_vm5, %v8586_v21, %v8714_v12 }
 0x336   : > { %vm8649_vm8 = vcmp.ge.f32.partialorder %v8585_v57, 0.0  ;;  %v8713_v47 = vmul.f32 0.2, %v8585_v57  ;;  %v11387_v44 = vpop.f32.mrb[16].mxu0  ;;  %v8776_v22 = vsel %vm8648_vm6, %v8584_v27, %v8712_v3 }
 0x337   : > { %v8779_v7 = vsel %vm8651_vm7, %v8587_v48, %v8715_v33  ;;  %v11451_v4 = vadd.f32 %v11387_v44, %v15244_v11  ;;  %v8310_v1 = vpop.f32.mrb[17].mxu0 }
 0x338   : > { %v10389_v23 = vpack.c.bf16 %v8779_v7, %v8778_v28  ;;  %v8777_v24 = vsel %vm8649_vm8, %v8585_v57, %v8713_v47  ;;  %v11452_v55 = vadd.f32 %v8310_v1, %v15246_v8  ;;  %v11388_v43 = vpop.f32.mrb[18].mxu0 }
 0x339   : > { %v10384_v61 = vpack.c.bf16 %v8777_v24, %v8776_v22  ;;  %v8590_v49 = vadd.f32 %v11451_v4, %v15279_v41  ;;  %v11453_v25 = vadd.f32 %v11388_v43, %v15248_v52  ;;  %v8313_v34 = vpop.f32.mrb[19].mxu0 }
 0x33a   : > { %10517 = vst [vmem:[%s15289_s8 + $0x38] sm:$0xff] %v10389_v23   ;;  %v8588_v9 = vadd.f32 %v11452_v55, %v15279_v41  ;;  %v11454_v54 = vadd.f32 %v8313_v34, %v15250_v37 }
 0x33b   : > { %10516 = vst [vmem:[%s15289_s8 + $0x30] sm:$0xff] %v10384_v61   ;;  %v8718_v11 = vmul.f32 0.2, %v8590_v49  ;;  %v8591_v39 = vadd.f32 %v11453_v25, %v15279_v41  ;;  %vm8654_vm9 = vcmp.ge.f32.partialorder %v8590_v49, 0.0 }
 0x33c   : > { %v8716_v10 = vmul.f32 0.2, %v8588_v9  ;;  %v8589_v8 = vadd.f32 %v11454_v54, %v15279_v41  ;;  %vm8652_vm10 = vcmp.ge.f32.partialorder %v8588_v9, 0.0 }
 0x33d   : > { %vm8655_vm11 = vcmp.ge.f32.partialorder %v8591_v39, 0.0  ;;  %v8719_v51 = vmul.f32 0.2, %v8591_v39  ;;  %v8782_v59 = vsel %vm8654_vm9, %v8590_v49, %v8718_v11 }
 0x33e   : > { %vm8653_vm12 = vcmp.ge.f32.partialorder %v8589_v8, 0.0  ;;  %v8717_v52 = vmul.f32 0.2, %v8589_v8  ;;  %v11391_v30 = vpop.f32.mrb[20].mxu0  ;;  %v8780_v26 = vsel %vm8652_vm10, %v8588_v9, %v8716_v10 }
 0x33f   : > { %v8783_v0 = vsel %vm8655_vm11, %v8591_v39, %v8719_v51  ;;  %v11455_v37 = vadd.f32 %v11391_v30, %v15252_v62  ;;  %v8326_v31 = vpop.f32.mrb[21].mxu0 }
 0x340   : > { %v10399_v58 = vpack.c.bf16 %v8783_v0, %v8782_v59  ;;  %v8781_v14 = vsel %vm8653_vm12, %v8589_v8, %v8717_v52  ;;  %v11456_v56 = vadd.f32 %v8326_v31, %v15254_v53  ;;  %v11392_v42 = vpop.f32.mrb[22].mxu0 }
 0x341   : > { %v10394_v50 = vpack.c.bf16 %v8781_v14, %v8780_v26  ;;  %v8594_v36 = vadd.f32 %v11455_v37, %v15279_v41  ;;  %v11457_v2 = vadd.f32 %v11392_v42, %v15256_v29  ;;  %v8329_v18 = vpop.f32.mrb[23].mxu0 }
 0x342   : > { %10519 = vst [vmem:[%s15289_s8 + $0x48] sm:$0xff] %v10399_v58   ;;  %v8592_v40 = vadd.f32 %v11456_v56, %v15279_v41  ;;  %v11458_v45 = vadd.f32 %v8329_v18, %v15258_v32 }
 0x343   : > { %10518 = vst [vmem:[%s15289_s8 + $0x40] sm:$0xff] %v10394_v50   ;;  %v8722_v62 = vmul.f32 0.2, %v8594_v36  ;;  %v8595_v38 = vadd.f32 %v11457_v2, %v15279_v41  ;;  %vm8658_vm13 = vcmp.ge.f32.partialorder %v8594_v36, 0.0 }
 0x344   : > { %v8720_v20 = vmul.f32 0.2, %v8592_v40  ;;  %v8593_v53 = vadd.f32 %v11458_v45, %v15279_v41  ;;  %vm8656_vm14 = vcmp.ge.f32.partialorder %v8592_v40, 0.0 }
 0x345   : > { %vm8659_vm15 = vcmp.ge.f32.partialorder %v8595_v38, 0.0  ;;  %v8723_v21 = vmul.f32 0.2, %v8595_v38  ;;  %v8786_v13 = vsel %vm8658_vm13, %v8594_v36, %v8722_v62 }
 0x346   : > { %vm8657_vm0 = vcmp.ge.f32.partialorder %v8593_v53, 0.0  ;;  %v8721_v29 = vmul.f32 0.2, %v8593_v53  ;;  %v11395_v60 = vpop.f32.mrb[24].mxu0  ;;  %v8784_v12 = vsel %vm8656_vm14, %v8592_v40, %v8720_v20 }
 0x347   : > { %v8787_v27 = vsel %vm8659_vm15, %v8595_v38, %v8723_v21  ;;  %v11459_v32 = vadd.f32 %v11395_v60, %v15260_v63  ;;  %v8342_v6 = vpop.f32.mrb[25].mxu0 }
 0x348   : > { %v10409_v48 = vpack.c.bf16 %v8787_v27, %v8786_v13  ;;  %v8785_v3 = vsel %vm8657_vm0, %v8593_v53, %v8721_v29  ;;  %v11460_v57 = vadd.f32 %v8342_v6, %v15262_v35  ;;  %v11396_v33 = vpop.f32.mrb[26].mxu0 }
 0x349   : > { %v10404_v47 = vpack.c.bf16 %v8785_v3, %v8784_v12  ;;  %v8598_v44 = vadd.f32 %v11459_v32, %v15279_v41  ;;  %v11461_v28 = vadd.f32 %v11396_v33, %v15264_v16  ;;  %v8345_v7 = vpop.f32.mrb[27].mxu0 }
 0x34a   : > { %10521 = vst [vmem:[%s15289_s8 + $0x58] sm:$0xff] %v10409_v48   ;;  %v8596_v4 = vadd.f32 %v11460_v57, %v15279_v41  ;;  %v11462_v1 = vadd.f32 %v8345_v7, %v15266_v46 }
 0x34b   : > { %10520 = vst [vmem:[%s15289_s8 + $0x50] sm:$0xff] %v10404_v47   ;;  %v8726_v63 = vmul.f32 0.2, %v8598_v44  ;;  %v8599_v22 = vadd.f32 %v11461_v28, %v15279_v41  ;;  %vm8662_vm1 = vcmp.ge.f32.partialorder %v8598_v44, 0.0 }
 0x34c   : > { %v8724_v23 = vmul.f32 0.2, %v8596_v4  ;;  %v8597_v35 = vadd.f32 %v11462_v1, %v15279_v41  ;;  %vm8660_vm2 = vcmp.ge.f32.partialorder %v8596_v4, 0.0 }
 0x34d   : > { %vm8663_vm3 = vcmp.ge.f32.partialorder %v8599_v22, 0.0  ;;  %v8727_v24 = vmul.f32 0.2, %v8599_v22  ;;  %v8790_v43 = vsel %vm8662_vm1, %v8598_v44, %v8726_v63 }
 0x34e   : > { %vm8661_vm4 = vcmp.ge.f32.partialorder %v8597_v35, 0.0  ;;  %v8725_v16 = vmul.f32 0.2, %v8597_v35  ;;  %v11399_v55 = vpop.f32.mrb[28].mxu0  ;;  %v8788_v25 = vsel %vm8660_vm2, %v8596_v4, %v8724_v23 }
 0x34f   : > { %v8791_v61 = vsel %vm8663_vm3, %v8599_v22, %v8727_v24  ;;  %v11463_v46 = vadd.f32 %v11399_v55, %v15268_v19  ;;  %v8358_v49 = vpop.f32.mrb[29].mxu0 }
 0x350   : > { %v10419_v34 = vpack.c.bf16 %v8791_v61, %v8790_v43  ;;  %v8789_v9 = vsel %vm8661_vm4, %v8597_v35, %v8725_v16  ;;  %v11464_v54 = vadd.f32 %v8358_v49, %v15270_v15  ;;  %v11400_v11 = vpop.f32.mrb[30].mxu0 }
 0x351   : > { %v10414_v39 = vpack.c.bf16 %v8789_v9, %v8788_v25  ;;  %v8602_v10 = vadd.f32 %v11463_v46, %v15279_v41  ;;  %v11465_v8 = vadd.f32 %v11400_v11, %v15272_v17  ;;  %v8361_v51 = vpop.f32.mrb[31].mxu0 }
 0x352   : > { %10523 = vst [vmem:[%s15289_s8 + $0x68] sm:$0xff] %v10419_v34   ;;  %v8600_v52 = vadd.f32 %v11464_v54, %v15279_v41  ;;  %v11466_v30 = vadd.f32 %v8361_v51, %v15274_v5 }
 0x353   : > { %10522 = vst [vmem:[%s15289_s8 + $0x60] sm:$0xff] %v10414_v39   ;;  %v8730_v19 = vmul.f32 0.2, %v8602_v10  ;;  %v8603_v59 = vadd.f32 %v11465_v8, %v15279_v41  ;;  %vm8666_vm5 = vcmp.ge.f32.partialorder %v8602_v10, 0.0 }
 0x354   : > { %v8728_v0 = vmul.f32 0.2, %v8600_v52  ;;  %v8601_v15 = vadd.f32 %v11466_v30, %v15279_v41  ;;  %vm8664_vm6 = vcmp.ge.f32.partialorder %v8600_v52, 0.0 }
 0x355   : > { %vm8667_vm7 = vcmp.ge.f32.partialorder %v8603_v59, 0.0  ;;  %v8731_v37 = vmul.f32 0.2, %v8603_v59  ;;  %v8794_v14 = vsel %vm8666_vm5, %v8602_v10, %v8730_v19 }
 0x356   : > { %v11139_v31 = vpop.f32.mrb[32].mxu1  ;;  %vm8665_vm8 = vcmp.ge.f32.partialorder %v8601_v15, 0.0  ;;  %v8729_v17 = vmul.f32 0.2, %v8601_v15  ;;  %v11403_v26 = vpop.f32.mrb[32].mxu0  ;;  %v8792_v36 = vsel %vm8664_vm6, %v8600_v52, %v8728_v0 }
 0x357   : > { %v4650_v58 = vpop.f32.mrb[33].mxu1  ;;  %v8795_v56 = vsel %vm8667_vm7, %v8603_v59, %v8731_v37  ;;  %v11467_v5 = vadd.f32 %v11403_v26, %v11139_v31  ;;  %v8374_v42 = vpop.f32.mrb[33].mxu0 }
 0x358   : > { %v11140_v50 = vpop.f32.mrb[34].mxu1  ;;  %v10429_v2 = vpack.c.bf16 %v8795_v56, %v8794_v14  ;;  %v8793_v18 = vsel %vm8665_vm8, %v8601_v15, %v8729_v17  ;;  %v11468_v40 = vadd.f32 %v8374_v42, %v4650_v58  ;;  %v11404_v45 = vpop.f32.mrb[34].mxu0 }
 0x359   : > { %v4653_v62 = vpop.f32.mrb[35].mxu1  ;;  %v10424_v38 = vpack.c.bf16 %v8793_v18, %v8792_v36  ;;  %v8606_v20 = vadd.f32 %v11467_v5, %v15279_v41  ;;  %v11469_v53 = vadd.f32 %v11404_v45, %v11140_v50  ;;  %v8377_v21 = vpop.f32.mrb[35].mxu0 }
 0x35a   : > { %10525 = vst [vmem:[%s15289_s8 + $0x78] sm:$0xff] %v10429_v2   ;;  %v8604_v29 = vadd.f32 %v11468_v40, %v15279_v41  ;;  %v11470_v60 = vadd.f32 %v8377_v21, %v4653_v62 }
 0x35b   : > { %10524 = vst [vmem:[%s15289_s8 + $0x70] sm:$0xff] %v10424_v38   ;;  %v8734_v13 = vmul.f32 0.2, %v8606_v20  ;;  %v8607_v27 = vadd.f32 %v11469_v53, %v15279_v41  ;;  %vm8670_vm9 = vcmp.ge.f32.partialorder %v8606_v20, 0.0 }
 0x35c   : > { %v8732_v32 = vmul.f32 0.2, %v8604_v29  ;;  %v8605_v6 = vadd.f32 %v11470_v60, %v15279_v41  ;;  %vm8668_vm10 = vcmp.ge.f32.partialorder %v8604_v29, 0.0 }
 0x35d   : > { %vm8671_vm11 = vcmp.ge.f32.partialorder %v8607_v27, 0.0  ;;  %v8735_v12 = vmul.f32 0.2, %v8607_v27  ;;  %v8798_v47 = vsel %vm8670_vm9, %v8606_v20, %v8734_v13 }
 0x35e   : > { %v11143_v48 = vpop.f32.mrb[36].mxu1  ;;  %vm8669_vm12 = vcmp.ge.f32.partialorder %v8605_v6, 0.0  ;;  %v8733_v3 = vmul.f32 0.2, %v8605_v6  ;;  %v11407_v57 = vpop.f32.mrb[36].mxu0  ;;  %v8796_v1 = vsel %vm8668_vm10, %v8604_v29, %v8732_v32 }
 0x35f   : > { %v4666_v33 = vpop.f32.mrb[37].mxu1  ;;  %v8799_v44 = vsel %vm8671_vm11, %v8607_v27, %v8735_v12  ;;  %v11471_v28 = vadd.f32 %v11407_v57, %v11143_v48  ;;  %v8390_v7 = vpop.f32.mrb[37].mxu0 }
 0x360   : > { %v11144_v4 = vpop.f32.mrb[38].mxu1  ;;  %v10439_v63 = vpack.c.bf16 %v8799_v44, %v8798_v47  ;;  %v8797_v22 = vsel %vm8669_vm12, %v8605_v6, %v8733_v3  ;;  %v11472_v23 = vadd.f32 %v8390_v7, %v4666_v33  ;;  %v11408_v35 = vpop.f32.mrb[38].mxu0 }
 0x361   : > { %v4669_v24 = vpop.f32.mrb[39].mxu1  ;;  %v10434_v16 = vpack.c.bf16 %v8797_v22, %v8796_v1  ;;  %v8610_v55 = vadd.f32 %v11471_v28, %v15279_v41  ;;  %v11473_v43 = vadd.f32 %v11408_v35, %v11144_v4  ;;  %v8393_v61 = vpop.f32.mrb[39].mxu0 }
 0x362   : > { %10527 = vst [vmem:[%s15289_s8 + $0x88] sm:$0xff] %v10439_v63   ;;  %v8608_v46 = vadd.f32 %v11472_v23, %v15279_v41  ;;  %v11474_v49 = vadd.f32 %v8393_v61, %v4669_v24 }
 0x363   : > { %10526 = vst [vmem:[%s15289_s8 + $0x80] sm:$0xff] %v10434_v16   ;;  %v8738_v25 = vmul.f32 0.2, %v8610_v55  ;;  %v8611_v34 = vadd.f32 %v11473_v43, %v15279_v41  ;;  %vm8674_vm13 = vcmp.ge.f32.partialorder %v8610_v55, 0.0 }
 0x364   : > { %v8736_v9 = vmul.f32 0.2, %v8608_v46  ;;  %v8609_v54 = vadd.f32 %v11474_v49, %v15279_v41  ;;  %vm8672_vm14 = vcmp.ge.f32.partialorder %v8608_v46, 0.0 }
 0x365   : > { %vm8675_vm15 = vcmp.ge.f32.partialorder %v8611_v34, 0.0  ;;  %v8739_v11 = vmul.f32 0.2, %v8611_v34  ;;  %v8802_v52 = vsel %vm8674_vm13, %v8610_v55, %v8738_v25 }
 0x366   : > { %v11147_v39 = vpop.f32.mrb[40].mxu1  ;;  %vm8673_vm0 = vcmp.ge.f32.partialorder %v8609_v54, 0.0  ;;  %v8737_v10 = vmul.f32 0.2, %v8609_v54  ;;  %v11411_v8 = vpop.f32.mrb[40].mxu0  ;;  %v8800_v15 = vsel %vm8672_vm14, %v8608_v46, %v8736_v9 }
 0x367   : > { %v4682_v51 = vpop.f32.mrb[41].mxu1  ;;  %v8803_v30 = vsel %vm8675_vm15, %v8611_v34, %v8739_v11  ;;  %v11475_v19 = vadd.f32 %v11411_v8, %v11147_v39  ;;  %v8406_v59 = vpop.f32.mrb[41].mxu0 }
 0x368   : > { %v11148_v0 = vpop.f32.mrb[42].mxu1  ;;  %v10449_v37 = vpack.c.bf16 %v8803_v30, %v8802_v52  ;;  %v8801_v31 = vsel %vm8673_vm0, %v8609_v54, %v8737_v10  ;;  %v11476_v17 = vadd.f32 %v8406_v59, %v4682_v51  ;;  %v11412_v26 = vpop.f32.mrb[42].mxu0 }
 0x369   : > { %v4685_v58 = vpop.f32.mrb[43].mxu1  ;;  %v10444_v14 = vpack.c.bf16 %v8801_v31, %v8800_v15  ;;  %v8614_v56 = vadd.f32 %v11475_v19, %v15279_v41  ;;  %v11477_v5 = vadd.f32 %v11412_v26, %v11148_v0  ;;  %v8409_v42 = vpop.f32.mrb[43].mxu0 }
 0x36a   : > { %10529 = vst [vmem:[%s15289_s8 + $0x98] sm:$0xff] %v10449_v37   ;;  %v8612_v50 = vadd.f32 %v11476_v17, %v15279_v41  ;;  %v11478_v36 = vadd.f32 %v8409_v42, %v4685_v58 }
 0x36b   : > { %10528 = vst [vmem:[%s15289_s8 + $0x90] sm:$0xff] %v10444_v14   ;;  %v8742_v2 = vmul.f32 0.2, %v8614_v56  ;;  %v8615_v18 = vadd.f32 %v11477_v5, %v15279_v41  ;;  %vm8678_vm1 = vcmp.ge.f32.partialorder %v8614_v56, 0.0 }
 0x36c   : > { %v8740_v40 = vmul.f32 0.2, %v8612_v50  ;;  %v8613_v45 = vadd.f32 %v11478_v36, %v15279_v41  ;;  %vm8676_vm2 = vcmp.ge.f32.partialorder %v8612_v50, 0.0 }
 0x36d   : > { %vm8679_vm3 = vcmp.ge.f32.partialorder %v8615_v18, 0.0  ;;  %v8743_v62 = vmul.f32 0.2, %v8615_v18  ;;  %v8806_v29 = vsel %vm8678_vm1, %v8614_v56, %v8742_v2 }
 0x36e   : > { %v11151_v38 = vpop.f32.mrb[44].mxu1  ;;  %vm8677_vm4 = vcmp.ge.f32.partialorder %v8613_v45, 0.0  ;;  %v8741_v20 = vmul.f32 0.2, %v8613_v45  ;;  %v11415_v53 = vpop.f32.mrb[44].mxu0  ;;  %v8804_v6 = vsel %vm8676_vm2, %v8612_v50, %v8740_v40 }
 0x36f   : > { %v4698_v21 = vpop.f32.mrb[45].mxu1  ;;  %v8807_v60 = vsel %vm8679_vm3, %v8615_v18, %v8743_v62  ;;  %v11479_v13 = vadd.f32 %v11415_v53, %v11151_v38  ;;  %v8422_v27 = vpop.f32.mrb[45].mxu0 }
 0x370   : > { %v11152_v32 = vpop.f32.mrb[46].mxu1  ;;  %v10459_v12 = vpack.c.bf16 %v8807_v60, %v8806_v29  ;;  %v8805_v48 = vsel %vm8677_vm4, %v8613_v45, %v8741_v20  ;;  %v11480_v3 = vadd.f32 %v8422_v27, %v4698_v21  ;;  %v11416_v57 = vpop.f32.mrb[46].mxu0 }
 0x371   : > { %v4701_v33 = vpop.f32.mrb[47].mxu1  ;;  %v10454_v47 = vpack.c.bf16 %v8805_v48, %v8804_v6  ;;  %v8618_v44 = vadd.f32 %v11479_v13, %v15279_v41  ;;  %v11481_v28 = vadd.f32 %v11416_v57, %v11152_v32  ;;  %v8425_v7 = vpop.f32.mrb[47].mxu0 }
 0x372   : > { %10531 = vst [vmem:[%s15289_s8 + $0xa8] sm:$0xff] %v10459_v12   ;;  %v8616_v4 = vadd.f32 %v11480_v3, %v15279_v41  ;;  %v11482_v1 = vadd.f32 %v8425_v7, %v4701_v33 }
 0x373   : > { %10530 = vst [vmem:[%s15289_s8 + $0xa0] sm:$0xff] %v10454_v47   ;;  %v8746_v63 = vmul.f32 0.2, %v8618_v44  ;;  %v8619_v22 = vadd.f32 %v11481_v28, %v15279_v41  ;;  %vm8682_vm5 = vcmp.ge.f32.partialorder %v8618_v44, 0.0 }
 0x374   : > { %v8744_v23 = vmul.f32 0.2, %v8616_v4  ;;  %v8617_v35 = vadd.f32 %v11482_v1, %v15279_v41  ;;  %vm8680_vm6 = vcmp.ge.f32.partialorder %v8616_v4, 0.0 }
 0x375   : > { %vm8683_vm7 = vcmp.ge.f32.partialorder %v8619_v22, 0.0  ;;  %v8747_v24 = vmul.f32 0.2, %v8619_v22  ;;  %v8810_v46 = vsel %vm8682_vm5, %v8618_v44, %v8746_v63 }
 0x376   : > { %v11155_v16 = vpop.f32.mrb[48].mxu1  ;;  %vm8681_vm8 = vcmp.ge.f32.partialorder %v8617_v35, 0.0  ;;  %v8745_v55 = vmul.f32 0.2, %v8617_v35  ;;  %v11419_v43 = vpop.f32.mrb[48].mxu0  ;;  %v8808_v54 = vsel %vm8680_vm6, %v8616_v4, %v8744_v23 }
 0x377   : > { %v4714_v61 = vpop.f32.mrb[49].mxu1  ;;  %v8811_v49 = vsel %vm8683_vm7, %v8619_v22, %v8747_v24  ;;  %v11483_v25 = vadd.f32 %v11419_v43, %v11155_v16  ;;  %v8438_v34 = vpop.f32.mrb[49].mxu0 }
 0x378   : > { %v11156_v9 = vpop.f32.mrb[50].mxu1  ;;  %v10469_v11 = vpack.c.bf16 %v8811_v49, %v8810_v46  ;;  %v8809_v39 = vsel %vm8681_vm8, %v8617_v35, %v8745_v55  ;;  %v11484_v10 = vadd.f32 %v8438_v34, %v4714_v61  ;;  %v11420_v8 = vpop.f32.mrb[50].mxu0 }
 0x379   : > { %v4717_v51 = vpop.f32.mrb[51].mxu1  ;;  %v10464_v52 = vpack.c.bf16 %v8809_v39, %v8808_v54  ;;  %v8622_v30 = vadd.f32 %v11483_v25, %v15279_v41  ;;  %v11485_v19 = vadd.f32 %v11420_v8, %v11156_v9  ;;  %v8441_v59 = vpop.f32.mrb[51].mxu0 }
 0x37a   : > { %10533 = vst [vmem:[%s15289_s8 + $0xb8] sm:$0xff] %v10469_v11   ;;  %v8620_v0 = vadd.f32 %v11484_v10, %v15279_v41  ;;  %v11486_v15 = vadd.f32 %v8441_v59, %v4717_v51 }
 0x37b   : > { %10532 = vst [vmem:[%s15289_s8 + $0xb0] sm:$0xff] %v10464_v52   ;;  %v8750_v37 = vmul.f32 0.2, %v8622_v30  ;;  %v8623_v31 = vadd.f32 %v11485_v19, %v15279_v41  ;;  %vm8686_vm9 = vcmp.ge.f32.partialorder %v8622_v30, 0.0 }
 0x37c   : > { %v8748_v17 = vmul.f32 0.2, %v8620_v0  ;;  %v8621_v26 = vadd.f32 %v11486_v15, %v15279_v41  ;;  %vm8684_vm10 = vcmp.ge.f32.partialorder %v8620_v0, 0.0 }
 0x37d   : > { %vm8687_vm11 = vcmp.ge.f32.partialorder %v8623_v31, 0.0  ;;  %v8751_v58 = vmul.f32 0.2, %v8623_v31  ;;  %v8814_v50 = vsel %vm8686_vm9, %v8622_v30, %v8750_v37 }
 0x37e   : > { %v11159_v14 = vpop.f32.mrb[52].mxu1  ;;  %vm8685_vm12 = vcmp.ge.f32.partialorder %v8621_v26, 0.0  ;;  %v8749_v56 = vmul.f32 0.2, %v8621_v26  ;;  %v11423_v5 = vpop.f32.mrb[52].mxu0  ;;  %v8812_v45 = vsel %vm8684_vm10, %v8620_v0, %v8748_v17 }
 0x37f   : > { %v4730_v42 = vpop.f32.mrb[53].mxu1  ;;  %v8815_v36 = vsel %vm8687_vm11, %v8623_v31, %v8751_v58  ;;  %v11487_v2 = vadd.f32 %v11423_v5, %v11159_v14  ;;  %v8454_v18 = vpop.f32.mrb[53].mxu0 }
 0x380   : > { %v11160_v40 = vpop.f32.mrb[54].mxu1  ;;  %v10479_v62 = vpack.c.bf16 %v8815_v36, %v8814_v50  ;;  %v8813_v38 = vsel %vm8685_vm12, %v8621_v26, %v8749_v56  ;;  %v11488_v20 = vadd.f32 %v8454_v18, %v4730_v42  ;;  %v11424_v53 = vpop.f32.mrb[54].mxu0 }
 0x381   : > { %v4733_v21 = vpop.f32.mrb[55].mxu1  ;;  %v10474_v29 = vpack.c.bf16 %v8813_v38, %v8812_v45  ;;  %v8626_v60 = vadd.f32 %v11487_v2, %v15279_v41  ;;  %v11489_v13 = vadd.f32 %v11424_v53, %v11160_v40  ;;  %v8457_v27 = vpop.f32.mrb[55].mxu0 }
 0x382   : > { %10535 = vst [vmem:[%s15289_s8 + $0xc8] sm:$0xff] %v10479_v62   ;;  %v8624_v32 = vadd.f32 %v11488_v20, %v15279_v41  ;;  %v11490_v6 = vadd.f32 %v8457_v27, %v4733_v21 }
 0x383   : > { %10534 = vst [vmem:[%s15289_s8 + $0xc0] sm:$0xff] %v10474_v29   ;;  %v8754_v12 = vmul.f32 0.2, %v8626_v60  ;;  %v8627_v48 = vadd.f32 %v11489_v13, %v15279_v41  ;;  %vm8690_vm13 = vcmp.ge.f32.partialorder %v8626_v60, 0.0 }
 0x384   : > { %v8752_v3 = vmul.f32 0.2, %v8624_v32  ;;  %v8625_v57 = vadd.f32 %v11490_v6, %v15279_v41  ;;  %vm8688_vm14 = vcmp.ge.f32.partialorder %v8624_v32, 0.0 }
 0x385   : > { %vm8691_vm15 = vcmp.ge.f32.partialorder %v8627_v48, 0.0  ;;  %v8755_v33 = vmul.f32 0.2, %v8627_v48  ;;  %v8818_v4 = vsel %vm8690_vm13, %v8626_v60, %v8754_v12 }
 0x386   : > { %v11163_v47 = vpop.f32.mrb[56].mxu1  ;;  %vm8689_vm0 = vcmp.ge.f32.partialorder %v8625_v57, 0.0  ;;  %v8753_v44 = vmul.f32 0.2, %v8625_v57  ;;  %v11427_v28 = vpop.f32.mrb[56].mxu0  ;;  %v8816_v35 = vsel %vm8688_vm14, %v8624_v32, %v8752_v3 }
 0x387   : > { %v4746_v7 = vpop.f32.mrb[57].mxu1  ;;  %v8819_v1 = vsel %vm8691_vm15, %v8627_v48, %v8755_v33  ;;  %v11491_v63 = vadd.f32 %v11427_v28, %v11163_v47  ;;  %v8470_v22 = vpop.f32.mrb[57].mxu0 }
 0x388   : > { %v11164_v23 = vpop.f32.mrb[58].mxu1  ;;  %v10489_v24 = vpack.c.bf16 %v8819_v1, %v8818_v4  ;;  %v8817_v16 = vsel %vm8689_vm0, %v8625_v57, %v8753_v44  ;;  %v11492_v55 = vadd.f32 %v8470_v22, %v4746_v7  ;;  %v11428_v43 = vpop.f32.mrb[58].mxu0 }
 0x389   : > { %v4749_v61 = vpop.f32.mrb[59].mxu1  ;;  %v10484_v46 = vpack.c.bf16 %v8817_v16, %v8816_v35  ;;  %v8630_v49 = vadd.f32 %v11491_v63, %v15279_v41  ;;  %v11493_v25 = vadd.f32 %v11428_v43, %v11164_v23  ;;  %v8473_v34 = vpop.f32.mrb[59].mxu0 }
 0x38a   : > { %10537 = vst [vmem:[%s15289_s8 + $0xd8] sm:$0xff] %v10489_v24   ;;  %v8628_v9 = vadd.f32 %v11492_v55, %v15279_v41  ;;  %v11494_v54 = vadd.f32 %v8473_v34, %v4749_v61 }
 0x38b   : > { %10536 = vst [vmem:[%s15289_s8 + $0xd0] sm:$0xff] %v10484_v46   ;;  %v8758_v11 = vmul.f32 0.2, %v8630_v49  ;;  %v8631_v39 = vadd.f32 %v11493_v25, %v15279_v41  ;;  %vm8694_vm1 = vcmp.ge.f32.partialorder %v8630_v49, 0.0 }
 0x38c   : > { %v8756_v10 = vmul.f32 0.2, %v8628_v9  ;;  %v8629_v8 = vadd.f32 %v11494_v54, %v15279_v41  ;;  %vm8692_vm2 = vcmp.ge.f32.partialorder %v8628_v9, 0.0 }
 0x38d   : > { %vm8695_vm3 = vcmp.ge.f32.partialorder %v8631_v39, 0.0  ;;  %v8759_v51 = vmul.f32 0.2, %v8631_v39  ;;  %v8822_v0 = vsel %vm8694_vm1, %v8630_v49, %v8758_v11 }
 0x38e   : > { %v11167_v52 = vpop.f32.mrb[60].mxu1  ;;  %vm8693_vm4 = vcmp.ge.f32.partialorder %v8629_v8, 0.0  ;;  %v8757_v30 = vmul.f32 0.2, %v8629_v8  ;;  %v11431_v19 = vpop.f32.mrb[60].mxu0  ;;  %v8820_v26 = vsel %vm8692_vm2, %v8628_v9, %v8756_v10 }
 0x38f   : > { %v4762_v59 = vpop.f32.mrb[61].mxu1  ;;  %v8823_v15 = vsel %vm8695_vm3, %v8631_v39, %v8759_v51  ;;  %v11495_v37 = vadd.f32 %v11431_v19, %v11167_v52  ;;  %v8486_v31 = vpop.f32.mrb[61].mxu0 }
 0x390   : > { %v11168_v17 = vpop.f32.mrb[62].mxu1  ;;  %v10499_v58 = vpack.c.bf16 %v8823_v15, %v8822_v0  ;;  %v8821_v14 = vsel %vm8693_vm4, %v8629_v8, %v8757_v30  ;;  %v11496_v56 = vadd.f32 %v8486_v31, %v4762_v59  ;;  %v11432_v5 = vpop.f32.mrb[62].mxu0 }
 0x391   : > { %v4765_v42 = vpop.f32.mrb[63].mxu1  ;;  %v10494_v50 = vpack.c.bf16 %v8821_v14, %v8820_v26  ;;  %v8634_v36 = vadd.f32 %v11495_v37, %v15279_v41  ;;  %v11497_v2 = vadd.f32 %v11432_v5, %v11168_v17  ;;  %v8489_v18 = vpop.f32.mrb[63].mxu0 }
 0x392   : > { %10539 = vst [vmem:[%s15289_s8 + $0xe8] sm:$0xff] %v10499_v58   ;;  %v8632_v40 = vadd.f32 %v11496_v56, %v15279_v41  ;;  %v11498_v45 = vadd.f32 %v8489_v18, %v4765_v42 }
 0x393   : > { %10538 = vst [vmem:[%s15289_s8 + $0xe0] sm:$0xff] %v10494_v50   ;;  %v8762_v62 = vmul.f32 0.2, %v8634_v36  ;;  %v8635_v38 = vadd.f32 %v11497_v2, %v15279_v41  ;;  %vm8698_vm5 = vcmp.ge.f32.partialorder %v8634_v36, 0.0 }
 0x394   : > { %v8760_v20 = vmul.f32 0.2, %v8632_v40  ;;  %v8633_v53 = vadd.f32 %v11498_v45, %v15279_v41  ;;  %vm8696_vm6 = vcmp.ge.f32.partialorder %v8632_v40, 0.0 }
 0x395   : > { %vm8699_vm7 = vcmp.ge.f32.partialorder %v8635_v38, 0.0  ;;  %v8763_v21 = vmul.f32 0.2, %v8635_v38  ;;  %v8826_v60 = vsel %vm8698_vm5, %v8634_v36, %v8762_v62 }
 0x396   : > { %vm8697_vm8 = vcmp.ge.f32.partialorder %v8633_v53, 0.0  ;;  %v8761_v29 = vmul.f32 0.2, %v8633_v53  ;;  %v8824_v27 = vsel %vm8696_vm6, %v8632_v40, %v8760_v20 }
 0x397   : > { %v8827_v13 = vsel %vm8699_vm7, %v8635_v38, %v8763_v21 }
 0x398   : > { %v10509_v32 = vpack.c.bf16 %v8827_v13, %v8826_v60  ;;  %v8825_v6 = vsel %vm8697_vm8, %v8633_v53, %v8761_v29 }
 0x399   : > { %v10504_v41 = vpack.c.bf16 %v8825_v6, %v8824_v27 }
 0x39a   : > { %10541 = vst [vmem:[%s15289_s8 + $0xf8] sm:$0xff] %v10509_v32  }
 0x39b   : > { %10540 = vst [vmem:[%s15289_s8 + $0xf0] sm:$0xff] %v10504_v41  }
 0x39c   : > { %12313 = shalt.err (!%p12310_p3)
}
 0x39d   : > { %s12314_s28 = scalar_lea.hbm %s15410_s19, 4096  ;;  %s12318_s4 = scalar_lea.hbm %s15467_s3, 8192 }
 0x39e   : > { %p12315_p5 = scmp.ne.s32.totalorder %s15410_s19, %s12314_s28  ;;  %p12319_p9 = scmp.lt.u32.totalorder %s15410_s19, %s15467_s3 }
 0x39f   : > { %p12320_p10 = scmp.lt.u32.totalorder %s12318_s4, %s12314_s28  ;;  %p12322_p12 = scmp.lt.u32.totalorder %s12314_s28, %s15410_s19 }
 0x3a0   : > { %p12316_p6 = pnand %p12315_p5, %p12444_p4 }
 0x3a1   : > { %p12321_p11 = por %p12320_p10, %p12319_p9 }
 0x3a2   : > { %p12317_p7 = pneg %p12316_p6 }
 0x3a3   : > { %p12323_p13 = por %p12322_p12, %p12321_p11 }
 0x3a5   : > { %p12324_p0 = pnand %p12323_p13, %p12317_p7 }
 0x3a7   : > { %12327 = shalt.err (!%p12324_p0)
}
 0x3a8   : > { %s12382_s7 = smov 64   ;;  %s12383_s8 = smov 4  }
 0x3a9   : > { %11947 = dma.vmem_to_hbm [thread:$0]  (%p12444_p4), %s15412_s10, 4096, %s15410_s19, %s15418_s15, %s12382_s7, %s12382_s7, %s12383_s8  }
 0x3aa PF: > { %p11953_p1 = scmp.ge.s32.totalorder %s12378_s17, 2  ;;  %s9179_s9 = sand.u32 1, %s12358_s12  }
 0x3ab   : > { %s9180_s11 = scalar_lea.sflag [#allocation3], %s9179_s9 }
 0x3ac   : > { %p11950_p2 = pnand %p11953_p1, %p12451_p8 }
 0x3ae   : > { %12353 = dma.done.wait (!%p11950_p2), %s9180_s11, 4096  }
 0x3af   : > { %12355 = vsyncadd (!%p11950_p2), %s9180_s11, 4294963200  ;;  %s16_s17 = sadd.s32 1, %s12378_s17   ;;  %s15512_s12 = smov %s12362_s13 }
 0x3b0   : > { %p13_p3 = scmp.ge.s32.totalorder %s16_s17, 4   ;;  %s15513_s13 = smov %s12366_s14 }
 0x3b1   : > { %s15514_s14 = smov %s12457_s25  ;;  %s15515_s15 = smov %s12374_s16 }
 0x3b2   : > { %s15516_s16 = smov %s15518_s20  ;;  %15 = sbr.rel (!%p13_p3) target bundleno = 4 (0x4), region = 78 }
 0x3b9   :  { %9185 = vsyncpa [#allocation3], 1 }
 0x3ba   :  { %9187 = vsyncpa [#allocation3 + $0x1], 1 }

</bundles_post_ra>
